<compile_context>
chip_gen: v6e
topology: v6e:2x2x1
jax: 0.10.0
libtpu: 0.0.40
codegen_flags: <defaults>
</compile_context>

<pallas_src>
import jax
import jax.numpy as jnp
from jax.experimental import pallas as pl
from jax.experimental.pallas import tpu as pltpu

LATENT_DIM = 100
LATENT_PAD = 128        # K of the first matmul padded to a lane multiple
OUT_DIM = 784
OUT_PAD = 896           # 7 * 128, lane-aligned final feature width
BN_EPS = 1e-5
LEAK = 0.2


def _leaky_relu(x):
    return jnp.where(x >= 0, x, LEAK * x)


def _bn_leaky(h, gamma, beta):
    """Training-mode BatchNorm1d (biased variance) fused with LeakyReLU.

    Normalization is applied as a single per-feature FMA:
        c = h - mean;  h = c * (rsqrt(var+eps)*gamma) + beta
    """
    mean = jnp.mean(h, axis=0, keepdims=True)
    c = h - mean
    var = jnp.mean(c * c, axis=0, keepdims=True)
    scale = jax.lax.rsqrt(var + BN_EPS) * gamma      # (1, F)
    return _leaky_relu(c * scale + beta)             # FMA on the (B, F) tile


def _mdot(a, w):
    """bf16 x bf16 on the MXU with f32 accumulation."""
    return jnp.dot(a.astype(jnp.bfloat16), w, preferred_element_type=jnp.float32)


def generator_kernel(z_ref, w1_ref, w2_ref, w3_hbm, w4_hbm, w5_hbm, vec_ref,
                     out_ref, w3_vm, w4_vm, w5_vm, dma_sem):
    # vec_ref layout (rows of an (8, 1024) f32 slab):
    #   0: b1[:128]   1: g2[:256]   2: be2[:256]  3: g3[:512]
    #   4: be3[:512]  5: g4[:1024]  6: be4[:1024] 7: b5[:896]

    # Kick off the three large weight DMAs immediately so they overlap the
    # first two layers' compute (they are waited on just before use).
    cp3 = pltpu.make_async_copy(w3_hbm, w3_vm, dma_sem.at[0])
    cp4 = pltpu.make_async_copy(w4_hbm, w4_vm, dma_sem.at[1])
    cp5 = pltpu.make_async_copy(w5_hbm, w5_vm, dma_sem.at[2])
    cp3.start()
    cp4.start()
    cp5.start()

    x = z_ref[...]                                   # (B, 128) f32, zero-padded K

    # Linear(128pad, 128) + bias + LeakyReLU
    h = _mdot(x, w1_ref[...]) + vec_ref[0:1, 0:128]
    h = _leaky_relu(h)

    # Linear(128, 256) [bias cancelled by BN] + BatchNorm + LeakyReLU
    h = _mdot(h, w2_ref[...])
    h = _bn_leaky(h, vec_ref[1:2, 0:256], vec_ref[2:3, 0:256])

    # Linear(256, 512) [bias cancelled by BN] + BatchNorm + LeakyReLU
    cp3.wait()
    h = _mdot(h, w3_vm[...])
    h = _bn_leaky(h, vec_ref[3:4, 0:512], vec_ref[4:5, 0:512])

    # Linear(512, 1024) [bias cancelled by BN] + BatchNorm + LeakyReLU
    cp4.wait()
    h = _mdot(h, w4_vm[...])
    h = _bn_leaky(h, vec_ref[5:6, 0:1024], vec_ref[6:7, 0:1024])

    # Linear(1024, 784 padded to 896) + bias + Tanh
    cp5.wait()
    h = _mdot(h, w5_vm[...]) + vec_ref[7:8, 0:OUT_PAD]
    out_ref[...] = jnp.tanh(h)


def init_params(key):
    """PyTorch-style init: Linear W,b ~ U(-1/sqrt(fan_in), +); BN gamma=1, beta=0.

    Weights are stored in bf16 (what the kernel consumes); per-feature vectors
    stay fp32 and are additionally coalesced into a single (8, 1024) slab.
    w1 is padded with zero rows to K=128 and w5/b5 with zero columns to N=896.
    """
    dims = [(LATENT_DIM, 128), (128, 256), (256, 512), (512, 1024), (1024, OUT_DIM)]
    params = {}
    keys = jax.random.split(key, 2 * len(dims))
    for i, (fin, fout) in enumerate(dims):
        bound = 1.0 / (fin ** 0.5)
        w = jax.random.uniform(keys[2 * i], (fin, fout), jnp.float32, -bound, bound)
        b = jax.random.uniform(keys[2 * i + 1], (1, fout), jnp.float32, -bound, bound)
        params[f"w{i + 1}"] = w
        params[f"b{i + 1}"] = b
    for idx, f in zip((2, 3, 4), (256, 512, 1024)):
        params[f"g{idx}"] = jnp.ones((1, f), jnp.float32)
        params[f"be{idx}"] = jnp.zeros((1, f), jnp.float32)

    # Lane-align the first matmul's K (zero rows) and the last layer's N
    # (zero columns). Both pads are exactly semantics-preserving.
    params["w1"] = jnp.pad(params["w1"], ((0, LATENT_PAD - LATENT_DIM), (0, 0)))
    params["w5"] = jnp.pad(params["w5"], ((0, 0), (0, OUT_PAD - OUT_DIM)))
    params["b5"] = jnp.pad(params["b5"], ((0, 0), (0, OUT_PAD - OUT_DIM)))

    # bf16 weights: halves weight DMA traffic, native MXU bf16 rate.
    for i in range(1, 6):
        params[f"w{i}"] = params[f"w{i}"].astype(jnp.bfloat16)

    # Coalesce every per-feature vector the kernel needs into one slab
    # (b2/b3/b4 are intentionally omitted: training-mode BN cancels them).
    vec = jnp.zeros((8, 1024), jnp.float32)
    vec = vec.at[0, :128].set(params["b1"][0])
    vec = vec.at[1, :256].set(params["g2"][0])
    vec = vec.at[2, :256].set(params["be2"][0])
    vec = vec.at[3, :512].set(params["g3"][0])
    vec = vec.at[4, :512].set(params["be3"][0])
    vec = vec.at[5, :1024].set(params["g4"][0])
    vec = vec.at[6, :1024].set(params["be4"][0])
    vec = vec.at[7, :OUT_PAD].set(params["b5"][0])
    params["vec"] = vec
    return params


def _pad_latent(z):
    return jnp.pad(z, ((0, 0), (0, LATENT_PAD - LATENT_DIM)))


def generator_forward(z, params):
    B = z.shape[0]
    z_p = _pad_latent(z)
    args = (z_p, params["w1"], params["w2"], params["w3"], params["w4"],
            params["w5"], params["vec"])
    vmem = pl.BlockSpec(memory_space=pltpu.MemorySpace.VMEM)
    hbm = pl.BlockSpec(memory_space=pl.ANY)     # manual DMA targets
    out = pl.pallas_call(
        generator_kernel,
        out_shape=jax.ShapeDtypeStruct((B, OUT_PAD), jnp.float32),
        in_specs=[vmem, vmem, vmem, hbm, hbm, hbm, vmem],
        out_specs=vmem,
        scratch_shapes=[
            pltpu.VMEM((256, 512), jnp.bfloat16),       # w3 staging
            pltpu.VMEM((512, 1024), jnp.bfloat16),      # w4 staging
            pltpu.VMEM((1024, OUT_PAD), jnp.bfloat16),  # w5 staging
            pltpu.SemaphoreType.DMA((3,)),
        ],
        # Actual footprint ~3.3 MiB; 32 MiB fits every TPU generation
        # (incl. v7x's 64 MiB physical VMEM) with ample headroom.
        compiler_params=pltpu.CompilerParams(vmem_limit_bytes=32 * 1024 * 1024),
    )(*args)
    # Negligible at small batch; at large batch fold this slice into the
    # consumer (or hand back the padded slab) to avoid a second output pass.
    return out[:, :OUT_DIM]


def generator_forward_ref(z, params):
    """Pure-JAX mirror of the kernel math (bf16 matmul operands, f32 accum)."""
    z_p = _pad_latent(z)
    h = _leaky_relu(_mdot(z_p, params["w1"]) + params["b1"])
    for i in (2, 3, 4):
        h = _mdot(h, params[f"w{i}"])
        h = _bn_leaky(h, params[f"g{i}"], params[f"be{i}"])
    h = _mdot(h, params["w5"]) + params["b5"]
    return jnp.tanh(h)[:, :OUT_DIM]


def generator_forward_module_ref(z, params):
    """Literal fp32 module semantics (incl. the Linear biases before BN)."""
    def w(i):
        return params[f"w{i}"].astype(jnp.float32)

    h = _pad_latent(z) @ w(1) + params["b1"]
    h = jnp.where(h >= 0, h, LEAK * h)
    for i in (2, 3, 4):
        h = h @ w(i) + params[f"b{i}"]
        mean = jnp.mean(h, axis=0, keepdims=True)
        var = jnp.mean((h - mean) ** 2, axis=0, keepdims=True)
        h = (h - mean) / jnp.sqrt(var + BN_EPS) * params[f"g{i}"] + params[f"be{i}"]
        h = jnp.where(h >= 0, h, LEAK * h)
    h = h @ w(5) + params["b5"]
    return jnp.tanh(h)[:, :OUT_DIM]


if __name__ == "__main__":
    key = jax.random.PRNGKey(0)
    pkey, zkey = jax.random.split(key)
    params = init_params(pkey)

    B = 8
    z = jax.random.normal(zkey, (B, LATENT_DIM), jnp.float32)

    out = jax.block_until_ready(generator_forward(z, params))
    assert out.shape == (B, OUT_DIM), out.shape

    # Tight check against the exact mixed-precision math the kernel performs.
    ref = generator_forward_ref(z, params)
    err = float(jnp.max(jnp.abs(out - ref)))
    assert jnp.allclose(out, ref, atol=5e-3, rtol=5e-3), err

    # Looser check against literal fp32 module semantics (bias-before-BN kept),
    # demonstrating the bias-drop / BN-fusion / padding are semantics-preserving
    # up to bf16 weight/activation rounding.
    ref32 = generator_forward_module_ref(z, params)
    err32 = float(jnp.max(jnp.abs(out - ref32)))
    assert jnp.allclose(out, ref32, atol=6e-2, rtol=6e-2), err32

    print("KERNEL_OK")
</pallas_src>

<mosaic_0001>
module attributes {stable_mosaic.version = 11 : i64} {
  func.func @generator_kernel(%arg0: memref<8x128xf32, #tpu.memory_space<vmem>>, %arg1: memref<128x128xbf16, #tpu.memory_space<vmem>>, %arg2: memref<128x256xbf16, #tpu.memory_space<vmem>>, %arg3: memref<256x512xbf16, #tpu.memory_space<any>>, %arg4: memref<512x1024xbf16, #tpu.memory_space<any>>, %arg5: memref<1024x896xbf16, #tpu.memory_space<any>>, %arg6: memref<8x1024xf32, #tpu.memory_space<vmem>>, %arg7: memref<8x896xf32, #tpu.memory_space<vmem>>, %arg8: memref<256x512xbf16, #tpu.memory_space<vmem>>, %arg9: memref<512x1024xbf16, #tpu.memory_space<vmem>>, %arg10: memref<1024x896xbf16, #tpu.memory_space<vmem>>, %arg11: memref<3x!tpu.dma_semaphore, #tpu.memory_space<semaphore_mem>>) attributes {dimension_semantics = [], scalar_prefetch = 0 : i64, scratch_operands = 4 : i64, tpu.core_type = #tpu.core_type<tc>} {
    %c0_i32 = arith.constant 0 : i32
    %0 = tpu.memref_slice %arg11[%c0_i32] : memref<3x!tpu.dma_semaphore, #tpu.memory_space<semaphore_mem>> -> memref<1x!tpu.dma_semaphore, #tpu.memory_space<semaphore_mem>>
    %1 = tpu.memref_squeeze %0 : memref<1x!tpu.dma_semaphore, #tpu.memory_space<semaphore_mem>> -> memref<!tpu.dma_semaphore, #tpu.memory_space<semaphore_mem>>
    tpu.enqueue_dma source(%arg3 : memref<256x512xbf16, #tpu.memory_space<any>>) target(%arg8 : memref<256x512xbf16, #tpu.memory_space<vmem>>) target_semaphore(%1 : memref<!tpu.dma_semaphore, #tpu.memory_space<semaphore_mem>>)
    %c1_i32 = arith.constant 1 : i32
    %2 = tpu.memref_slice %arg11[%c1_i32] : memref<3x!tpu.dma_semaphore, #tpu.memory_space<semaphore_mem>> -> memref<1x!tpu.dma_semaphore, #tpu.memory_space<semaphore_mem>>
    %3 = tpu.memref_squeeze %2 : memref<1x!tpu.dma_semaphore, #tpu.memory_space<semaphore_mem>> -> memref<!tpu.dma_semaphore, #tpu.memory_space<semaphore_mem>>
    tpu.enqueue_dma source(%arg4 : memref<512x1024xbf16, #tpu.memory_space<any>>) target(%arg9 : memref<512x1024xbf16, #tpu.memory_space<vmem>>) target_semaphore(%3 : memref<!tpu.dma_semaphore, #tpu.memory_space<semaphore_mem>>)
    %c2_i32 = arith.constant 2 : i32
    %4 = tpu.memref_slice %arg11[%c2_i32] : memref<3x!tpu.dma_semaphore, #tpu.memory_space<semaphore_mem>> -> memref<1x!tpu.dma_semaphore, #tpu.memory_space<semaphore_mem>>
    %5 = tpu.memref_squeeze %4 : memref<1x!tpu.dma_semaphore, #tpu.memory_space<semaphore_mem>> -> memref<!tpu.dma_semaphore, #tpu.memory_space<semaphore_mem>>
    tpu.enqueue_dma source(%arg5 : memref<1024x896xbf16, #tpu.memory_space<any>>) target(%arg10 : memref<1024x896xbf16, #tpu.memory_space<vmem>>) target_semaphore(%5 : memref<!tpu.dma_semaphore, #tpu.memory_space<semaphore_mem>>)
    %c0 = arith.constant 0 : index
    %c0_0 = arith.constant 0 : index
    %6 = vector.load %arg0[%c0, %c0_0] : memref<8x128xf32, #tpu.memory_space<vmem>>, vector<8x128xf32>
    %c0_1 = arith.constant 0 : index
    %c0_2 = arith.constant 0 : index
    %7 = vector.load %arg1[%c0_1, %c0_2] : memref<128x128xbf16, #tpu.memory_space<vmem>>, vector<128x128xbf16>
    %8 = arith.truncf %6 : vector<8x128xf32> to vector<8x128xbf16>
    %cst = arith.constant dense<0.000000e+00> : vector<8x128xf32>
    %9 = tpu.matmul %8, %7, %cst {dimension_numbers = #tpu.dot_dimension_numbers<[1], [0], [0], [1], [0, 0, 1, 1], [], []>} : vector<8x128xbf16>, vector<128x128xbf16>, vector<8x128xf32> -> vector<8x128xf32>
    %c0_3 = arith.constant 0 : index
    %c0_4 = arith.constant 0 : index
    %10 = vector.load %arg6[%c0_3, %c0_4] : memref<8x1024xf32, #tpu.memory_space<vmem>>, vector<1x128xf32>
    %11 = vector.broadcast %10 : vector<1x128xf32> to vector<8x128xf32>
    %12 = arith.addf %9, %11 : vector<8x128xf32>
    %cst_5 = arith.constant 0.000000e+00 : f32
    %13 = vector.broadcast %cst_5 : f32 to vector<8x128xf32>
    %14 = arith.cmpf oge, %12, %13 : vector<8x128xf32>
    %cst_6 = arith.constant 2.000000e-01 : f32
    %15 = vector.broadcast %cst_6 : f32 to vector<8x128xf32>
    %16 = arith.mulf %15, %12 : vector<8x128xf32>
    %17 = arith.select %14, %12, %16 : vector<8x128xi1>, vector<8x128xf32>
    %c0_7 = arith.constant 0 : index
    %c0_8 = arith.constant 0 : index
    %18 = vector.load %arg2[%c0_7, %c0_8] : memref<128x256xbf16, #tpu.memory_space<vmem>>, vector<128x256xbf16>
    %19 = arith.truncf %17 : vector<8x128xf32> to vector<8x128xbf16>
    %cst_9 = arith.constant dense<0.000000e+00> : vector<8x256xf32>
    %20 = tpu.matmul %19, %18, %cst_9 {dimension_numbers = #tpu.dot_dimension_numbers<[1], [0], [0], [1], [0, 0, 1, 1], [], []>} : vector<8x128xbf16>, vector<128x256xbf16>, vector<8x256xf32> -> vector<8x256xf32>
    %c1 = arith.constant 1 : index
    %c0_10 = arith.constant 0 : index
    %21 = vector.load %arg6[%c1, %c0_10] : memref<8x1024xf32, #tpu.memory_space<vmem>>, vector<1x256xf32>
    %c2 = arith.constant 2 : index
    %c0_11 = arith.constant 0 : index
    %22 = vector.load %arg6[%c2, %c0_11] : memref<8x1024xf32, #tpu.memory_space<vmem>>, vector<1x256xf32>
    %cst_12 = arith.constant dense<0.000000e+00> : vector<256xf32>
    %23 = vector.multi_reduction <add>, %20, %cst_12 [0] : vector<8x256xf32> to vector<256xf32>
    %24 = vector.shape_cast %23 : vector<256xf32> to vector<1x256xf32>
    %cst_13 = arith.constant 8.000000e+00 : f32
    %25 = vector.broadcast %cst_13 : f32 to vector<1x256xf32>
    %26 = arith.divf %24, %25 : vector<1x256xf32>
    %27 = vector.broadcast %26 : vector<1x256xf32> to vector<8x256xf32>
    %28 = arith.subf %20, %27 : vector<8x256xf32>
    %29 = arith.mulf %28, %28 : vector<8x256xf32>
    %cst_14 = arith.constant dense<0.000000e+00> : vector<256xf32>
    %30 = vector.multi_reduction <add>, %29, %cst_14 [0] : vector<8x256xf32> to vector<256xf32>
    %31 = vector.shape_cast %30 : vector<256xf32> to vector<1x256xf32>
    %cst_15 = arith.constant 8.000000e+00 : f32
    %32 = vector.broadcast %cst_15 : f32 to vector<1x256xf32>
    %33 = arith.divf %31, %32 : vector<1x256xf32>
    %cst_16 = arith.constant 9.99999974E-6 : f32
    %34 = vector.broadcast %cst_16 : f32 to vector<1x256xf32>
    %35 = arith.addf %33, %34 : vector<1x256xf32>
    %36 = math.rsqrt %35 : vector<1x256xf32>
    %37 = arith.mulf %36, %21 : vector<1x256xf32>
    %38 = vector.broadcast %37 : vector<1x256xf32> to vector<8x256xf32>
    %39 = arith.mulf %28, %38 : vector<8x256xf32>
    %40 = vector.broadcast %22 : vector<1x256xf32> to vector<8x256xf32>
    %41 = arith.addf %39, %40 : vector<8x256xf32>
    %cst_17 = arith.constant 0.000000e+00 : f32
    %42 = vector.broadcast %cst_17 : f32 to vector<8x256xf32>
    %43 = arith.cmpf oge, %41, %42 : vector<8x256xf32>
    %cst_18 = arith.constant 2.000000e-01 : f32
    %44 = vector.broadcast %cst_18 : f32 to vector<8x256xf32>
    %45 = arith.mulf %44, %41 : vector<8x256xf32>
    %46 = arith.select %43, %41, %45 : vector<8x256xi1>, vector<8x256xf32>
    %c0_i32_19 = arith.constant 0 : i32
    %47 = tpu.memref_slice %arg11[%c0_i32_19] : memref<3x!tpu.dma_semaphore, #tpu.memory_space<semaphore_mem>> -> memref<1x!tpu.dma_semaphore, #tpu.memory_space<semaphore_mem>>
    %48 = tpu.memref_squeeze %47 : memref<1x!tpu.dma_semaphore, #tpu.memory_space<semaphore_mem>> -> memref<!tpu.dma_semaphore, #tpu.memory_space<semaphore_mem>>
    tpu.wait_dma2 semaphore(%48 : memref<!tpu.dma_semaphore, #tpu.memory_space<semaphore_mem>>) src(%arg3 : memref<256x512xbf16, #tpu.memory_space<any>>) dst(%arg8 : memref<256x512xbf16, #tpu.memory_space<vmem>>)
    %c0_20 = arith.constant 0 : index
    %c0_21 = arith.constant 0 : index
    %49 = vector.load %arg8[%c0_20, %c0_21] : memref<256x512xbf16, #tpu.memory_space<vmem>>, vector<256x512xbf16>
    %50 = arith.truncf %46 : vector<8x256xf32> to vector<8x256xbf16>
    %cst_22 = arith.constant dense<0.000000e+00> : vector<8x512xf32>
    %51 = tpu.matmul %50, %49, %cst_22 {dimension_numbers = #tpu.dot_dimension_numbers<[1], [0], [0], [1], [0, 0, 1, 1], [], []>} : vector<8x256xbf16>, vector<256x512xbf16>, vector<8x512xf32> -> vector<8x512xf32>
    %c3 = arith.constant 3 : index
    %c0_23 = arith.constant 0 : index
    %52 = vector.load %arg6[%c3, %c0_23] : memref<8x1024xf32, #tpu.memory_space<vmem>>, vector<1x512xf32>
    %c4 = arith.constant 4 : index
    %c0_24 = arith.constant 0 : index
    %53 = vector.load %arg6[%c4, %c0_24] : memref<8x1024xf32, #tpu.memory_space<vmem>>, vector<1x512xf32>
    %cst_25 = arith.constant dense<0.000000e+00> : vector<512xf32>
    %54 = vector.multi_reduction <add>, %51, %cst_25 [0] : vector<8x512xf32> to vector<512xf32>
    %55 = vector.shape_cast %54 : vector<512xf32> to vector<1x512xf32>
    %cst_26 = arith.constant 8.000000e+00 : f32
    %56 = vector.broadcast %cst_26 : f32 to vector<1x512xf32>
    %57 = arith.divf %55, %56 : vector<1x512xf32>
    %58 = vector.broadcast %57 : vector<1x512xf32> to vector<8x512xf32>
    %59 = arith.subf %51, %58 : vector<8x512xf32>
    %60 = arith.mulf %59, %59 : vector<8x512xf32>
    %cst_27 = arith.constant dense<0.000000e+00> : vector<512xf32>
    %61 = vector.multi_reduction <add>, %60, %cst_27 [0] : vector<8x512xf32> to vector<512xf32>
    %62 = vector.shape_cast %61 : vector<512xf32> to vector<1x512xf32>
    %cst_28 = arith.constant 8.000000e+00 : f32
    %63 = vector.broadcast %cst_28 : f32 to vector<1x512xf32>
    %64 = arith.divf %62, %63 : vector<1x512xf32>
    %cst_29 = arith.constant 9.99999974E-6 : f32
    %65 = vector.broadcast %cst_29 : f32 to vector<1x512xf32>
    %66 = arith.addf %64, %65 : vector<1x512xf32>
    %67 = math.rsqrt %66 : vector<1x512xf32>
    %68 = arith.mulf %67, %52 : vector<1x512xf32>
    %69 = vector.broadcast %68 : vector<1x512xf32> to vector<8x512xf32>
    %70 = arith.mulf %59, %69 : vector<8x512xf32>
    %71 = vector.broadcast %53 : vector<1x512xf32> to vector<8x512xf32>
    %72 = arith.addf %70, %71 : vector<8x512xf32>
    %cst_30 = arith.constant 0.000000e+00 : f32
    %73 = vector.broadcast %cst_30 : f32 to vector<8x512xf32>
    %74 = arith.cmpf oge, %72, %73 : vector<8x512xf32>
    %cst_31 = arith.constant 2.000000e-01 : f32
    %75 = vector.broadcast %cst_31 : f32 to vector<8x512xf32>
    %76 = arith.mulf %75, %72 : vector<8x512xf32>
    %77 = arith.select %74, %72, %76 : vector<8x512xi1>, vector<8x512xf32>
    %c1_i32_32 = arith.constant 1 : i32
    %78 = tpu.memref_slice %arg11[%c1_i32_32] : memref<3x!tpu.dma_semaphore, #tpu.memory_space<semaphore_mem>> -> memref<1x!tpu.dma_semaphore, #tpu.memory_space<semaphore_mem>>
    %79 = tpu.memref_squeeze %78 : memref<1x!tpu.dma_semaphore, #tpu.memory_space<semaphore_mem>> -> memref<!tpu.dma_semaphore, #tpu.memory_space<semaphore_mem>>
    tpu.wait_dma2 semaphore(%79 : memref<!tpu.dma_semaphore, #tpu.memory_space<semaphore_mem>>) src(%arg4 : memref<512x1024xbf16, #tpu.memory_space<any>>) dst(%arg9 : memref<512x1024xbf16, #tpu.memory_space<vmem>>)
    %c0_33 = arith.constant 0 : index
    %c0_34 = arith.constant 0 : index
    %80 = vector.load %arg9[%c0_33, %c0_34] : memref<512x1024xbf16, #tpu.memory_space<vmem>>, vector<512x1024xbf16>
    %81 = arith.truncf %77 : vector<8x512xf32> to vector<8x512xbf16>
    %cst_35 = arith.constant dense<0.000000e+00> : vector<8x1024xf32>
    %82 = tpu.matmul %81, %80, %cst_35 {dimension_numbers = #tpu.dot_dimension_numbers<[1], [0], [0], [1], [0, 0, 1, 1], [], []>} : vector<8x512xbf16>, vector<512x1024xbf16>, vector<8x1024xf32> -> vector<8x1024xf32>
    %c5 = arith.constant 5 : index
    %c0_36 = arith.constant 0 : index
    %83 = vector.load %arg6[%c5, %c0_36] : memref<8x1024xf32, #tpu.memory_space<vmem>>, vector<1x1024xf32>
    %c6 = arith.constant 6 : index
    %c0_37 = arith.constant 0 : index
    %84 = vector.load %arg6[%c6, %c0_37] : memref<8x1024xf32, #tpu.memory_space<vmem>>, vector<1x1024xf32>
    %cst_38 = arith.constant dense<0.000000e+00> : vector<1024xf32>
    %85 = vector.multi_reduction <add>, %82, %cst_38 [0] : vector<8x1024xf32> to vector<1024xf32>
    %86 = vector.shape_cast %85 : vector<1024xf32> to vector<1x1024xf32>
    %cst_39 = arith.constant 8.000000e+00 : f32
    %87 = vector.broadcast %cst_39 : f32 to vector<1x1024xf32>
    %88 = arith.divf %86, %87 : vector<1x1024xf32>
    %89 = vector.broadcast %88 : vector<1x1024xf32> to vector<8x1024xf32>
    %90 = arith.subf %82, %89 : vector<8x1024xf32>
    %91 = arith.mulf %90, %90 : vector<8x1024xf32>
    %cst_40 = arith.constant dense<0.000000e+00> : vector<1024xf32>
    %92 = vector.multi_reduction <add>, %91, %cst_40 [0] : vector<8x1024xf32> to vector<1024xf32>
    %93 = vector.shape_cast %92 : vector<1024xf32> to vector<1x1024xf32>
    %cst_41 = arith.constant 8.000000e+00 : f32
    %94 = vector.broadcast %cst_41 : f32 to vector<1x1024xf32>
    %95 = arith.divf %93, %94 : vector<1x1024xf32>
    %cst_42 = arith.constant 9.99999974E-6 : f32
    %96 = vector.broadcast %cst_42 : f32 to vector<1x1024xf32>
    %97 = arith.addf %95, %96 : vector<1x1024xf32>
    %98 = math.rsqrt %97 : vector<1x1024xf32>
    %99 = arith.mulf %98, %83 : vector<1x1024xf32>
    %100 = vector.broadcast %99 : vector<1x1024xf32> to vector<8x1024xf32>
    %101 = arith.mulf %90, %100 : vector<8x1024xf32>
    %102 = vector.broadcast %84 : vector<1x1024xf32> to vector<8x1024xf32>
    %103 = arith.addf %101, %102 : vector<8x1024xf32>
    %cst_43 = arith.constant 0.000000e+00 : f32
    %104 = vector.broadcast %cst_43 : f32 to vector<8x1024xf32>
    %105 = arith.cmpf oge, %103, %104 : vector<8x1024xf32>
    %cst_44 = arith.constant 2.000000e-01 : f32
    %106 = vector.broadcast %cst_44 : f32 to vector<8x1024xf32>
    %107 = arith.mulf %106, %103 : vector<8x1024xf32>
    %108 = arith.select %105, %103, %107 : vector<8x1024xi1>, vector<8x1024xf32>
    %c2_i32_45 = arith.constant 2 : i32
    %109 = tpu.memref_slice %arg11[%c2_i32_45] : memref<3x!tpu.dma_semaphore, #tpu.memory_space<semaphore_mem>> -> memref<1x!tpu.dma_semaphore, #tpu.memory_space<semaphore_mem>>
    %110 = tpu.memref_squeeze %109 : memref<1x!tpu.dma_semaphore, #tpu.memory_space<semaphore_mem>> -> memref<!tpu.dma_semaphore, #tpu.memory_space<semaphore_mem>>
    tpu.wait_dma2 semaphore(%110 : memref<!tpu.dma_semaphore, #tpu.memory_space<semaphore_mem>>) src(%arg5 : memref<1024x896xbf16, #tpu.memory_space<any>>) dst(%arg10 : memref<1024x896xbf16, #tpu.memory_space<vmem>>)
    %c0_46 = arith.constant 0 : index
    %c0_47 = arith.constant 0 : index
    %111 = vector.load %arg10[%c0_46, %c0_47] : memref<1024x896xbf16, #tpu.memory_space<vmem>>, vector<1024x896xbf16>
    %112 = arith.truncf %108 : vector<8x1024xf32> to vector<8x1024xbf16>
    %cst_48 = arith.constant dense<0.000000e+00> : vector<8x896xf32>
    %113 = tpu.matmul %112, %111, %cst_48 {dimension_numbers = #tpu.dot_dimension_numbers<[1], [0], [0], [1], [0, 0, 1, 1], [], []>} : vector<8x1024xbf16>, vector<1024x896xbf16>, vector<8x896xf32> -> vector<8x896xf32>
    %c7 = arith.constant 7 : index
    %c0_49 = arith.constant 0 : index
    %114 = vector.load %arg6[%c7, %c0_49] : memref<8x1024xf32, #tpu.memory_space<vmem>>, vector<1x896xf32>
    %115 = vector.broadcast %114 : vector<1x896xf32> to vector<8x896xf32>
    %116 = arith.addf %113, %115 : vector<8x896xf32>
    %117 = math.tanh %116 : vector<8x896xf32>
    %c0_50 = arith.constant 0 : index
    %c0_51 = arith.constant 0 : index
    %118 = vector.load %arg7[%c0_50, %c0_51] : memref<8x896xf32, #tpu.memory_space<vmem>>, vector<8x896xf32>
    tpu.vector_store %arg7[%c0_50, %c0_51], %117 {strides = array<i32>} : memref<8x896xf32, #tpu.memory_space<vmem>>, vector<8x896xf32>,
    return
  }
}

</mosaic_0001>

<bundles_post_ra>
// kernel: tpu_custom_call.1
= control target key start
LH: loop header
LB: loop body
LE: loop exit
PB: predicated region body
PF: predicated region fallthrough
CT: control target
= control target key end

     0   :  { %12 = vsyncpa [#allocation7], 0  ;;  %s9076_s0 = inlined_call_operand.hbm [shape: f32[8,128], index: 0, kind: input, shape index: {}]   ;;  %s9077_s1 = inlined_call_operand.hbm [shape: bf16[128,128], index: 1, kind: input, shape index: {}]   ;;  %s9078_s2 = inlined_call_operand.hbm [shape: bf16[128,256], index: 2, kind: input, shape index: {}]   ;;  %s9079_s3 = inlined_call_operand.hbm [shape: bf16[256,512], index: 3, kind: input, shape index: {}]   ;;  %s9080_s4 = inlined_call_operand.hbm [shape: bf16[512,1024], index: 4, kind: input, shape index: {}]   ;;  %s9081_s5 = inlined_call_operand.hbm [shape: bf16[1024,896], index: 5, kind: input, shape index: {}]   ;;  %s9082_s6 = inlined_call_operand.hbm [shape: f32[8,1024], index: 6, kind: input, shape index: {}]   ;;  %s9083_s7 = inlined_call_operand.hbm [shape: f32[8,896], index: 7, kind: output, shape index: {}]  }
   0x1   :  { %13 = vsyncpa [#allocation10], 0 }
   0x2   :  { %14 = vsyncpa [#allocation13], 0 }
   0x3   :  { %15 = vsyncpa [#allocation8], 0  ;;  %s8737_s24 = smov [#allocation9]  }
   0x4   :  { %s31_s25 = sshll.u32 %s8737_s24, 4  ;;  %s32_s25 = int_to_ptr.vmem [resolvable:$true] %s31_s25 }
   0x5   :  { %s8571_s26 = scalar_lea.vmem %s32_s25, 1024  ;;  %p8576_p1 = scmp.lt.s32.totalorder %s32_s25, %s32_s25 }
   0x6   :  { %p8572_p0 = scmp.ne.s32.totalorder %s32_s25, %s8571_s26  ;;  %p8577_p2 = scmp.lt.s32.totalorder %s8571_s26, %s8571_s26 }
   0x8   :  { %p8578_p3 = por %p8577_p2, %p8576_p1 }
   0xa   :  { %p8579_p4 = pnand %p8578_p3, %p8572_p0 }
   0xc   :  { %8582 = shalt.err (!%p8579_p4)
}
   0xd   :  { %s8738_s27 = smov 64   ;;  %s8739_s28 = smov 4  }
   0xe   :  { %37 = dma.hbm_to_vmem [thread:$0]  %s9077_s1, 1024, %s32_s25, [#allocation10], %s8738_s27, %s8738_s27, %s8739_s28  }
   0xf   :  { %s8740_s8 = smov [#allocation6]   ;;  %s8741_s10 = smov [#allocation11]  }
  0x10   :  { %s22_s9 = sshll.u32 %s8740_s8, 4  ;;  %s43_s11 = sshll.u32 %s8741_s10, 4  ;;  %s23_s9 = int_to_ptr.vmem [resolvable:$true] %s22_s9  ;;  %s44_s11 = int_to_ptr.vmem [resolvable:$true] %s43_s11 }
  0x11   :  { %s8591_s12 = scalar_lea.vmem %s23_s9, 128  ;;  %p8596_p6 = scmp.lt.s32.totalorder %s23_s9, %s23_s9 }
  0x12   :  { %p8592_p5 = scmp.ne.s32.totalorder %s23_s9, %s8591_s12  ;;  %p8597_p7 = scmp.lt.s32.totalorder %s8591_s12, %s8591_s12 }
  0x14   :  { %p8598_p8 = por %p8597_p7, %p8596_p6 }
  0x16   :  { %p8599_p9 = pnand %p8598_p8, %p8592_p5 }
  0x18   :  { %8602 = shalt.err (!%p8599_p9)
}
  0x19   :  { %25 = dma.hbm_to_vmem [thread:$0]  %s9076_s0, 128, %s23_s9, [#allocation7]  }
  0x1a   :  { %s8611_s15 = scalar_lea.vmem %s44_s11, 2048  ;;  %p8616_p11 = scmp.lt.s32.totalorder %s44_s11, %s44_s11 }
  0x1b   :  { %p8612_p10 = scmp.ne.s32.totalorder %s44_s11, %s8611_s15  ;;  %p8617_p12 = scmp.lt.s32.totalorder %s8611_s15, %s8611_s15 }
  0x1d   :  { %p8618_p13 = por %p8617_p12, %p8616_p11 }
  0x1f   :  { %p8619_p0 = pnand %p8618_p13, %p8612_p10 }
  0x21   :  { %8622 = shalt.err (!%p8619_p0)
}
  0x22   :  { %s8742_s1 = smov 128   ;;  %s8743_s16 = smov 8  }
  0x23   :  { %49 = dma.hbm_to_vmem [thread:$0]  %s9078_s2, 2048, %s44_s11, [#allocation10], %s8742_s1, %s8742_s1, %s8743_s16  }
  0x24   :  { %s8744_s19 = smov [#allocation12]  }
  0x25   :  { %s56_s20 = sshll.u32 %s8744_s19, 4  ;;  %s57_s20 = int_to_ptr.vmem [resolvable:$true] %s56_s20 }
  0x26   :  { %s8631_s21 = scalar_lea.vmem %s57_s20, 1024  ;;  %p8636_p2 = scmp.lt.s32.totalorder %s57_s20, %s57_s20 }
  0x27   :  { %p8632_p1 = scmp.ne.s32.totalorder %s57_s20, %s8631_s21  ;;  %p8637_p3 = scmp.lt.s32.totalorder %s8631_s21, %s8631_s21 }
  0x29   :  { %p8638_p4 = por %p8637_p3, %p8636_p2 }
  0x2b   :  { %p8639_p5 = pnand %p8638_p4, %p8632_p1 }
  0x2d   :  { %8642 = shalt.err (!%p8639_p5)
}
  0x2e   :  { %59 = dma.hbm_to_vmem [thread:$0]  %s9082_s6, 1024, %s57_s20, [#allocation13]  }
  0x2f   :  { %8723 = dma.done.wait [#allocation7], 128  }
  0x30   :  { %8724 = vsyncadd [#allocation7], 4294967168 }
  0x31   :  { %8725 = dma.done.wait [#allocation10], 3072  }
  0x32   :  { %8726 = vsyncadd [#allocation10], 4294964224 }
  0x33   :  { %8727 = dma.done.wait [#allocation13], 1024  }
  0x34   :  { %8728 = vsyncadd [#allocation13], 4294966272  ;;  %v8745_v0 = vmov 0.0   ;;  %vm8746_vm0 = vmmov 0   ;;  %v7753_v1 = vld [vmem:[#allocation9 + $0x38] sm:$0xff]   ;;  %v7754_v2 = vld [vmem:[#allocation9 + $0x30] sm:$0xff]  }
  0x35   :  { %7718 = vmatprep.subr.bf16.mxu0 %v8745_v0  ;;  %7734 = vmatprep.mubr.msk.bf16.mxu0 %vm8746_vm0, %v8745_v0  ;;  %v7755_v3 = vld [vmem:[#allocation9 + $0x28] sm:$0xff]   ;;  %v7761_v4 = vld [vmem:[#allocation11 + $0x74] ss:$8 sps:$4 sm:$0xff]   ;;  %v7763_v5 = vld [vmem:[#allocation11 + $0x70] ss:$8 sps:$4 sm:$0xff]   ;;  %v8747_v27 = vmov 0  }
  0x36   :  { %7719 = vmatpush3.bf16.msra.mxu0 %v7753_v1  ;;  %v7756_v6 = vld [vmem:[#allocation9 + $0x20] sm:$0xff]   ;;  %315 = vmatprep.subr.bf16.mxu1 %v7761_v4  ;;  %v7767_v9 = vld [vmem:[#allocation11 + $0x54] ss:$8 sps:$4 sm:$0xff]   ;;  %v7769_v11 = vld [vmem:[#allocation11 + $0x50] ss:$8 sps:$4 sm:$0xff]   ;;  %s8748_s2 = smov [#allocation2]  }
  0x37   :  { %7720 = vmatprep.subr.bf16.mxu0 %v8745_v0  ;;  %v7764_v7 = vld [vmem:[#allocation11 + $0x64] ss:$8 sps:$4 sm:$0xff]   ;;  %316 = vmatpush1.bf16.msra.mxu1 %v7763_v5  ;;  %v7766_v8 = vld [vmem:[#allocation11 + $0x60] ss:$8 sps:$4 sm:$0xff]   ;;  %v7757_v10 = vld [vmem:[#allocation9 + $0x18] sm:$0xff]   ;;  %s80_s6 = sshll.u32 %s8748_s2, 4  ;;  %s81_s6 = int_to_ptr.vmem [resolvable:$true] %s80_s6 }
  0x38   :  { %317 = vmatprep.subr.bf16.mxu1 %v7764_v7  ;;  %v7770_v12 = vld [vmem:[#allocation11 + $0x44] ss:$8 sps:$4 sm:$0xff]   ;;  %v7758_v13 = vld [vmem:[#allocation9 + $0x10] sm:$0xff]   ;;  %v7772_v14 = vld [vmem:[#allocation11 + $0x40] ss:$8 sps:$4 sm:$0xff]   ;;  %347 = vmatprep.mubr.bf16.mxu1 %v8747_v27  ;;  %s8749_s23 = smov [#allocation3]   ;;  %p8656_p7 = scmp.lt.s32.totalorder %s81_s6, %s81_s6 }
  0x39   :  { %v7773_v15 = vld [vmem:[#allocation11 + $0x34] ss:$8 sps:$4 sm:$0xff]   ;;  %v7759_v16 = vld [vmem:[#allocation9 + $0x8] sm:$0xff]   ;;  %v7775_v17 = vld [vmem:[#allocation11 + $0x30] ss:$8 sps:$4 sm:$0xff]   ;;  %s92_s24 = sshll.u32 %s8749_s23, 4  ;;  %s93_s24 = int_to_ptr.vmem [resolvable:$true] %s92_s24 }
  0x3a   :  { %7721 = vmatpush3.bf16.msra.mxu0 %v7754_v2  ;;  %v7776_v18 = vld [vmem:[#allocation11 + $0x24] ss:$8 sps:$4 sm:$0xff]   ;;  %v108_v20 = vld [vmem:[#allocation6] sm:$0xff]  ;;  %v7778_v21 = vld [vmem:[#allocation11 + $0x20] ss:$8 sps:$4 sm:$0xff]   ;;  %s8651_s25 = scalar_lea.vmem %s81_s6, 8192 }
  0x3b   :  { %7722 = vmatprep.subr.bf16.mxu0 %v8745_v0  ;;  %318 = vmatpush1.bf16.msra.mxu1 %v7766_v8  ;;  %v7760_v19 = vld [vmem:[#allocation9] sm:$0xff]   ;;  %v125_v22 = vpack.c.bf16 %v108_v20, %v108_v20  ;;  %v7779_v23 = vld [vmem:[#allocation11 + $0x14] ss:$8 sps:$4 sm:$0xff]   ;;  %v7781_v24 = vld [vmem:[#allocation11 + $0x10] ss:$8 sps:$4 sm:$0xff]   ;;  %p8652_p6 = scmp.ne.s32.totalorder %s81_s6, %s8651_s25  ;;  %p8657_p8 = scmp.lt.s32.totalorder %s8651_s25, %s8651_s25 }
  0x3c   :  { %319 = vmatprep.subr.bf16.mxu1 %v7767_v9  ;;  %v7782_v25 = vld [vmem:[#allocation11 + $0x4] ss:$8 sps:$4 sm:$0xff]   ;;  %v7784_v26 = vld [vmem:[#allocation11] ss:$8 sps:$4 sm:$0xff]  }
  0x3d   :  { %v126_v28 = vld [vmem:[#allocation12] ss:$0 sm:$0xff]  ;;  %p8658_p9 = por %p8657_p8, %p8656_p7 }
  0x3e   :  { %7723 = vmatpush3.bf16.msra.mxu0 %v7755_v3 }
  0x3f   :  { %7724 = vmatprep.subr.bf16.mxu0 %v8745_v0  ;;  %320 = vmatpush1.bf16.msra.mxu1 %v7769_v11  ;;  %p8659_p10 = pnand %p8658_p9, %p8652_p6 }
  0x40   :  { %321 = vmatprep.subr.bf16.mxu1 %v7770_v12 }
  0x42   :  { %7725 = vmatpush3.bf16.msra.mxu0 %v7756_v6 }
  0x43   :  { %7726 = vmatprep.subr.bf16.mxu0 %v8745_v0  ;;  %322 = vmatpush1.bf16.msra.mxu1 %v7772_v14 }
  0x44   :  { %323 = vmatprep.subr.bf16.mxu1 %v7773_v15 }
  0x46   :  { %7727 = vmatpush3.bf16.msra.mxu0 %v7757_v10 }
  0x47   :  { %7728 = vmatprep.subr.bf16.mxu0 %v8745_v0  ;;  %324 = vmatpush1.bf16.msra.mxu1 %v7775_v17 }
  0x48   :  { %325 = vmatprep.subr.bf16.mxu1 %v7776_v18 }
  0x4a   :  { %7729 = vmatpush3.bf16.msra.mxu0 %v7758_v13 }
  0x4b   :  { %7730 = vmatprep.subr.bf16.mxu0 %v8745_v0  ;;  %326 = vmatpush1.bf16.msra.mxu1 %v7778_v21 }
  0x4c   :  { %327 = vmatprep.subr.bf16.mxu1 %v7779_v23 }
  0x4e   :  { %7731 = vmatpush3.bf16.msra.mxu0 %v7759_v16 }
  0x4f   :  { %7732 = vmatprep.subr.bf16.mxu0 %v8745_v0  ;;  %328 = vmatpush1.bf16.msra.mxu1 %v7781_v24 }
  0x50   :  { %329 = vmatprep.subr.bf16.mxu1 %v7782_v25 }
  0x52   :  { %7733 = vmatpush3.bf16.msra.mxu0 %v7760_v19 }
  0x53   :  { %330 = vmatpush1.bf16.msra.mxu1 %v7784_v26 }
  0x55   :  { %7735 = vmatmul.mubr.bf16.vlgmr.msra.gmra.mxu0 %v125_v22 }
 0x115   :  { %v209_v29 = vpop.f32.mrf.mxu0 }
 0x116   :  { %v210_v30 = vadd.f32 %v209_v29, %v126_v28 }
 0x117   :  { %v7736_v31 = vpop.f32.mrf.mxu0 }
 0x118   :  { %vm215_vm1 = vcmp.ge.f32.partialorder %v210_v30, 0.0  ;;  %v216_v32 = vmul.f32 0.2, %v210_v30 }
 0x119   :  { %v212_v33 = vpop.f32.mrf.mxu0 }
 0x11a   :  { %v217_v34 = vsel %vm215_vm1, %v210_v30, %v216_v32 }
 0x11b   :  { %v7737_v35 = vpop.f32.mrf.mxu0  ;;  %v234_v36 = vpack.c.bf16 %v217_v34, %v217_v34 }
 0x11d   :  { %348 = vmatmul.mubr.bf16.vlgmr.msra.gmra.mxu1 %v234_v36 }
 0x11e   :  { %8662 = shalt.err (!%p8659_p10)  }
 0x11f   :  { %83 = dma.hbm_to_vmem [thread:$0]  %s9079_s3, 8192, %s81_s6, [#allocation5] }
 0x120   :  { %s8671_s28 = scalar_lea.vmem %s93_s24, 32768  ;;  %p8676_p12 = scmp.lt.s32.totalorder %s93_s24, %s93_s24 }
 0x121   :  { %p8672_p11 = scmp.ne.s32.totalorder %s93_s24, %s8671_s28  ;;  %p8677_p13 = scmp.lt.s32.totalorder %s8671_s28, %s8671_s28 }
 0x123   :  { %p8678_p0 = por %p8677_p13, %p8676_p12 }
 0x125   :  { %p8679_p1 = pnand %p8678_p0, %p8672_p11 }
 0x127   :  { %8682 = shalt.err (!%p8679_p1)  }
 0x128   :  { %95 = dma.hbm_to_vmem [thread:$0]  %s9080_s4, 32768, %s93_s24, [#allocation5 + $0x1] }
 0x129   :  { %s8750_s8 = smov [#allocation4]  }
 0x12a   :  { %s104_s9 = sshll.u32 %s8750_s8, 4  ;;  %s105_s9 = int_to_ptr.vmem [resolvable:$true] %s104_s9 }
 0x12b   :  { %s8691_s10 = scalar_lea.vmem %s105_s9, 57344  ;;  %p8696_p3 = scmp.lt.s32.totalorder %s105_s9, %s105_s9 }
 0x12c   :  { %p8692_p2 = scmp.ne.s32.totalorder %s105_s9, %s8691_s10  ;;  %p8697_p4 = scmp.lt.s32.totalorder %s8691_s10, %s8691_s10 }
 0x12e   :  { %p8698_p5 = por %p8697_p4, %p8696_p3 }
 0x130   :  { %p8699_p6 = pnand %p8698_p5, %p8692_p2 }
 0x132   :  { %8702 = shalt.err (!%p8699_p6)  }
 0x133   :  { %107 = dma.hbm_to_vmem [thread:$0]  %s9081_s5, 57344, %s105_s9, [#allocation5 + $0x2]  ;;  %v398_v9 = vlaneseq  ;;  %v357_v14 = vld [vmem:[#allocation12 + $0x1] ss:$8 sm:$0x3] }
 0x134   :  { %v359_v19 = vld [vmem:[#allocation12 + $0x2] ss:$8 sm:$0x3] }
 0x135   :  { %v8813_v12 = vshrl.u32 %v398_v9, 7 }
 0x137   :  { %v8816_v13 = vsub.s32 0, %v8813_v12  ;;  %v8819_v15 = vsub.s32 1, %v8813_v12 }
 0x139   :  { %v401_v16 = vrot.slane %v357_v14, %v8816_v13  ;;  %v405_v17 = vrot.slane %v357_v14, %v8819_v15  ;;  %v424_v23 = vrot.slane %v359_v19, %v8816_v13  ;;  %v428_v27 = vrot.slane %v359_v19, %v8819_v15 }
 0x1dd   :  { %v349_v37 = vpop.f32.mrf.mxu1 }
 0x1de   :  { %v360_v38 = vrot.slane %v349_v37, 4 }
 0x1df   :  { %v351_v39 = vpop.f32.mrf.mxu1 }
 0x1e0   :  { %v361_v40 = vadd.f32 %v360_v38, %v349_v37  ;;  %v366_v41 = vrot.slane %v351_v39, 4 }
 0x1e1   :  { %v353_v42 = vpop.f32.mrf.mxu1 }
 0x1e2   :  { %v362_v43 = vrot.slane %v361_v40, 2  ;;  %v367_v44 = vadd.f32 %v366_v41, %v351_v39 }
 0x1e3   :  { %v354_v45 = vpop.f32.mrf.mxu1 }
 0x1e4   :  { %v363_v46 = vadd.f32 %v362_v43, %v361_v40  ;;  %v368_v47 = vrot.slane %v367_v44, 2 }
 0x1e6   :  { %v364_v48 = vrot.slane %v363_v46, 1  ;;  %v369_v49 = vadd.f32 %v368_v47, %v367_v44 }
 0x1e8   :  { %v365_v50 = vadd.f32 %v364_v48, %v363_v46  ;;  %v370_v51 = vrot.slane %v369_v49, 1 }
 0x1ea   :  { %v373_v52 = vmul.f32 0.125, %v365_v50  ;;  %v371_v53 = vadd.f32 %v370_v51, %v369_v49 }
 0x1ec   :  { %v375_v54 = vsub.f32 %v349_v37, %v373_v52  ;;  %v374_v55 = vmul.f32 0.125, %v371_v53 }
 0x1ee   :  { %v377_v56 = vmul.f32 %v375_v54, %v375_v54  ;;  %v376_v57 = vsub.f32 %v351_v39, %v374_v55 }
 0x1f0   :  { %v379_v58 = vrot.slane %v377_v56, 4  ;;  %v378_v59 = vmul.f32 %v376_v57, %v376_v57 }
 0x1f2   :  { %v380_v60 = vadd.f32 %v379_v58, %v377_v56  ;;  %v385_v61 = vrot.slane %v378_v59, 4 }
 0x1f4   :  { %v381_v62 = vrot.slane %v380_v60, 2  ;;  %v386_v63 = vadd.f32 %v385_v61, %v378_v59 }
 0x1f6   :  { %v382_v0 = vadd.f32 %v381_v62, %v380_v60  ;;  %v387_v1 = vrot.slane %v386_v63, 2 }
 0x1f8   :  { %v383_v2 = vrot.slane %v382_v0, 1  ;;  %v388_v3 = vadd.f32 %v387_v1, %v386_v63 }
 0x1fa   :  { %v384_v4 = vadd.f32 %v383_v2, %v382_v0  ;;  %v389_v5 = vrot.slane %v388_v3, 1 }
 0x1fc   :  { %v391_v6 = vmul.f32 0.125, %v384_v4  ;;  %v390_v7 = vadd.f32 %v389_v5, %v388_v3 }
 0x1fe   :  { %v393_v8 = vadd.f32 1e-05, %v391_v6  ;;  %v392_v10 = vmul.f32 0.125, %v390_v7 }
 0x200   :  { %7785 = vrsqrt.f32 %v393_v8  ;;  %v394_v11 = vadd.f32 1e-05, %v392_v10 }
 0x202   :  { %7787 = vrsqrt.f32 %v394_v11 }
 0x20d   :  { %v7786_v18 = vpop.eup %7785 }
 0x20e   :  { %v408_v20 = vmul.f32 %v7786_v18, %v401_v16 }
 0x20f   :  { %v7788_v21 = vpop.eup %7787 }
 0x210   :  { %v413_v22 = vrot.slane %v408_v20, %v8816_v13  ;;  %v409_v24 = vmul.f32 %v7788_v21, %v405_v17 }
 0x212   :  { %v418_v25 = vmul.f32 %v413_v22, %v375_v54  ;;  %v417_v26 = vrot.slane %v409_v24, %v8816_v13 }
 0x214   :  { %v431_v28 = vadd.f32 %v424_v23, %v418_v25  ;;  %v419_v29 = vmul.f32 %v417_v26, %v376_v57 }
 0x216   :  { %vm433_vm2 = vcmp.ge.f32.partialorder %v431_v28, 0.0  ;;  %v435_v30 = vmul.f32 0.2, %v431_v28  ;;  %v432_v31 = vadd.f32 %v428_v27, %v419_v29 }
 0x218   :  { %v8827_v32 = vsel %vm433_vm2, %v431_v28, %v435_v30  ;;  %vm434_vm3 = vcmp.ge.f32.partialorder %v432_v31, 0.0  ;;  %v436_v33 = vmul.f32 0.2, %v432_v31 }
 0x21a   :  { %v438_v34 = vsel %vm434_vm3, %v432_v31, %v436_v33 }
 0x21b   :  { %8729 = dma.done.wait [#allocation5], 8192 }
 0x21c   :  { %8730 = vsyncadd [#allocation5], 4294959104  ;;  %v508_v35 = vpack.c.bf16 %v438_v34, %v438_v34  ;;  %v7789_v36 = vld [vmem:[#allocation2 + $0xe4] ss:$16 sps:$4 sm:$0xff]   ;;  %v7791_v37 = vld [vmem:[#allocation2 + $0xec] ss:$16 sps:$4 sm:$0xff]  }
 0x21d   :  { %829 = vmatprep.subr.bf16.mxu0 %v7789_v36  ;;  %v7793_v38 = vld [vmem:[#allocation2 + $0xe0] ss:$16 sps:$4 sm:$0xff]   ;;  %v7794_v39 = vld [vmem:[#allocation2 + $0xe8] ss:$16 sps:$4 sm:$0xff]   ;;  %870 = vmatprep.subr.bf16.mxu1 %v7791_v37  ;;  %v7795_v40 = vld [vmem:[#allocation2 + $0xc4] ss:$16 sps:$4 sm:$0xff]  }
 0x21e   :  { %861 = vmatprep.mubr.bf16.mxu0 %v508_v35  ;;  %902 = vmatprep.mubr.bf16.mxu1 %v508_v35  ;;  %v7797_v41 = vld [vmem:[#allocation2 + $0xcc] ss:$16 sps:$4 sm:$0xff]   ;;  %v7799_v42 = vld [vmem:[#allocation2 + $0xc0] ss:$16 sps:$4 sm:$0xff]   ;;  %v7800_v43 = vld [vmem:[#allocation2 + $0xc8] ss:$16 sps:$4 sm:$0xff]  }
 0x21f   :  { %830 = vmatpush1.bf16.msra.mxu0 %v7793_v38  ;;  %871 = vmatpush1.bf16.msra.mxu1 %v7794_v39  ;;  %v7801_v44 = vld [vmem:[#allocation2 + $0xa4] ss:$16 sps:$4 sm:$0xff]   ;;  %v7803_v45 = vld [vmem:[#allocation2 + $0xac] ss:$16 sps:$4 sm:$0xff]   ;;  %v7805_v46 = vld [vmem:[#allocation2 + $0xa0] ss:$16 sps:$4 sm:$0xff]  }
 0x220   :  { %831 = vmatprep.subr.bf16.mxu0 %v7795_v40  ;;  %872 = vmatprep.subr.bf16.mxu1 %v7797_v41  ;;  %v7806_v47 = vld [vmem:[#allocation2 + $0xa8] ss:$16 sps:$4 sm:$0xff]   ;;  %v7807_v48 = vld [vmem:[#allocation2 + $0x84] ss:$16 sps:$4 sm:$0xff]   ;;  %v7809_v49 = vld [vmem:[#allocation2 + $0x8c] ss:$16 sps:$4 sm:$0xff]   ;;  %v507_v40 = vpack.c.bf16 %v8827_v32, %v8827_v32 }
 0x221   :  { %v7811_v50 = vld [vmem:[#allocation2 + $0x80] ss:$16 sps:$4 sm:$0xff]   ;;  %v7812_v51 = vld [vmem:[#allocation2 + $0x88] ss:$16 sps:$4 sm:$0xff]   ;;  %v7813_v52 = vld [vmem:[#allocation2 + $0x64] ss:$16 sps:$4 sm:$0xff]  }
 0x222   :  { %v7815_v53 = vld [vmem:[#allocation2 + $0x6c] ss:$16 sps:$4 sm:$0xff]   ;;  %v7817_v54 = vld [vmem:[#allocation2 + $0x60] ss:$16 sps:$4 sm:$0xff]   ;;  %v7818_v55 = vld [vmem:[#allocation2 + $0x68] ss:$16 sps:$4 sm:$0xff]  }
 0x223   :  { %832 = vmatpush1.bf16.msra.mxu0 %v7799_v42  ;;  %873 = vmatpush1.bf16.msra.mxu1 %v7800_v43  ;;  %v7819_v56 = vld [vmem:[#allocation2 + $0x44] ss:$16 sps:$4 sm:$0xff]   ;;  %v7821_v57 = vld [vmem:[#allocation2 + $0x4c] ss:$16 sps:$4 sm:$0xff]   ;;  %v7823_v58 = vld [vmem:[#allocation2 + $0x40] ss:$16 sps:$4 sm:$0xff]  }
 0x224   :  { %833 = vmatprep.subr.bf16.mxu0 %v7801_v44  ;;  %874 = vmatprep.subr.bf16.mxu1 %v7803_v45  ;;  %v7824_v59 = vld [vmem:[#allocation2 + $0x48] ss:$16 sps:$4 sm:$0xff]   ;;  %v7825_v60 = vld [vmem:[#allocation2 + $0x24] ss:$16 sps:$4 sm:$0xff]   ;;  %v7827_v61 = vld [vmem:[#allocation2 + $0x2c] ss:$16 sps:$4 sm:$0xff]  }
 0x225   :  { %v7829_v62 = vld [vmem:[#allocation2 + $0x20] ss:$16 sps:$4 sm:$0xff]   ;;  %v7830_v63 = vld [vmem:[#allocation2 + $0x28] ss:$16 sps:$4 sm:$0xff]   ;;  %v7831_v0 = vld [vmem:[#allocation2 + $0x4] ss:$16 sps:$4 sm:$0xff]  }
 0x226   :  { %v7833_v1 = vld [vmem:[#allocation2 + $0xc] ss:$16 sps:$4 sm:$0xff]   ;;  %v7835_v2 = vld [vmem:[#allocation2] ss:$16 sps:$4 sm:$0xff]   ;;  %v7836_v3 = vld [vmem:[#allocation2 + $0x8] ss:$16 sps:$4 sm:$0xff]  }
 0x227   :  { %834 = vmatpush1.bf16.msra.mxu0 %v7805_v46  ;;  %875 = vmatpush1.bf16.msra.mxu1 %v7806_v47  ;;  %v7837_v4 = vld [vmem:[#allocation2 + $0x1e4] ss:$16 sps:$4 sm:$0xff]   ;;  %v7839_v5 = vld [vmem:[#allocation2 + $0x1ec] ss:$16 sps:$4 sm:$0xff]   ;;  %v7841_v6 = vld [vmem:[#allocation2 + $0x1e0] ss:$16 sps:$4 sm:$0xff]  }
 0x228   :  { %835 = vmatprep.subr.bf16.mxu0 %v7807_v48  ;;  %876 = vmatprep.subr.bf16.mxu1 %v7809_v49  ;;  %v7842_v7 = vld [vmem:[#allocation2 + $0x1e8] ss:$16 sps:$4 sm:$0xff]   ;;  %v7843_v8 = vld [vmem:[#allocation2 + $0x1c4] ss:$16 sps:$4 sm:$0xff]   ;;  %v7845_v9 = vld [vmem:[#allocation2 + $0x1cc] ss:$16 sps:$4 sm:$0xff]  }
 0x229   :  { %v7847_v10 = vld [vmem:[#allocation2 + $0x1c0] ss:$16 sps:$4 sm:$0xff]   ;;  %v7848_v11 = vld [vmem:[#allocation2 + $0x1c8] ss:$16 sps:$4 sm:$0xff]   ;;  %v7849_v14 = vld [vmem:[#allocation2 + $0x1a4] ss:$16 sps:$4 sm:$0xff]  }
 0x22a   :  { %v7851_v16 = vld [vmem:[#allocation2 + $0x1ac] ss:$16 sps:$4 sm:$0xff]   ;;  %v7853_v17 = vld [vmem:[#allocation2 + $0x1a0] ss:$16 sps:$4 sm:$0xff]   ;;  %v7854_v18 = vld [vmem:[#allocation2 + $0x1a8] ss:$16 sps:$4 sm:$0xff]  }
 0x22b   :  { %836 = vmatpush1.bf16.msra.mxu0 %v7811_v50  ;;  %877 = vmatpush1.bf16.msra.mxu1 %v7812_v51  ;;  %v7855_v19 = vld [vmem:[#allocation2 + $0x184] ss:$16 sps:$4 sm:$0xff]   ;;  %v7857_v20 = vld [vmem:[#allocation2 + $0x18c] ss:$16 sps:$4 sm:$0xff]   ;;  %v7859_v21 = vld [vmem:[#allocation2 + $0x180] ss:$16 sps:$4 sm:$0xff]  }
 0x22c   :  { %837 = vmatprep.subr.bf16.mxu0 %v7813_v52  ;;  %878 = vmatprep.subr.bf16.mxu1 %v7815_v53  ;;  %v7860_v22 = vld [vmem:[#allocation2 + $0x188] ss:$16 sps:$4 sm:$0xff]   ;;  %v7861_v23 = vld [vmem:[#allocation2 + $0x164] ss:$16 sps:$4 sm:$0xff]   ;;  %v7863_v24 = vld [vmem:[#allocation2 + $0x16c] ss:$16 sps:$4 sm:$0xff]  }
 0x22d   :  { %v7865_v25 = vld [vmem:[#allocation2 + $0x160] ss:$16 sps:$4 sm:$0xff]   ;;  %v7866_v26 = vld [vmem:[#allocation2 + $0x168] ss:$16 sps:$4 sm:$0xff]   ;;  %v7867_v27 = vld [vmem:[#allocation2 + $0x144] ss:$16 sps:$4 sm:$0xff]  }
 0x22e   :  { %v7869_v28 = vld [vmem:[#allocation2 + $0x14c] ss:$16 sps:$4 sm:$0xff]   ;;  %v7871_v29 = vld [vmem:[#allocation2 + $0x140] ss:$16 sps:$4 sm:$0xff]   ;;  %v7872_v30 = vld [vmem:[#allocation2 + $0x148] ss:$16 sps:$4 sm:$0xff]  }
 0x22f   :  { %838 = vmatpush1.bf16.msra.mxu0 %v7817_v54  ;;  %879 = vmatpush1.bf16.msra.mxu1 %v7818_v55  ;;  %v7873_v31 = vld [vmem:[#allocation2 + $0x124] ss:$16 sps:$4 sm:$0xff]   ;;  %v7875_v33 = vld [vmem:[#allocation2 + $0x12c] ss:$16 sps:$4 sm:$0xff]   ;;  %v7877_v34 = vld [vmem:[#allocation2 + $0x120] ss:$16 sps:$4 sm:$0xff]  }
 0x230   :  { %839 = vmatprep.subr.bf16.mxu0 %v7819_v56  ;;  %880 = vmatprep.subr.bf16.mxu1 %v7821_v57  ;;  %v7878_v35 = vld [vmem:[#allocation2 + $0x128] ss:$16 sps:$4 sm:$0xff]   ;;  %v7879_v36 = vld [vmem:[#allocation2 + $0x104] ss:$16 sps:$4 sm:$0xff]   ;;  %v7881_v37 = vld [vmem:[#allocation2 + $0x10c] ss:$16 sps:$4 sm:$0xff]  }
 0x231   :  { %v7883_v38 = vld [vmem:[#allocation2 + $0x100] ss:$16 sps:$4 sm:$0xff]   ;;  %v7884_v39 = vld [vmem:[#allocation2 + $0x108] ss:$16 sps:$4 sm:$0xff]  }
 0x233   :  { %840 = vmatpush1.bf16.msra.mxu0 %v7823_v58  ;;  %881 = vmatpush1.bf16.msra.mxu1 %v7824_v59 }
 0x234   :  { %841 = vmatprep.subr.bf16.mxu0 %v7825_v60  ;;  %882 = vmatprep.subr.bf16.mxu1 %v7827_v61 }
 0x237   :  { %842 = vmatpush1.bf16.msra.mxu0 %v7829_v62  ;;  %883 = vmatpush1.bf16.msra.mxu1 %v7830_v63 }
 0x238   :  { %843 = vmatprep.subr.bf16.mxu0 %v7831_v0  ;;  %884 = vmatprep.subr.bf16.mxu1 %v7833_v1 }
 0x23b   :  { %844 = vmatpush1.bf16.msra.mxu0 %v7835_v2  ;;  %885 = vmatpush1.bf16.msra.mxu1 %v7836_v3 }
 0x23c   :  { %845 = vmatprep.subr.bf16.mxu0 %v7837_v4  ;;  %886 = vmatprep.subr.bf16.mxu1 %v7839_v5 }
 0x23f   :  { %846 = vmatpush2.bf16.msra.mxu0 %v7841_v6  ;;  %887 = vmatpush2.bf16.msra.mxu1 %v7842_v7 }
 0x240   :  { %847 = vmatprep.subr.bf16.mxu0 %v7843_v8  ;;  %888 = vmatprep.subr.bf16.mxu1 %v7845_v9 }
 0x243   :  { %848 = vmatpush2.bf16.msra.mxu0 %v7847_v10  ;;  %889 = vmatpush2.bf16.msra.mxu1 %v7848_v11 }
 0x244   :  { %849 = vmatprep.subr.bf16.mxu0 %v7849_v14  ;;  %890 = vmatprep.subr.bf16.mxu1 %v7851_v16 }
 0x247   :  { %850 = vmatpush2.bf16.msra.mxu0 %v7853_v17  ;;  %891 = vmatpush2.bf16.msra.mxu1 %v7854_v18 }
 0x248   :  { %851 = vmatprep.subr.bf16.mxu0 %v7855_v19  ;;  %892 = vmatprep.subr.bf16.mxu1 %v7857_v20 }
 0x24b   :  { %852 = vmatpush2.bf16.msra.mxu0 %v7859_v21  ;;  %893 = vmatpush2.bf16.msra.mxu1 %v7860_v22 }
 0x24c   :  { %853 = vmatprep.subr.bf16.mxu0 %v7861_v23  ;;  %894 = vmatprep.subr.bf16.mxu1 %v7863_v24 }
 0x24f   :  { %854 = vmatpush2.bf16.msra.mxu0 %v7865_v25  ;;  %895 = vmatpush2.bf16.msra.mxu1 %v7866_v26 }
 0x250   :  { %855 = vmatprep.subr.bf16.mxu0 %v7867_v27  ;;  %896 = vmatprep.subr.bf16.mxu1 %v7869_v28 }
 0x253   :  { %856 = vmatpush2.bf16.msra.mxu0 %v7871_v29  ;;  %897 = vmatpush2.bf16.msra.mxu1 %v7872_v30 }
 0x254   :  { %857 = vmatprep.subr.bf16.mxu0 %v7873_v31  ;;  %898 = vmatprep.subr.bf16.mxu1 %v7875_v33 }
 0x257   :  { %858 = vmatpush2.bf16.msra.mxu0 %v7877_v34  ;;  %899 = vmatpush2.bf16.msra.mxu1 %v7878_v35 }
 0x258   :  { %859 = vmatprep.subr.bf16.mxu0 %v7879_v36  ;;  %900 = vmatprep.subr.bf16.mxu1 %v7881_v37 }
 0x25b   :  { %860 = vmatpush2.bf16.msra.mxu0 %v7883_v38  ;;  %901 = vmatpush2.bf16.msra.mxu1 %v7884_v39 }
 0x25e   :  { %862 = vmatmul.mubr.bf16.vlgmr.msra.gmra.mxu0 %v507_v40  ;;  %903 = vmatmul.mubr.bf16.vlgmr.msra.gmra.mxu1 %v507_v40 }
 0x31e   :  { %v863_v41 = vpop.f32.mrf.mxu0  ;;  %v904_v42 = vpop.f32.mrf.mxu1 }
 0x31f   :  { %v915_v43 = vrot.slane %v863_v41, 4  ;;  %v927_v44 = vrot.slane %v904_v42, 4 }
 0x320   :  { %v865_v45 = vpop.f32.mrf.mxu0  ;;  %v906_v46 = vpop.f32.mrf.mxu1 }
 0x321   :  { %v916_v47 = vadd.f32 %v915_v43, %v863_v41  ;;  %v928_v48 = vadd.f32 %v927_v44, %v904_v42  ;;  %v921_v49 = vrot.slane %v865_v45, 4  ;;  %v933_v50 = vrot.slane %v906_v46, 4 }
 0x322   :  { %v867_v51 = vpop.f32.mrf.mxu0  ;;  %v908_v52 = vpop.f32.mrf.mxu1 }
 0x323   :  { %v917_v53 = vrot.slane %v916_v47, 2  ;;  %v929_v54 = vrot.slane %v928_v48, 2  ;;  %v922_v55 = vadd.f32 %v921_v49, %v865_v45  ;;  %v934_v32 = vadd.f32 %v933_v50, %v906_v46 }
 0x324   :  { %v868_v56 = vpop.f32.mrf.mxu0  ;;  %v909_v57 = vpop.f32.mrf.mxu1 }
 0x325   :  { %v918_v58 = vadd.f32 %v917_v53, %v916_v47  ;;  %v930_v59 = vadd.f32 %v929_v54, %v928_v48  ;;  %v923_v60 = vrot.slane %v922_v55, 2  ;;  %v935_v61 = vrot.slane %v934_v32, 2 }
 0x326   :  { %v8848_v56 = vsub.s32 2, %v8813_v12  ;;  %v8851_v57 = vsub.s32 3, %v8813_v12 }
 0x327   :  { %v919_v62 = vrot.slane %v918_v58, 1  ;;  %v931_v63 = vrot.slane %v930_v59, 1  ;;  %v924_v0 = vadd.f32 %v923_v60, %v922_v55  ;;  %v936_v1 = vadd.f32 %v935_v61, %v934_v32  ;;  %v912_v32 = vld [vmem:[#allocation12 + $0x3] ss:$8 sm:$0xf] }
 0x328   :  { %v995_v60 = vrot.slane %v912_v32, %v8819_v15 }
 0x329   :  { %v920_v2 = vadd.f32 %v919_v62, %v918_v58  ;;  %v932_v3 = vadd.f32 %v931_v63, %v930_v59  ;;  %v925_v4 = vrot.slane %v924_v0, 1  ;;  %v937_v5 = vrot.slane %v936_v1, 1  ;;  %v914_v62 = vld [vmem:[#allocation12 + $0x4] ss:$8 sm:$0xf] }
 0x32a   :  { %v991_v58 = vrot.slane %v912_v32, %v8816_v13  ;;  %v999_v59 = vrot.slane %v912_v32, %v8848_v56  ;;  %v1003_v63 = vrot.slane %v912_v32, %v8851_v57 }
 0x32b   :  { %v939_v6 = vmul.f32 0.125, %v920_v2  ;;  %v941_v7 = vmul.f32 0.125, %v932_v3  ;;  %v926_v8 = vadd.f32 %v925_v4, %v924_v0  ;;  %v938_v9 = vadd.f32 %v937_v5, %v936_v1 }
 0x32d   :  { %v8831_v10 = vsub.f32 %v863_v41, %v939_v6  ;;  %v8833_v11 = vsub.f32 %v904_v42, %v941_v7  ;;  %v940_v14 = vmul.f32 0.125, %v926_v8  ;;  %v942_v16 = vmul.f32 0.125, %v938_v9 }
 0x32e   :  { %v1036_v6 = vrot.slane %v914_v62, %v8816_v13  ;;  %v1044_v9 = vrot.slane %v914_v62, %v8848_v56 }
 0x32f   :  { %v947_v17 = vmul.f32 %v8831_v10, %v8831_v10  ;;  %v949_v18 = vmul.f32 %v8833_v11, %v8833_v11  ;;  %v8839_v19 = vsub.f32 %v865_v45, %v940_v14  ;;  %v8841_v20 = vsub.f32 %v906_v46, %v942_v16 }
 0x331   :  { %v951_v21 = vrot.slane %v947_v17, 4  ;;  %v963_v22 = vrot.slane %v949_v18, 4  ;;  %v948_v23 = vmul.f32 %v8839_v19, %v8839_v19  ;;  %v950_v24 = vmul.f32 %v8841_v20, %v8841_v20 }
 0x333   :  { %v952_v25 = vadd.f32 %v951_v21, %v947_v17  ;;  %v964_v26 = vadd.f32 %v963_v22, %v949_v18  ;;  %v957_v27 = vrot.slane %v948_v23, 4  ;;  %v969_v28 = vrot.slane %v950_v24, 4 }
 0x334   :  { %v1040_v18 = vrot.slane %v914_v62, %v8819_v15 }
 0x335   :  { %v953_v29 = vrot.slane %v952_v25, 2  ;;  %v965_v30 = vrot.slane %v964_v26, 2  ;;  %v958_v31 = vadd.f32 %v957_v27, %v948_v23  ;;  %v970_v33 = vadd.f32 %v969_v28, %v950_v24 }
 0x336   :  { %v1048_v23 = vrot.slane %v914_v62, %v8851_v57 }
 0x337   :  { %v954_v34 = vadd.f32 %v953_v29, %v952_v25  ;;  %v966_v35 = vadd.f32 %v965_v30, %v964_v26  ;;  %v959_v36 = vrot.slane %v958_v31, 2  ;;  %v971_v37 = vrot.slane %v970_v33, 2 }
 0x339   :  { %v955_v38 = vrot.slane %v954_v34, 1  ;;  %v967_v39 = vrot.slane %v966_v35, 1  ;;  %v960_v40 = vadd.f32 %v959_v36, %v958_v31  ;;  %v972_v41 = vadd.f32 %v971_v37, %v970_v33 }
 0x33b   :  { %v956_v42 = vadd.f32 %v955_v38, %v954_v34  ;;  %v968_v43 = vadd.f32 %v967_v39, %v966_v35  ;;  %v961_v44 = vrot.slane %v960_v40, 1  ;;  %v973_v45 = vrot.slane %v972_v41, 1 }
 0x33d   :  { %v975_v46 = vmul.f32 0.125, %v956_v42  ;;  %v977_v47 = vmul.f32 0.125, %v968_v43  ;;  %v962_v48 = vadd.f32 %v961_v44, %v960_v40  ;;  %v974_v49 = vadd.f32 %v973_v45, %v972_v41 }
 0x33f   :  { %v979_v50 = vadd.f32 1e-05, %v975_v46  ;;  %v981_v51 = vadd.f32 1e-05, %v977_v47  ;;  %v976_v52 = vmul.f32 0.125, %v962_v48  ;;  %v978_v53 = vmul.f32 0.125, %v974_v49 }
 0x341   :  { %7885 = vrsqrt.f32 %v979_v50  ;;  %v980_v54 = vadd.f32 1e-05, %v976_v52  ;;  %v982_v55 = vadd.f32 1e-05, %v978_v53 }
 0x342   :  { %7887 = vrsqrt.f32 %v981_v51 }
 0x343   :  { %7889 = vrsqrt.f32 %v980_v54 }
 0x344   :  { %7891 = vrsqrt.f32 %v982_v55 }
 0x34e   :  { %v7886_v61 = vpop.eup %7885 }
 0x34f   :  { %v7888_v0 = vpop.eup %7887  ;;  %v1008_v1 = vmul.f32 %v7886_v61, %v991_v58 }
 0x350   :  { %v7890_v2 = vpop.eup %7889  ;;  %v1010_v3 = vmul.f32 %v7888_v0, %v999_v59 }
 0x351   :  { %v7892_v4 = vpop.eup %7891  ;;  %v1015_v5 = vrot.slane %v1008_v1, %v8816_v13  ;;  %v1009_v7 = vmul.f32 %v7890_v2, %v995_v60 }
 0x352   :  { %v1023_v8 = vrot.slane %v1010_v3, %v8816_v13  ;;  %v1011_v14 = vmul.f32 %v7892_v4, %v1003_v63 }
 0x353   :  { %v1028_v16 = vmul.f32 %v1015_v5, %v8831_v10  ;;  %v1019_v17 = vrot.slane %v1009_v7, %v8816_v13 }
 0x354   :  { %v1030_v21 = vmul.f32 %v1023_v8, %v8833_v11  ;;  %v1027_v22 = vrot.slane %v1011_v14, %v8816_v13 }
 0x355   :  { %v1053_v24 = vadd.f32 %v1036_v6, %v1028_v16  ;;  %v1029_v25 = vmul.f32 %v1019_v17, %v8839_v19 }
 0x356   :  { %v1055_v26 = vadd.f32 %v1044_v9, %v1030_v21  ;;  %v1031_v27 = vmul.f32 %v1027_v22, %v8841_v20 }
 0x357   :  { %vm1057_vm4 = vcmp.ge.f32.partialorder %v1053_v24, 0.0  ;;  %v1061_v28 = vmul.f32 0.2, %v1053_v24  ;;  %v1054_v29 = vadd.f32 %v1040_v18, %v1029_v25 }
 0x358   :  { %vm1059_vm5 = vcmp.ge.f32.partialorder %v1055_v26, 0.0  ;;  %v1063_v10 = vmul.f32 0.2, %v1055_v26  ;;  %v1056_v30 = vadd.f32 %v1048_v23, %v1031_v27 }
 0x359   :  { %v8869_v31 = vsel %vm1057_vm4, %v1053_v24, %v1061_v28  ;;  %vm1058_vm6 = vcmp.ge.f32.partialorder %v1054_v29, 0.0  ;;  %v1062_v11 = vmul.f32 0.2, %v1054_v29 }
 0x35a   :  { %v8871_v33 = vsel %vm1059_vm5, %v1055_v26, %v1063_v10  ;;  %vm1060_vm7 = vcmp.ge.f32.partialorder %v1056_v30, 0.0  ;;  %v1064_v34 = vmul.f32 0.2, %v1056_v30 }
 0x35b   :  { %v1066_v35 = vsel %vm1058_vm6, %v1054_v29, %v1062_v11 }
 0x35c   :  { %v1068_v36 = vsel %vm1060_vm7, %v1056_v30, %v1064_v34 }
 0x35d   :  { %8731 = dma.done.wait [#allocation5 + $0x1], 32768 }
 0x35e   :  { %8732 = vsyncadd [#allocation5 + $0x1], 4294934528  ;;  %v8873_v19 = vpack.c.bf16 %v1066_v35, %v1066_v35  ;;  %v8875_v20 = vpack.c.bf16 %v1068_v36, %v1068_v36  ;;  %v1129_v37 = vld [vmem:[#allocation3 + $0x1c0] sm:$0xff] }
 0x35f   :  { %v1133_v38 = vld [vmem:[#allocation3 + $0x1e0] sm:$0xff] }
 0x360   :  { %2645 = vmatprep.mubr.bf16.mxu0 %v8873_v19  ;;  %2686 = vmatprep.mubr.bf16.mxu1 %v8875_v20  ;;  %v1257_v39 = vld [vmem:[#allocation3 + $0x5c0] sm:$0xff]  ;;  %v6971_v40 = vcombine.high %v1129_v37, %v1133_v38  ;;  %v6970_v42 = vcombine.low %v1129_v37, %v1133_v38 }
 0x361   :  { %v1261_v41 = vld [vmem:[#allocation3 + $0x5e0] sm:$0xff] }
 0x362   :  { %v1121_v43 = vld [vmem:[#allocation3 + $0x180] sm:$0xff]  ;;  %v7099_v45 = vcombine.high %v1257_v39, %v1261_v41  ;;  %v7098_v46 = vcombine.low %v1257_v39, %v1261_v41  ;;  %2613 = vmatprep.subr.bf16.mxu0 %v6971_v40 }
 0x363   :  { %v1125_v44 = vld [vmem:[#allocation3 + $0x1a0] sm:$0xff]  ;;  %2614 = vmatpush1.bf16.msra.mxu0 %v6970_v42 }
 0x364   :  { %v6963_v47 = vcombine.high %v1121_v43, %v1125_v44  ;;  %v1249_v48 = vld [vmem:[#allocation3 + $0x580] sm:$0xff]  ;;  %2654 = vmatprep.subr.bf16.mxu1 %v7099_v45  ;;  %v6962_v55 = vcombine.low %v1121_v43, %v1125_v44 }
 0x365   :  { %v1253_v49 = vld [vmem:[#allocation3 + $0x5a0] sm:$0xff]  ;;  %2655 = vmatpush1.bf16.msra.mxu1 %v7098_v46 }
 0x366   :  { %v1113_v50 = vld [vmem:[#allocation3 + $0x140] sm:$0xff]  ;;  %v7091_v51 = vcombine.high %v1249_v48, %v1253_v49  ;;  %2615 = vmatprep.subr.bf16.mxu0 %v6963_v47  ;;  %v7090_v32 = vcombine.low %v1249_v48, %v1253_v49 }
 0x367   :  { %v1117_v52 = vld [vmem:[#allocation3 + $0x160] sm:$0xff]  ;;  %2616 = vmatpush1.bf16.msra.mxu0 %v6962_v55 }
 0x368   :  { %v1241_v53 = vld [vmem:[#allocation3 + $0x540] sm:$0xff]  ;;  %v6955_v58 = vcombine.high %v1113_v50, %v1117_v52  ;;  %2656 = vmatprep.subr.bf16.mxu1 %v7091_v51  ;;  %v6954_v0 = vcombine.low %v1113_v50, %v1117_v52 }
 0x369   :  { %v1245_v54 = vld [vmem:[#allocation3 + $0x560] sm:$0xff]  ;;  %2657 = vmatpush1.bf16.msra.mxu1 %v7090_v32 }
 0x36a   :  { %v7083_v59 = vcombine.high %v1241_v53, %v1245_v54  ;;  %v1105_v60 = vld [vmem:[#allocation3 + $0x100] sm:$0xff]  ;;  %2617 = vmatprep.subr.bf16.mxu0 %v6955_v58  ;;  %v7082_v1 = vcombine.low %v1241_v53, %v1245_v54 }
 0x36b   :  { %v1109_v61 = vld [vmem:[#allocation3 + $0x120] sm:$0xff]  ;;  %2618 = vmatpush1.bf16.msra.mxu0 %v6954_v0 }
 0x36c   :  { %v1233_v62 = vld [vmem:[#allocation3 + $0x500] sm:$0xff]  ;;  %v6947_v2 = vcombine.high %v1105_v60, %v1109_v61  ;;  %2658 = vmatprep.subr.bf16.mxu1 %v7083_v59  ;;  %v6946_v8 = vcombine.low %v1105_v60, %v1109_v61 }
 0x36d   :  { %v1237_v63 = vld [vmem:[#allocation3 + $0x520] sm:$0xff]  ;;  %2659 = vmatpush1.bf16.msra.mxu1 %v7082_v1 }
 0x36e   :  { %v7075_v3 = vcombine.high %v1233_v62, %v1237_v63  ;;  %v1097_v4 = vld [vmem:[#allocation3 + $0xc0] sm:$0xff]  ;;  %2619 = vmatprep.subr.bf16.mxu0 %v6947_v2  ;;  %v7074_v9 = vcombine.low %v1233_v62, %v1237_v63 }
 0x36f   :  { %v1101_v5 = vld [vmem:[#allocation3 + $0xe0] sm:$0xff]  ;;  %2620 = vmatpush1.bf16.msra.mxu0 %v6946_v8 }
 0x370   :  { %v1225_v6 = vld [vmem:[#allocation3 + $0x4c0] sm:$0xff]  ;;  %v6939_v14 = vcombine.high %v1097_v4, %v1101_v5  ;;  %2660 = vmatprep.subr.bf16.mxu1 %v7075_v3  ;;  %v6938_v23 = vcombine.low %v1097_v4, %v1101_v5 }
 0x371   :  { %v1229_v7 = vld [vmem:[#allocation3 + $0x4e0] sm:$0xff]  ;;  %2661 = vmatpush1.bf16.msra.mxu1 %v7074_v9 }
 0x372   :  { %v7067_v16 = vcombine.high %v1225_v6, %v1229_v7  ;;  %v1089_v17 = vld [vmem:[#allocation3 + $0x80] sm:$0xff]  ;;  %2621 = vmatprep.subr.bf16.mxu0 %v6939_v14  ;;  %v7066_v24 = vcombine.low %v1225_v6, %v1229_v7 }
 0x373   :  { %v1093_v18 = vld [vmem:[#allocation3 + $0xa0] sm:$0xff]  ;;  %2622 = vmatpush1.bf16.msra.mxu0 %v6938_v23 }
 0x374   :  { %v1217_v21 = vld [vmem:[#allocation3 + $0x480] sm:$0xff]  ;;  %v6931_v25 = vcombine.high %v1089_v17, %v1093_v18  ;;  %2662 = vmatprep.subr.bf16.mxu1 %v7067_v16  ;;  %v6930_v30 = vcombine.low %v1089_v17, %v1093_v18 }
 0x375   :  { %v1221_v22 = vld [vmem:[#allocation3 + $0x4a0] sm:$0xff]  ;;  %2663 = vmatpush1.bf16.msra.mxu1 %v7066_v24 }
 0x376   :  { %v7059_v26 = vcombine.high %v1217_v21, %v1221_v22  ;;  %v1081_v27 = vld [vmem:[#allocation3 + $0x40] sm:$0xff]  ;;  %2623 = vmatprep.subr.bf16.mxu0 %v6931_v25  ;;  %v7058_v11 = vcombine.low %v1217_v21, %v1221_v22 }
 0x377   :  { %v1085_v28 = vld [vmem:[#allocation3 + $0x60] sm:$0xff]  ;;  %2624 = vmatpush1.bf16.msra.mxu0 %v6930_v30 }
 0x378   :  { %v1209_v29 = vld [vmem:[#allocation3 + $0x440] sm:$0xff]  ;;  %v6923_v34 = vcombine.high %v1081_v27, %v1085_v28  ;;  %2664 = vmatprep.subr.bf16.mxu1 %v7059_v26  ;;  %v6922_v40 = vcombine.low %v1081_v27, %v1085_v28 }
 0x379   :  { %v1213_v10 = vld [vmem:[#allocation3 + $0x460] sm:$0xff]  ;;  %2665 = vmatpush1.bf16.msra.mxu1 %v7058_v11 }
 0x37a   :  { %v7051_v35 = vcombine.high %v1209_v29, %v1213_v10  ;;  %v1073_v36 = vld [vmem:[#allocation3] sm:$0xff]  ;;  %2625 = vmatprep.subr.bf16.mxu0 %v6923_v34  ;;  %v7050_v41 = vcombine.low %v1209_v29, %v1213_v10 }
 0x37b   :  { %v1077_v37 = vld [vmem:[#allocation3 + $0x20] sm:$0xff]  ;;  %2626 = vmatpush1.bf16.msra.mxu0 %v6922_v40 }
 0x37c   :  { %v1201_v38 = vld [vmem:[#allocation3 + $0x400] sm:$0xff]  ;;  %v6915_v42 = vcombine.high %v1073_v36, %v1077_v37  ;;  %2666 = vmatprep.subr.bf16.mxu1 %v7051_v35  ;;  %v6914_v48 = vcombine.low %v1073_v36, %v1077_v37 }
 0x37d   :  { %v1205_v39 = vld [vmem:[#allocation3 + $0x420] sm:$0xff]  ;;  %2667 = vmatpush1.bf16.msra.mxu1 %v7050_v41 }
 0x37e   :  { %v7043_v43 = vcombine.high %v1201_v38, %v1205_v39  ;;  %v1193_v44 = vld [vmem:[#allocation3 + $0x3c0] sm:$0xff]  ;;  %2627 = vmatprep.subr.bf16.mxu0 %v6915_v42  ;;  %v7042_v49 = vcombine.low %v1201_v38, %v1205_v39 }
 0x37f   :  { %v1197_v45 = vld [vmem:[#allocation3 + $0x3e0] sm:$0xff]  ;;  %2628 = vmatpush1.bf16.msra.mxu0 %v6914_v48 }
 0x380   :  { %v1321_v46 = vld [vmem:[#allocation3 + $0x7c0] sm:$0xff]  ;;  %v7035_v50 = vcombine.high %v1193_v44, %v1197_v45  ;;  %2668 = vmatprep.subr.bf16.mxu1 %v7043_v43  ;;  %v7034_v32 = vcombine.low %v1193_v44, %v1197_v45 }
 0x381   :  { %v1325_v47 = vld [vmem:[#allocation3 + $0x7e0] sm:$0xff]  ;;  %2669 = vmatpush1.bf16.msra.mxu1 %v7042_v49 }
 0x382   :  { %v7163_v51 = vcombine.high %v1321_v46, %v1325_v47  ;;  %v1185_v52 = vld [vmem:[#allocation3 + $0x380] sm:$0xff]  ;;  %2629 = vmatprep.subr.bf16.mxu0 %v7035_v50  ;;  %v7162_v58 = vcombine.low %v1321_v46, %v1325_v47 }
 0x383   :  { %v1189_v53 = vld [vmem:[#allocation3 + $0x3a0] sm:$0xff]  ;;  %2630 = vmatpush2.bf16.msra.mxu0 %v7034_v32  ;;  %v1262_v32 = vld [vmem:[#allocation3 + $0x5e8] sm:$0xff] }
 0x384   :  { %v1313_v54 = vld [vmem:[#allocation3 + $0x780] sm:$0xff]  ;;  %v7027_v59 = vcombine.high %v1185_v52, %v1189_v53  ;;  %2670 = vmatprep.subr.bf16.mxu1 %v7163_v51  ;;  %v7026_v1 = vcombine.low %v1185_v52, %v1189_v53  ;;  %v1130_v53 = vld [vmem:[#allocation3 + $0x1c8] sm:$0xff] }
 0x385   :  { %v1317_v55 = vld [vmem:[#allocation3 + $0x7a0] sm:$0xff]  ;;  %2671 = vmatpush2.bf16.msra.mxu1 %v7162_v58 }
 0x386   :  { %v7155_v60 = vcombine.high %v1313_v54, %v1317_v55  ;;  %v1177_v61 = vld [vmem:[#allocation3 + $0x340] sm:$0xff]  ;;  %2631 = vmatprep.subr.bf16.mxu0 %v7027_v59  ;;  %v7154_v2 = vcombine.low %v1313_v54, %v1317_v55  ;;  %v1134_v54 = vld [vmem:[#allocation3 + $0x1e8] sm:$0xff] }
 0x387   :  { %v1181_v62 = vld [vmem:[#allocation3 + $0x360] sm:$0xff]  ;;  %2632 = vmatpush2.bf16.msra.mxu0 %v7026_v1  ;;  %v1258_v55 = vld [vmem:[#allocation3 + $0x5c8] sm:$0xff] }
 0x388   :  { %v1305_v63 = vld [vmem:[#allocation3 + $0x740] sm:$0xff]  ;;  %v7019_v3 = vcombine.high %v1177_v61, %v1181_v62  ;;  %2672 = vmatprep.subr.bf16.mxu1 %v7155_v60  ;;  %v7018_v9 = vcombine.low %v1177_v61, %v1181_v62  ;;  %v6973_v60 = vcombine.high %v1130_v53, %v1134_v54  ;;  %v7101_v61 = vcombine.high %v1258_v55, %v1262_v32  ;;  %v1122_v62 = vld [vmem:[#allocation3 + $0x188] sm:$0xff] }
 0x389   :  { %v1309_v0 = vld [vmem:[#allocation3 + $0x760] sm:$0xff]  ;;  %2673 = vmatpush2.bf16.msra.mxu1 %v7154_v2  ;;  %v1250_v1 = vld [vmem:[#allocation3 + $0x588] sm:$0xff] }
 0x38a   :  { %v7147_v4 = vcombine.high %v1305_v63, %v1309_v0  ;;  %v1169_v5 = vld [vmem:[#allocation3 + $0x300] sm:$0xff]  ;;  %2633 = vmatprep.subr.bf16.mxu0 %v7019_v3  ;;  %v7146_v14 = vcombine.low %v1305_v63, %v1309_v0  ;;  %v1126_v63 = vld [vmem:[#allocation3 + $0x1a8] sm:$0xff]  ;;  %v8881_v0 = vpack.c.bf16 %v8869_v31, %v8869_v31  ;;  %v8885_v3 = vpack.c.bf16 %v8871_v33, %v8871_v33 }
 0x38b   :  { %v1173_v6 = vld [vmem:[#allocation3 + $0x320] sm:$0xff]  ;;  %2634 = vmatpush2.bf16.msra.mxu0 %v7018_v9  ;;  %v1254_v2 = vld [vmem:[#allocation3 + $0x5a8] sm:$0xff] }
 0x38c   :  { %v1297_v7 = vld [vmem:[#allocation3 + $0x700] sm:$0xff]  ;;  %v7011_v16 = vcombine.high %v1169_v5, %v1173_v6  ;;  %2674 = vmatprep.subr.bf16.mxu1 %v7147_v4  ;;  %v7010_v24 = vcombine.low %v1169_v5, %v1173_v6  ;;  %v6972_v4 = vcombine.low %v1130_v53, %v1134_v54  ;;  %v7100_v5 = vcombine.low %v1258_v55, %v1262_v32  ;;  %v1118_v9 = vld [vmem:[#allocation3 + $0x168] sm:$0xff] }
 0x38d   :  { %v1301_v8 = vld [vmem:[#allocation3 + $0x720] sm:$0xff]  ;;  %2675 = vmatpush2.bf16.msra.mxu1 %v7146_v14  ;;  %v6965_v6 = vcombine.high %v1122_v62, %v1126_v63  ;;  %v1242_v31 = vld [vmem:[#allocation3 + $0x548] sm:$0xff]  ;;  %v7092_v33 = vcombine.low %v1250_v1, %v1254_v2 }
 0x38e   :  { %v7139_v17 = vcombine.high %v1297_v7, %v1301_v8  ;;  %v1161_v18 = vld [vmem:[#allocation3 + $0x2c0] sm:$0xff]  ;;  %2635 = vmatprep.subr.bf16.mxu0 %v7011_v16  ;;  %v7138_v25 = vcombine.low %v1297_v7, %v1301_v8  ;;  %v7093_v7 = vcombine.high %v1250_v1, %v1254_v2  ;;  %v1114_v8 = vld [vmem:[#allocation3 + $0x148] sm:$0xff]  ;;  %v6964_v16 = vcombine.low %v1122_v62, %v1126_v63 }
 0x38f   :  { %v1165_v21 = vld [vmem:[#allocation3 + $0x2e0] sm:$0xff]  ;;  %2636 = vmatpush2.bf16.msra.mxu0 %v7010_v24  ;;  %v1246_v14 = vld [vmem:[#allocation3 + $0x568] sm:$0xff] }
 0x390   :  { %v1289_v22 = vld [vmem:[#allocation3 + $0x6c0] sm:$0xff]  ;;  %v7003_v26 = vcombine.high %v1161_v18, %v1165_v21  ;;  %2676 = vmatprep.subr.bf16.mxu1 %v7139_v17  ;;  %v7002_v11 = vcombine.low %v1161_v18, %v1165_v21  ;;  %v6957_v17 = vcombine.high %v1114_v8, %v1118_v9  ;;  %v7085_v18 = vcombine.high %v1242_v31, %v1246_v14  ;;  %v1106_v21 = vld [vmem:[#allocation3 + $0x108] sm:$0xff] }
 0x391   :  { %v1293_v23 = vld [vmem:[#allocation3 + $0x6e0] sm:$0xff]  ;;  %2677 = vmatpush2.bf16.msra.mxu1 %v7138_v25  ;;  %v1238_v24 = vld [vmem:[#allocation3 + $0x528] sm:$0xff]  ;;  %v6956_v25 = vcombine.low %v1114_v8, %v1118_v9 }
 0x392   :  { %v7131_v27 = vcombine.high %v1289_v22, %v1293_v23  ;;  %v1153_v28 = vld [vmem:[#allocation3 + $0x280] sm:$0xff]  ;;  %2637 = vmatprep.subr.bf16.mxu0 %v7003_v26  ;;  %v7130_v34 = vcombine.low %v1289_v22, %v1293_v23  ;;  %v1110_v22 = vld [vmem:[#allocation3 + $0x128] sm:$0xff]  ;;  %v7084_v26 = vcombine.low %v1242_v31, %v1246_v14 }
 0x393   :  { %v1157_v29 = vld [vmem:[#allocation3 + $0x2a0] sm:$0xff]  ;;  %2638 = vmatpush2.bf16.msra.mxu0 %v7002_v11  ;;  %v1234_v23 = vld [vmem:[#allocation3 + $0x508] sm:$0xff] }
 0x394   :  { %v1281_v10 = vld [vmem:[#allocation3 + $0x680] sm:$0xff]  ;;  %v6995_v35 = vcombine.high %v1153_v28, %v1157_v29  ;;  %2678 = vmatprep.subr.bf16.mxu1 %v7131_v27  ;;  %v6994_v41 = vcombine.low %v1153_v28, %v1157_v29  ;;  %v6949_v27 = vcombine.high %v1106_v21, %v1110_v22  ;;  %v7077_v28 = vcombine.high %v1234_v23, %v1238_v24  ;;  %v1098_v29 = vld [vmem:[#allocation3 + $0xc8] sm:$0xff] }
 0x395   :  { %v1285_v30 = vld [vmem:[#allocation3 + $0x6a0] sm:$0xff]  ;;  %2679 = vmatpush2.bf16.msra.mxu1 %v7130_v34  ;;  %v1230_v11 = vld [vmem:[#allocation3 + $0x4e8] sm:$0xff]  ;;  %v6948_v34 = vcombine.low %v1106_v21, %v1110_v22 }
 0x396   :  { %v7123_v36 = vcombine.high %v1281_v10, %v1285_v30  ;;  %v1145_v37 = vld [vmem:[#allocation3 + $0x240] sm:$0xff]  ;;  %2639 = vmatprep.subr.bf16.mxu0 %v6995_v35  ;;  %v7122_v42 = vcombine.low %v1281_v10, %v1285_v30  ;;  %v1102_v10 = vld [vmem:[#allocation3 + $0xe8] sm:$0xff]  ;;  %v7076_v35 = vcombine.low %v1234_v23, %v1238_v24 }
 0x397   :  { %v1149_v38 = vld [vmem:[#allocation3 + $0x260] sm:$0xff]  ;;  %2640 = vmatpush2.bf16.msra.mxu0 %v6994_v41  ;;  %v1226_v30 = vld [vmem:[#allocation3 + $0x4c8] sm:$0xff] }
 0x398   :  { %v1273_v39 = vld [vmem:[#allocation3 + $0x640] sm:$0xff]  ;;  %v6987_v43 = vcombine.high %v1145_v37, %v1149_v38  ;;  %2680 = vmatprep.subr.bf16.mxu1 %v7123_v36  ;;  %v6986_v49 = vcombine.low %v1145_v37, %v1149_v38  ;;  %v6941_v36 = vcombine.high %v1098_v29, %v1102_v10  ;;  %v7069_v37 = vcombine.high %v1226_v30, %v1230_v11  ;;  %v1090_v38 = vld [vmem:[#allocation3 + $0x88] sm:$0xff] }
 0x399   :  { %v1277_v40 = vld [vmem:[#allocation3 + $0x660] sm:$0xff]  ;;  %2681 = vmatpush2.bf16.msra.mxu1 %v7122_v42  ;;  %v1222_v41 = vld [vmem:[#allocation3 + $0x4a8] sm:$0xff]  ;;  %v6940_v42 = vcombine.low %v1098_v29, %v1102_v10 }
 0x39a   :  { %v7115_v44 = vcombine.high %v1273_v39, %v1277_v40  ;;  %v1137_v45 = vld [vmem:[#allocation3 + $0x200] sm:$0xff]  ;;  %2641 = vmatprep.subr.bf16.mxu0 %v6987_v43  ;;  %v7114_v50 = vcombine.low %v1273_v39, %v1277_v40  ;;  %v1094_v39 = vld [vmem:[#allocation3 + $0xa8] sm:$0xff]  ;;  %v7068_v43 = vcombine.low %v1226_v30, %v1230_v11 }
 0x39b   :  { %v1141_v46 = vld [vmem:[#allocation3 + $0x220] sm:$0xff]  ;;  %2642 = vmatpush2.bf16.msra.mxu0 %v6986_v49  ;;  %v1218_v40 = vld [vmem:[#allocation3 + $0x488] sm:$0xff] }
 0x39c   :  { %v1265_v47 = vld [vmem:[#allocation3 + $0x600] sm:$0xff]  ;;  %v6979_v51 = vcombine.high %v1137_v45, %v1141_v46  ;;  %2682 = vmatprep.subr.bf16.mxu1 %v7115_v44  ;;  %v6978_v58 = vcombine.low %v1137_v45, %v1141_v46  ;;  %v6933_v44 = vcombine.high %v1090_v38, %v1094_v39  ;;  %v7061_v45 = vcombine.high %v1218_v40, %v1222_v41  ;;  %v1082_v46 = vld [vmem:[#allocation3 + $0x48] sm:$0xff] }
 0x39d   :  { %v1269_v48 = vld [vmem:[#allocation3 + $0x620] sm:$0xff]  ;;  %2683 = vmatpush2.bf16.msra.mxu1 %v7114_v50  ;;  %v1214_v49 = vld [vmem:[#allocation3 + $0x468] sm:$0xff]  ;;  %v6932_v50 = vcombine.low %v1090_v38, %v1094_v39 }
 0x39e   :  { %v7107_v52 = vcombine.high %v1265_v47, %v1269_v48  ;;  %2643 = vmatprep.subr.bf16.mxu0 %v6979_v51  ;;  %v7106_v59 = vcombine.low %v1265_v47, %v1269_v48  ;;  %v1086_v47 = vld [vmem:[#allocation3 + $0x68] sm:$0xff]  ;;  %v7060_v51 = vcombine.low %v1218_v40, %v1222_v41 }
 0x39f   :  { %2644 = vmatpush2.bf16.msra.mxu0 %v6978_v58  ;;  %v1210_v48 = vld [vmem:[#allocation3 + $0x448] sm:$0xff] }
 0x3a0   :  { %2684 = vmatprep.subr.bf16.mxu1 %v7107_v52  ;;  %2695 = vmatprep.subr.bf16.mxu0 %v6973_v60  ;;  %v6925_v52 = vcombine.high %v1082_v46, %v1086_v47  ;;  %v7053_v53 = vcombine.high %v1210_v48, %v1214_v49  ;;  %v1074_v54 = vld [vmem:[#allocation3 + $0x8] sm:$0xff]  ;;  %v7052_v60 = vcombine.low %v1210_v48, %v1214_v49 }
 0x3a1   :  { %2685 = vmatpush2.bf16.msra.mxu1 %v7106_v59  ;;  %v1078_v55 = vld [vmem:[#allocation3 + $0x28] sm:$0xff]  ;;  %v6924_v59 = vcombine.low %v1082_v46, %v1086_v47 }
 0x3a2   :  { %2736 = vmatprep.subr.bf16.mxu1 %v7101_v61  ;;  %2646 = vmatmul.mubr.bf16.vlgmr.msra.gmra.mxu0 %v8881_v0  ;;  %v1202_v32 = vld [vmem:[#allocation3 + $0x408] sm:$0xff]  ;;  %v6917_v61 = vcombine.high %v1074_v54, %v1078_v55 }
 0x3a3   :  { %2696 = vmatpush1.bf16.msra.mxu0 %v6972_v4  ;;  %2727 = vmatprep.mubr.bf16.mxu0 %v8873_v19  ;;  %v1206_v58 = vld [vmem:[#allocation3 + $0x428] sm:$0xff] }
 0x3a4   :  { %2687 = vmatmul.mubr.bf16.vlgmr.msra.gmra.mxu1 %v8885_v3  ;;  %2697 = vmatprep.subr.bf16.mxu0 %v6965_v6  ;;  %v7045_v62 = vcombine.high %v1202_v32, %v1206_v58  ;;  %v1194_v63 = vld [vmem:[#allocation3 + $0x3c8] sm:$0xff]  ;;  %v7044_v6 = vcombine.low %v1202_v32, %v1206_v58 }
 0x3a5   :  { %2737 = vmatpush1.bf16.msra.mxu1 %v7100_v5  ;;  %2768 = vmatprep.mubr.bf16.mxu1 %v8875_v20  ;;  %v1198_v1 = vld [vmem:[#allocation3 + $0x3e8] sm:$0xff]  ;;  %v6916_v5 = vcombine.low %v1074_v54, %v1078_v55 }
 0x3a6   :  { %2738 = vmatprep.subr.bf16.mxu1 %v7093_v7  ;;  %v1322_v2 = vld [vmem:[#allocation3 + $0x7c8] sm:$0xff]  ;;  %v7037_v7 = vcombine.high %v1194_v63, %v1198_v1 }
 0x3a7   :  { %2698 = vmatpush1.bf16.msra.mxu0 %v6964_v16  ;;  %v1326_v4 = vld [vmem:[#allocation3 + $0x7e8] sm:$0xff] }
 0x3a8   :  { %2699 = vmatprep.subr.bf16.mxu0 %v6957_v17  ;;  %v7165_v8 = vcombine.high %v1322_v2, %v1326_v4  ;;  %v1186_v9 = vld [vmem:[#allocation3 + $0x388] sm:$0xff]  ;;  %v7164_v17 = vcombine.low %v1322_v2, %v1326_v4 }
 0x3a9   :  { %2739 = vmatpush1.bf16.msra.mxu1 %v7092_v33  ;;  %v1190_v31 = vld [vmem:[#allocation3 + $0x3a8] sm:$0xff]  ;;  %v7036_v33 = vcombine.low %v1194_v63, %v1198_v1 }
 0x3aa   :  { %2740 = vmatprep.subr.bf16.mxu1 %v7085_v18  ;;  %v1314_v14 = vld [vmem:[#allocation3 + $0x788] sm:$0xff]  ;;  %v7029_v18 = vcombine.high %v1186_v9, %v1190_v31 }
 0x3ab   :  { %2700 = vmatpush1.bf16.msra.mxu0 %v6956_v25  ;;  %v1318_v16 = vld [vmem:[#allocation3 + $0x7a8] sm:$0xff] }
 0x3ac   :  { %2701 = vmatprep.subr.bf16.mxu0 %v6949_v27  ;;  %v7157_v21 = vcombine.high %v1314_v14, %v1318_v16  ;;  %v1178_v22 = vld [vmem:[#allocation3 + $0x348] sm:$0xff]  ;;  %v7156_v27 = vcombine.low %v1314_v14, %v1318_v16  ;;  %v1135_v14 = vld [vmem:[#allocation3 + $0x1f0] sm:$0xff] }
 0x3ad   :  { %2741 = vmatpush1.bf16.msra.mxu1 %v7084_v26  ;;  %v1182_v23 = vld [vmem:[#allocation3 + $0x368] sm:$0xff]  ;;  %v7028_v26 = vcombine.low %v1186_v9, %v1190_v31  ;;  %v1131_v31 = vld [vmem:[#allocation3 + $0x1d0] sm:$0xff] }
 0x3ae   :  { %2742 = vmatprep.subr.bf16.mxu1 %v7077_v28  ;;  %v1306_v24 = vld [vmem:[#allocation3 + $0x748] sm:$0xff]  ;;  %v7021_v28 = vcombine.high %v1178_v22, %v1182_v23  ;;  %v1259_v16 = vld [vmem:[#allocation3 + $0x5d0] sm:$0xff] }
 0x3af   :  { %2702 = vmatpush1.bf16.msra.mxu0 %v6948_v34  ;;  %v1310_v25 = vld [vmem:[#allocation3 + $0x768] sm:$0xff] }
 0x3b0   :  { %2703 = vmatprep.subr.bf16.mxu0 %v6941_v36  ;;  %v7149_v29 = vcombine.high %v1306_v24, %v1310_v25  ;;  %v1170_v10 = vld [vmem:[#allocation3 + $0x308] sm:$0xff]  ;;  %v7148_v36 = vcombine.low %v1306_v24, %v1310_v25  ;;  %v1127_v24 = vld [vmem:[#allocation3 + $0x1b0] sm:$0xff] }
 0x3b1   :  { %2743 = vmatpush1.bf16.msra.mxu1 %v7076_v35  ;;  %v1174_v30 = vld [vmem:[#allocation3 + $0x328] sm:$0xff]  ;;  %v7020_v35 = vcombine.low %v1178_v22, %v1182_v23  ;;  %v1123_v23 = vld [vmem:[#allocation3 + $0x190] sm:$0xff] }
 0x3b2   :  { %2744 = vmatprep.subr.bf16.mxu1 %v7069_v37  ;;  %v1298_v11 = vld [vmem:[#allocation3 + $0x708] sm:$0xff]  ;;  %v7013_v37 = vcombine.high %v1170_v10, %v1174_v30  ;;  %v1251_v25 = vld [vmem:[#allocation3 + $0x590] sm:$0xff] }
 0x3b3   :  { %2704 = vmatpush1.bf16.msra.mxu0 %v6940_v42  ;;  %v1302_v34 = vld [vmem:[#allocation3 + $0x728] sm:$0xff] }
 0x3b4   :  { %2705 = vmatprep.subr.bf16.mxu0 %v6933_v44  ;;  %v7141_v38 = vcombine.high %v1298_v11, %v1302_v34  ;;  %v1162_v39 = vld [vmem:[#allocation3 + $0x2c8] sm:$0xff]  ;;  %v7140_v44 = vcombine.low %v1298_v11, %v1302_v34  ;;  %v1119_v11 = vld [vmem:[#allocation3 + $0x170] sm:$0xff] }
 0x3b5   :  { %2745 = vmatpush1.bf16.msra.mxu1 %v7068_v43  ;;  %v1166_v40 = vld [vmem:[#allocation3 + $0x2e8] sm:$0xff]  ;;  %v7012_v43 = vcombine.low %v1170_v10, %v1174_v30  ;;  %v1115_v30 = vld [vmem:[#allocation3 + $0x150] sm:$0xff] }
 0x3b6   :  { %2746 = vmatprep.subr.bf16.mxu1 %v7061_v45  ;;  %v1290_v41 = vld [vmem:[#allocation3 + $0x6c8] sm:$0xff]  ;;  %v7005_v45 = vcombine.high %v1162_v39, %v1166_v40  ;;  %v1243_v34 = vld [vmem:[#allocation3 + $0x550] sm:$0xff] }
 0x3b7   :  { %2706 = vmatpush1.bf16.msra.mxu0 %v6932_v50  ;;  %v1294_v42 = vld [vmem:[#allocation3 + $0x6e8] sm:$0xff] }
 0x3b8   :  { %2707 = vmatprep.subr.bf16.mxu0 %v6925_v52  ;;  %v7133_v46 = vcombine.high %v1290_v41, %v1294_v42  ;;  %v1154_v47 = vld [vmem:[#allocation3 + $0x288] sm:$0xff]  ;;  %v7132_v52 = vcombine.low %v1290_v41, %v1294_v42  ;;  %v1111_v41 = vld [vmem:[#allocation3 + $0x130] sm:$0xff] }
 0x3b9   :  { %2747 = vmatpush1.bf16.msra.mxu1 %v7060_v51  ;;  %v1158_v48 = vld [vmem:[#allocation3 + $0x2a8] sm:$0xff]  ;;  %v7004_v51 = vcombine.low %v1162_v39, %v1166_v40  ;;  %v1107_v40 = vld [vmem:[#allocation3 + $0x110] sm:$0xff] }
 0x3ba   :  { %2748 = vmatprep.subr.bf16.mxu1 %v7053_v53  ;;  %v1282_v49 = vld [vmem:[#allocation3 + $0x688] sm:$0xff]  ;;  %v6997_v53 = vcombine.high %v1154_v47, %v1158_v48  ;;  %v1235_v42 = vld [vmem:[#allocation3 + $0x510] sm:$0xff] }
 0x3bb   :  { %2708 = vmatpush1.bf16.msra.mxu0 %v6924_v59  ;;  %v1286_v50 = vld [vmem:[#allocation3 + $0x6a8] sm:$0xff] }
 0x3bc   :  { %2709 = vmatprep.subr.bf16.mxu0 %v6917_v61  ;;  %v7125_v54 = vcombine.high %v1282_v49, %v1286_v50  ;;  %v1146_v55 = vld [vmem:[#allocation3 + $0x248] sm:$0xff]  ;;  %v7124_v61 = vcombine.low %v1282_v49, %v1286_v50  ;;  %v1103_v49 = vld [vmem:[#allocation3 + $0xf0] sm:$0xff] }
 0x3bd   :  { %2749 = vmatpush1.bf16.msra.mxu1 %v7052_v60  ;;  %v1150_v32 = vld [vmem:[#allocation3 + $0x268] sm:$0xff]  ;;  %v6996_v60 = vcombine.low %v1154_v47, %v1158_v48  ;;  %v1099_v48 = vld [vmem:[#allocation3 + $0xd0] sm:$0xff] }
 0x3be   :  { %2750 = vmatprep.subr.bf16.mxu1 %v7045_v62  ;;  %v1274_v58 = vld [vmem:[#allocation3 + $0x648] sm:$0xff]  ;;  %v6989_v62 = vcombine.high %v1146_v55, %v1150_v32  ;;  %v1227_v50 = vld [vmem:[#allocation3 + $0x4d0] sm:$0xff] }
 0x3bf   :  { %2710 = vmatpush1.bf16.msra.mxu0 %v6916_v5  ;;  %v1278_v59 = vld [vmem:[#allocation3 + $0x668] sm:$0xff] }
 0x3c0   :  { %2711 = vmatprep.subr.bf16.mxu0 %v7037_v7  ;;  %v7117_v63 = vcombine.high %v1274_v58, %v1278_v59  ;;  %v1138_v1 = vld [vmem:[#allocation3 + $0x208] sm:$0xff]  ;;  %v7116_v7 = vcombine.low %v1274_v58, %v1278_v59  ;;  %v1095_v58 = vld [vmem:[#allocation3 + $0xb0] sm:$0xff] }
 0x3c1   :  { %2751 = vmatpush1.bf16.msra.mxu1 %v7044_v6  ;;  %v1142_v2 = vld [vmem:[#allocation3 + $0x228] sm:$0xff]  ;;  %v6988_v6 = vcombine.low %v1146_v55, %v1150_v32  ;;  %v1091_v32 = vld [vmem:[#allocation3 + $0x90] sm:$0xff] }
 0x3c2   :  { %2752 = vmatprep.subr.bf16.mxu1 %v7165_v8  ;;  %v1266_v4 = vld [vmem:[#allocation3 + $0x608] sm:$0xff]  ;;  %v6981_v8 = vcombine.high %v1138_v1, %v1142_v2  ;;  %v1219_v59 = vld [vmem:[#allocation3 + $0x490] sm:$0xff] }
 0x3c3   :  { %2712 = vmatpush2.bf16.msra.mxu0 %v7036_v33  ;;  %v1270_v5 = vld [vmem:[#allocation3 + $0x628] sm:$0xff]  ;;  %v1263_v33 = vld [vmem:[#allocation3 + $0x5f0] sm:$0xff] }
 0x3c4   :  { %2713 = vmatprep.subr.bf16.mxu0 %v7029_v18  ;;  %v7109_v9 = vcombine.high %v1266_v4, %v1270_v5  ;;  %v7108_v18 = vcombine.low %v1266_v4, %v1270_v5  ;;  %v7103_v22 = vcombine.high %v1259_v16, %v1263_v33  ;;  %v1087_v4 = vld [vmem:[#allocation3 + $0x70] sm:$0xff] }
 0x3c5   :  { %2753 = vmatpush2.bf16.msra.mxu1 %v7164_v17  ;;  %v6980_v17 = vcombine.low %v1138_v1, %v1142_v2  ;;  %v1083_v2 = vld [vmem:[#allocation3 + $0x50] sm:$0xff] }
 0x3c6   :  { %2754 = vmatprep.subr.bf16.mxu1 %v7157_v21  ;;  %v6975_v21 = vcombine.high %v1131_v31, %v1135_v14  ;;  %v1211_v5 = vld [vmem:[#allocation3 + $0x450] sm:$0xff] }
 0x3c7   :  { %2714 = vmatpush2.bf16.msra.mxu0 %v7028_v26  ;;  %v1255_v26 = vld [vmem:[#allocation3 + $0x5b0] sm:$0xff] }
 0x3c8   :  { %2715 = vmatprep.subr.bf16.mxu0 %v7021_v28  ;;  %v7102_v28 = vcombine.low %v1259_v16, %v1263_v33  ;;  %v7095_v10 = vcombine.high %v1251_v25, %v1255_v26  ;;  %v1079_v16 = vld [vmem:[#allocation3 + $0x30] sm:$0xff] }
 0x3c9   :  { %2755 = vmatpush2.bf16.msra.mxu1 %v7156_v27  ;;  %v6974_v27 = vcombine.low %v1131_v31, %v1135_v14  ;;  %v1075_v14 = vld [vmem:[#allocation3 + $0x10] sm:$0xff] }
 0x3ca   :  { %2756 = vmatprep.subr.bf16.mxu1 %v7149_v29  ;;  %v6967_v29 = vcombine.high %v1123_v23, %v1127_v24  ;;  %v1203_v33 = vld [vmem:[#allocation3 + $0x410] sm:$0xff] }
 0x3cb   :  { %2716 = vmatpush2.bf16.msra.mxu0 %v7020_v35  ;;  %v1247_v35 = vld [vmem:[#allocation3 + $0x570] sm:$0xff] }
 0x3cc   :  { %2717 = vmatprep.subr.bf16.mxu0 %v7013_v37  ;;  %v7094_v37 = vcombine.low %v1251_v25, %v1255_v26  ;;  %v7087_v39 = vcombine.high %v1243_v34, %v1247_v35  ;;  %v1199_v25 = vld [vmem:[#allocation3 + $0x3f0] sm:$0xff] }
 0x3cd   :  { %2757 = vmatpush2.bf16.msra.mxu1 %v7148_v36  ;;  %v6966_v36 = vcombine.low %v1123_v23, %v1127_v24  ;;  %v1195_v24 = vld [vmem:[#allocation3 + $0x3d0] sm:$0xff] }
 0x3ce   :  { %2758 = vmatprep.subr.bf16.mxu1 %v7141_v38  ;;  %v6959_v38 = vcombine.high %v1115_v30, %v1119_v11  ;;  %v1323_v26 = vld [vmem:[#allocation3 + $0x7d0] sm:$0xff] }
 0x3cf   :  { %2718 = vmatpush2.bf16.msra.mxu0 %v7012_v43  ;;  %v1239_v43 = vld [vmem:[#allocation3 + $0x530] sm:$0xff] }
 0x3d0   :  { %2719 = vmatprep.subr.bf16.mxu0 %v7005_v45  ;;  %v7086_v45 = vcombine.low %v1243_v34, %v1247_v35  ;;  %v7079_v47 = vcombine.high %v1235_v42, %v1239_v43  ;;  %v1191_v34 = vld [vmem:[#allocation3 + $0x3b0] sm:$0xff] }
 0x3d1   :  { %2759 = vmatpush2.bf16.msra.mxu1 %v7140_v44  ;;  %v6958_v44 = vcombine.low %v1115_v30, %v1119_v11  ;;  %v1187_v11 = vld [vmem:[#allocation3 + $0x390] sm:$0xff] }
 0x3d2   :  { %2760 = vmatprep.subr.bf16.mxu1 %v7133_v46  ;;  %v6951_v46 = vcombine.high %v1107_v40, %v1111_v41  ;;  %v1315_v35 = vld [vmem:[#allocation3 + $0x790] sm:$0xff] }
 0x3d3   :  { %2720 = vmatpush2.bf16.msra.mxu0 %v7004_v51  ;;  %v1231_v51 = vld [vmem:[#allocation3 + $0x4f0] sm:$0xff] }
 0x3d4   :  { %2721 = vmatprep.subr.bf16.mxu0 %v6997_v53  ;;  %v7078_v53 = vcombine.low %v1235_v42, %v1239_v43  ;;  %v7071_v55 = vcombine.high %v1227_v50, %v1231_v51  ;;  %v1183_v42 = vld [vmem:[#allocation3 + $0x370] sm:$0xff] }
 0x3d5   :  { %2761 = vmatpush2.bf16.msra.mxu1 %v7132_v52  ;;  %v6950_v52 = vcombine.low %v1107_v40, %v1111_v41  ;;  %v1179_v41 = vld [vmem:[#allocation3 + $0x350] sm:$0xff] }
 0x3d6   :  { %2762 = vmatprep.subr.bf16.mxu1 %v7125_v54  ;;  %v6943_v54 = vcombine.high %v1099_v48, %v1103_v49  ;;  %v1307_v43 = vld [vmem:[#allocation3 + $0x750] sm:$0xff] }
 0x3d7   :  { %2722 = vmatpush2.bf16.msra.mxu0 %v6996_v60  ;;  %v1223_v60 = vld [vmem:[#allocation3 + $0x4b0] sm:$0xff] }
 0x3d8   :  { %2723 = vmatprep.subr.bf16.mxu0 %v6989_v62  ;;  %v7070_v62 = vcombine.low %v1227_v50, %v1231_v51  ;;  %v7063_v1 = vcombine.high %v1219_v59, %v1223_v60  ;;  %v1175_v50 = vld [vmem:[#allocation3 + $0x330] sm:$0xff] }
 0x3d9   :  { %2763 = vmatpush2.bf16.msra.mxu1 %v7124_v61  ;;  %v6942_v61 = vcombine.low %v1099_v48, %v1103_v49  ;;  %v1171_v49 = vld [vmem:[#allocation3 + $0x310] sm:$0xff] }
 0x3da   :  { %2764 = vmatprep.subr.bf16.mxu1 %v7117_v63  ;;  %v6935_v63 = vcombine.high %v1091_v32, %v1095_v58  ;;  %v1299_v51 = vld [vmem:[#allocation3 + $0x710] sm:$0xff] }
 0x3db   :  { %2724 = vmatpush2.bf16.msra.mxu0 %v6988_v6  ;;  %v1215_v6 = vld [vmem:[#allocation3 + $0x470] sm:$0xff] }
 0x3dc   :  { %2725 = vmatprep.subr.bf16.mxu0 %v6981_v8  ;;  %v7062_v8 = vcombine.low %v1219_v59, %v1223_v60  ;;  %v7055_v31 = vcombine.high %v1211_v5, %v1215_v6  ;;  %v1167_v59 = vld [vmem:[#allocation3 + $0x2f0] sm:$0xff] }
 0x3dd   :  { %2765 = vmatpush2.bf16.msra.mxu1 %v7116_v7  ;;  %v6934_v7 = vcombine.low %v1091_v32, %v1095_v58  ;;  %v1163_v58 = vld [vmem:[#allocation3 + $0x2d0] sm:$0xff] }
 0x3de   :  { %2766 = vmatprep.subr.bf16.mxu1 %v7109_v9  ;;  %v6927_v9 = vcombine.high %v1083_v2, %v1087_v4  ;;  %v1291_v60 = vld [vmem:[#allocation3 + $0x6d0] sm:$0xff] }
 0x3df   :  { %2726 = vmatpush2.bf16.msra.mxu0 %v6980_v17  ;;  %v1207_v17 = vld [vmem:[#allocation3 + $0x430] sm:$0xff] }
 0x3e0   :  { %2777 = vmatprep.subr.bf16.mxu0 %v6975_v21  ;;  %v7054_v21 = vcombine.low %v1211_v5, %v1215_v6  ;;  %v7047_v23 = vcombine.high %v1203_v33, %v1207_v17  ;;  %v1159_v5 = vld [vmem:[#allocation3 + $0x2b0] sm:$0xff] }
 0x3e1   :  { %2767 = vmatpush2.bf16.msra.mxu1 %v7108_v18  ;;  %v6926_v18 = vcombine.low %v1083_v2, %v1087_v4  ;;  %v1155_v4 = vld [vmem:[#allocation3 + $0x290] sm:$0xff] }
 0x3e2   :  { %2818 = vmatprep.subr.bf16.mxu1 %v7103_v22  ;;  %2728 = vmatmul.mubr.bf16.vlgmr.msra.gmra.mxu0 %v8881_v0  ;;  %v6919_v22 = vcombine.high %v1075_v14, %v1079_v16  ;;  %v1283_v6 = vld [vmem:[#allocation3 + $0x690] sm:$0xff] }
 0x3e3   :  { %2778 = vmatpush1.bf16.msra.mxu0 %v6974_v27  ;;  %2809 = vmatprep.mubr.bf16.mxu0 %v8873_v19  ;;  %v1327_v27 = vld [vmem:[#allocation3 + $0x7f0] sm:$0xff] }
 0x3e4   :  { %2769 = vmatmul.mubr.bf16.vlgmr.msra.gmra.mxu1 %v8885_v3  ;;  %2779 = vmatprep.subr.bf16.mxu0 %v6967_v29  ;;  %v7046_v29 = vcombine.low %v1203_v33, %v1207_v17  ;;  %v7167_v30 = vcombine.high %v1323_v26, %v1327_v27  ;;  %v1151_v33 = vld [vmem:[#allocation3 + $0x270] sm:$0xff] }
 0x3e5   :  { %2819 = vmatpush1.bf16.msra.mxu1 %v7102_v28  ;;  %2850 = vmatprep.mubr.bf16.mxu1 %v8875_v20  ;;  %v6918_v28 = vcombine.low %v1075_v14, %v1079_v16  ;;  %v1147_v16 = vld [vmem:[#allocation3 + $0x250] sm:$0xff] }
 0x3e6   :  { %2820 = vmatprep.subr.bf16.mxu1 %v7095_v10  ;;  %v7039_v10 = vcombine.high %v1195_v24, %v1199_v25  ;;  %v1275_v17 = vld [vmem:[#allocation3 + $0x650] sm:$0xff] }
 0x3e7   :  { %2780 = vmatpush1.bf16.msra.mxu0 %v6966_v36  ;;  %v1319_v36 = vld [vmem:[#allocation3 + $0x7b0] sm:$0xff] }
 0x3e8   :  { %2781 = vmatprep.subr.bf16.mxu0 %v6959_v38  ;;  %v7166_v38 = vcombine.low %v1323_v26, %v1327_v27  ;;  %v7159_v40 = vcombine.high %v1315_v35, %v1319_v36  ;;  %v1143_v26 = vld [vmem:[#allocation3 + $0x230] sm:$0xff] }
 0x3e9   :  { %2821 = vmatpush1.bf16.msra.mxu1 %v7094_v37  ;;  %v7038_v37 = vcombine.low %v1195_v24, %v1199_v25  ;;  %v1139_v25 = vld [vmem:[#allocation3 + $0x210] sm:$0xff] }
 0x3ea   :  { %2822 = vmatprep.subr.bf16.mxu1 %v7087_v39  ;;  %v7031_v39 = vcombine.high %v1187_v11, %v1191_v34  ;;  %v1267_v27 = vld [vmem:[#allocation3 + $0x610] sm:$0xff] }
 0x3eb   :  { %2782 = vmatpush1.bf16.msra.mxu0 %v6958_v44  ;;  %v1311_v44 = vld [vmem:[#allocation3 + $0x770] sm:$0xff] }
 0x3ec   :  { %2783 = vmatprep.subr.bf16.mxu0 %v6951_v46  ;;  %v7158_v46 = vcombine.low %v1315_v35, %v1319_v36  ;;  %v7151_v48 = vcombine.high %v1307_v43, %v1311_v44  ;;  %v1136_v35 = vld [vmem:[#allocation3 + $0x1f8] sm:$0xff] }
 0x3ed   :  { %2823 = vmatpush1.bf16.msra.mxu1 %v7086_v45  ;;  %v7030_v45 = vcombine.low %v1187_v11, %v1191_v34  ;;  %v1132_v34 = vld [vmem:[#allocation3 + $0x1d8] sm:$0xff] }
 0x3ee   :  { %2824 = vmatprep.subr.bf16.mxu1 %v7079_v47  ;;  %v7023_v47 = vcombine.high %v1179_v41, %v1183_v42  ;;  %v1260_v36 = vld [vmem:[#allocation3 + $0x5d8] sm:$0xff] }
 0x3ef   :  { %2784 = vmatpush1.bf16.msra.mxu0 %v6950_v52  ;;  %v1303_v52 = vld [vmem:[#allocation3 + $0x730] sm:$0xff] }
 0x3f0   :  { %2785 = vmatprep.subr.bf16.mxu0 %v6943_v54  ;;  %v7150_v54 = vcombine.low %v1307_v43, %v1311_v44  ;;  %v7143_v32 = vcombine.high %v1299_v51, %v1303_v52  ;;  %v1128_v43 = vld [vmem:[#allocation3 + $0x1b8] sm:$0xff] }
 0x3f1   :  { %2825 = vmatpush1.bf16.msra.mxu1 %v7078_v53  ;;  %v7022_v53 = vcombine.low %v1179_v41, %v1183_v42  ;;  %v1124_v42 = vld [vmem:[#allocation3 + $0x198] sm:$0xff] }
 0x3f2   :  { %2826 = vmatprep.subr.bf16.mxu1 %v7071_v55  ;;  %v7015_v55 = vcombine.high %v1171_v49, %v1175_v50  ;;  %v1252_v44 = vld [vmem:[#allocation3 + $0x598] sm:$0xff] }
 0x3f3   :  { %2786 = vmatpush1.bf16.msra.mxu0 %v6942_v61  ;;  %v1295_v61 = vld [vmem:[#allocation3 + $0x6f0] sm:$0xff] }
 0x3f4   :  { %2787 = vmatprep.subr.bf16.mxu0 %v6935_v63  ;;  %v7142_v63 = vcombine.low %v1299_v51, %v1303_v52  ;;  %v7135_v2 = vcombine.high %v1291_v60, %v1295_v61  ;;  %v1120_v51 = vld [vmem:[#allocation3 + $0x178] sm:$0xff] }
 0x3f5   :  { %2827 = vmatpush1.bf16.msra.mxu1 %v7070_v62  ;;  %v7014_v62 = vcombine.low %v1171_v49, %v1175_v50  ;;  %v1116_v50 = vld [vmem:[#allocation3 + $0x158] sm:$0xff] }
 0x3f6   :  { %2828 = vmatprep.subr.bf16.mxu1 %v7063_v1  ;;  %v7007_v1 = vcombine.high %v1163_v58, %v1167_v59  ;;  %v1244_v52 = vld [vmem:[#allocation3 + $0x558] sm:$0xff] }
 0x3f7   :  { %2788 = vmatpush1.bf16.msra.mxu0 %v6934_v7  ;;  %v1287_v7 = vld [vmem:[#allocation3 + $0x6b0] sm:$0xff] }
 0x3f8   :  { %2789 = vmatprep.subr.bf16.mxu0 %v6927_v9  ;;  %v7134_v9 = vcombine.low %v1291_v60, %v1295_v61  ;;  %v7127_v14 = vcombine.high %v1283_v6, %v1287_v7  ;;  %v1112_v60 = vld [vmem:[#allocation3 + $0x138] sm:$0xff] }
 0x3f9   :  { %2829 = vmatpush1.bf16.msra.mxu1 %v7062_v8  ;;  %v7006_v8 = vcombine.low %v1163_v58, %v1167_v59  ;;  %v1108_v59 = vld [vmem:[#allocation3 + $0x118] sm:$0xff] }
 0x3fa   :  { %2830 = vmatprep.subr.bf16.mxu1 %v7055_v31  ;;  %v6999_v31 = vcombine.high %v1155_v4, %v1159_v5  ;;  %v1236_v61 = vld [vmem:[#allocation3 + $0x518] sm:$0xff] }
 0x3fb   :  { %2790 = vmatpush1.bf16.msra.mxu0 %v6926_v18  ;;  %v1279_v18 = vld [vmem:[#allocation3 + $0x670] sm:$0xff] }
 0x3fc   :  { %2791 = vmatprep.subr.bf16.mxu0 %v6919_v22  ;;  %v7126_v22 = vcombine.low %v1283_v6, %v1287_v7  ;;  %v7119_v24 = vcombine.high %v1275_v17, %v1279_v18  ;;  %v1104_v6 = vld [vmem:[#allocation3 + $0xf8] sm:$0xff] }
 0x3fd   :  { %2831 = vmatpush1.bf16.msra.mxu1 %v7054_v21  ;;  %v6998_v21 = vcombine.low %v1155_v4, %v1159_v5  ;;  %v1100_v5 = vld [vmem:[#allocation3 + $0xd8] sm:$0xff] }
 0x3fe   :  { %2832 = vmatprep.subr.bf16.mxu1 %v7047_v23  ;;  %v6991_v23 = vcombine.high %v1147_v16, %v1151_v33  ;;  %v1228_v7 = vld [vmem:[#allocation3 + $0x4d8] sm:$0xff] }
 0x3ff   :  { %2792 = vmatpush1.bf16.msra.mxu0 %v6918_v28  ;;  %v1271_v28 = vld [vmem:[#allocation3 + $0x630] sm:$0xff] }
 0x400   :  { %2793 = vmatprep.subr.bf16.mxu0 %v7039_v10  ;;  %v7118_v10 = vcombine.low %v1275_v17, %v1279_v18  ;;  %v7111_v11 = vcombine.high %v1267_v27, %v1271_v28  ;;  %v1224_v17 = vld [vmem:[#allocation3 + $0x4b8] sm:$0xff]  ;;  %v6944_v18 = vcombine.low %v1100_v5, %v1104_v6 }
 0x401   :  { %2833 = vmatpush1.bf16.msra.mxu1 %v7046_v29  ;;  %v6990_v29 = vcombine.low %v1147_v16, %v1151_v33  ;;  %v1096_v16 = vld [vmem:[#allocation3 + $0xb8] sm:$0xff] }
 0x402   :  { %2834 = vmatprep.subr.bf16.mxu1 %v7167_v30  ;;  %v6983_v30 = vcombine.high %v1139_v25, %v1143_v26  ;;  %v1220_v33 = vld [vmem:[#allocation3 + $0x498] sm:$0xff] }
 0x403   :  { %2794 = vmatpush2.bf16.msra.mxu0 %v7038_v37  ;;  %v1264_v37 = vld [vmem:[#allocation3 + $0x5f8] sm:$0xff] }
 0x404   :  { %2795 = vmatprep.subr.bf16.mxu0 %v7031_v39  ;;  %v7110_v39 = vcombine.low %v1267_v27, %v1271_v28  ;;  %v7105_v41 = vcombine.high %v1260_v36, %v1264_v37  ;;  %v1216_v27 = vld [vmem:[#allocation3 + $0x478] sm:$0xff] }
 0x405   :  { %2835 = vmatpush2.bf16.msra.mxu1 %v7166_v38  ;;  %v6982_v38 = vcombine.low %v1139_v25, %v1143_v26  ;;  %v1088_v25 = vld [vmem:[#allocation3 + $0x78] sm:$0xff] }
 0x406   :  { %2836 = vmatprep.subr.bf16.mxu1 %v7159_v40  ;;  %v6977_v40 = vcombine.high %v1132_v34, %v1136_v35  ;;  %v1212_v26 = vld [vmem:[#allocation3 + $0x458] sm:$0xff] }
 0x407   :  { %2796 = vmatpush2.bf16.msra.mxu0 %v7030_v45  ;;  %v1256_v45 = vld [vmem:[#allocation3 + $0x5b8] sm:$0xff] }
 0x408   :  { %2797 = vmatprep.subr.bf16.mxu0 %v7023_v47  ;;  %v7104_v47 = vcombine.low %v1260_v36, %v1264_v37  ;;  %v7097_v49 = vcombine.high %v1252_v44, %v1256_v45  ;;  %v1208_v36 = vld [vmem:[#allocation3 + $0x438] sm:$0xff] }
 0x409   :  { %2837 = vmatpush2.bf16.msra.mxu1 %v7158_v46  ;;  %v6976_v46 = vcombine.low %v1132_v34, %v1136_v35  ;;  %v1080_v34 = vld [vmem:[#allocation3 + $0x38] sm:$0xff] }
 0x40a   :  { %2838 = vmatprep.subr.bf16.mxu1 %v7151_v48  ;;  %v6969_v48 = vcombine.high %v1124_v42, %v1128_v43  ;;  %v1204_v35 = vld [vmem:[#allocation3 + $0x418] sm:$0xff] }
 0x40b   :  { %2798 = vmatpush2.bf16.msra.mxu0 %v7022_v53  ;;  %v1248_v53 = vld [vmem:[#allocation3 + $0x578] sm:$0xff] }
 0x40c   :  { %2799 = vmatprep.subr.bf16.mxu0 %v7015_v55  ;;  %v7096_v55 = vcombine.low %v1252_v44, %v1256_v45  ;;  %v7089_v58 = vcombine.high %v1244_v52, %v1248_v53  ;;  %v1328_v44 = vld [vmem:[#allocation3 + $0x7f8] sm:$0xff] }
 0x40d   :  { %2839 = vmatpush2.bf16.msra.mxu1 %v7150_v54  ;;  %v6968_v54 = vcombine.low %v1124_v42, %v1128_v43  ;;  %v1200_v42 = vld [vmem:[#allocation3 + $0x3f8] sm:$0xff] }
 0x40e   :  { %2840 = vmatprep.subr.bf16.mxu1 %v7143_v32  ;;  %v6961_v32 = vcombine.high %v1116_v50, %v1120_v51  ;;  %v1324_v43 = vld [vmem:[#allocation3 + $0x7d8] sm:$0xff] }
 0x40f   :  { %2800 = vmatpush2.bf16.msra.mxu0 %v7014_v62  ;;  %v1240_v62 = vld [vmem:[#allocation3 + $0x538] sm:$0xff] }
 0x410   :  { %2801 = vmatprep.subr.bf16.mxu0 %v7007_v1  ;;  %v7088_v1 = vcombine.low %v1244_v52, %v1248_v53  ;;  %v7081_v4 = vcombine.high %v1236_v61, %v1240_v62  ;;  %v1320_v52 = vld [vmem:[#allocation3 + $0x7b8] sm:$0xff] }
 0x411   :  { %2841 = vmatpush2.bf16.msra.mxu1 %v7142_v63  ;;  %v6960_v63 = vcombine.low %v1116_v50, %v1120_v51  ;;  %v1192_v50 = vld [vmem:[#allocation3 + $0x3b8] sm:$0xff] }
 0x412   :  { %2842 = vmatprep.subr.bf16.mxu1 %v7135_v2  ;;  %v6953_v2 = vcombine.high %v1108_v59, %v1112_v60  ;;  %v1316_v51 = vld [vmem:[#allocation3 + $0x798] sm:$0xff] }
 0x413   :  { %2802 = vmatpush2.bf16.msra.mxu0 %v7006_v8  ;;  %v1232_v8 = vld [vmem:[#allocation3 + $0x4f8] sm:$0xff] }
 0x414   :  { %2803 = vmatprep.subr.bf16.mxu0 %v6999_v31  ;;  %v6945_v31 = vcombine.high %v1100_v5, %v1104_v6  ;;  %v1176_v5 = vld [vmem:[#allocation3 + $0x338] sm:$0xff] }
 0x415   :  { %2843 = vmatpush2.bf16.msra.mxu1 %v7134_v9  ;;  %v6952_v9 = vcombine.low %v1108_v59, %v1112_v60  ;;  %v1184_v59 = vld [vmem:[#allocation3 + $0x378] sm:$0xff] }
 0x416   :  { %2844 = vmatprep.subr.bf16.mxu1 %v7127_v14  ;;  %v1092_v14 = vld [vmem:[#allocation3 + $0x98] sm:$0xff] }
 0x417   :  { %2804 = vmatpush2.bf16.msra.mxu0 %v6998_v21  ;;  %v7072_v21 = vcombine.low %v1228_v7, %v1232_v8  ;;  %v6936_v28 = vcombine.low %v1092_v14, %v1096_v16  ;;  %v1308_v60 = vld [vmem:[#allocation3 + $0x758] sm:$0xff] }
 0x418   :  { %2805 = vmatprep.subr.bf16.mxu0 %v6991_v23  ;;  %v7065_v23 = vcombine.high %v1220_v33, %v1224_v17  ;;  %v1300_v6 = vld [vmem:[#allocation3 + $0x718] sm:$0xff] }
 0x419   :  { %2845 = vmatpush2.bf16.msra.mxu1 %v7126_v22  ;;  %v6937_v22 = vcombine.high %v1092_v14, %v1096_v16  ;;  %v1168_v14 = vld [vmem:[#allocation3 + $0x2f8] sm:$0xff] }
 0x41a   :  { %2846 = vmatprep.subr.bf16.mxu1 %v7119_v24  ;;  %v1084_v24 = vld [vmem:[#allocation3 + $0x58] sm:$0xff] }
 0x41b   :  { %2806 = vmatpush2.bf16.msra.mxu0 %v6990_v29  ;;  %v7064_v29 = vcombine.low %v1220_v33, %v1224_v17  ;;  %v6928_v37 = vcombine.low %v1084_v24, %v1088_v25  ;;  %v1292_v16 = vld [vmem:[#allocation3 + $0x6d8] sm:$0xff] }
 0x41c   :  { %2807 = vmatprep.subr.bf16.mxu0 %v6983_v30  ;;  %v7057_v30 = vcombine.high %v1212_v26, %v1216_v27  ;;  %v1296_v33 = vld [vmem:[#allocation3 + $0x6f8] sm:$0xff] }
 0x41d   :  { %2847 = vmatpush2.bf16.msra.mxu1 %v7118_v10  ;;  %v6929_v10 = vcombine.high %v1084_v24, %v1088_v25  ;;  %v1160_v24 = vld [vmem:[#allocation3 + $0x2b8] sm:$0xff] }
 0x41e   :  { %2848 = vmatprep.subr.bf16.mxu1 %v7111_v11  ;;  %v1076_v11 = vld [vmem:[#allocation3 + $0x18] sm:$0xff] }
 0x41f   :  { %2808 = vmatpush2.bf16.msra.mxu0 %v6982_v38  ;;  %v7056_v38 = vcombine.low %v1212_v26, %v1216_v27  ;;  %v6920_v45 = vcombine.low %v1076_v11, %v1080_v34  ;;  %v1284_v25 = vld [vmem:[#allocation3 + $0x698] sm:$0xff] }
 0x420   :  { %2859 = vmatprep.subr.bf16.mxu0 %v6977_v40  ;;  %v7049_v40 = vcombine.high %v1204_v35, %v1208_v36  ;;  %v1288_v26 = vld [vmem:[#allocation3 + $0x6b8] sm:$0xff] }
 0x421   :  { %2849 = vmatpush2.bf16.msra.mxu1 %v7110_v39  ;;  %v6921_v39 = vcombine.high %v1076_v11, %v1080_v34  ;;  %v1152_v11 = vld [vmem:[#allocation3 + $0x278] sm:$0xff] }
 0x422   :  { %2900 = vmatprep.subr.bf16.mxu1 %v7105_v41  ;;  %2810 = vmatmul.mubr.bf16.vlgmr.msra.gmra.mxu0 %v8881_v0  ;;  %v1196_v41 = vld [vmem:[#allocation3 + $0x3d8] sm:$0xff] }
 0x423   :  { %2860 = vmatpush1.bf16.msra.mxu0 %v6976_v46  ;;  %2891 = vmatprep.mubr.bf16.mxu0 %v8873_v19  ;;  %v7080_v19 = vcombine.low %v1236_v61, %v1240_v62  ;;  %v7048_v46 = vcombine.low %v1204_v35, %v1208_v36  ;;  %v7040_v53 = vcombine.low %v1196_v41, %v1200_v42  ;;  %v1312_v61 = vld [vmem:[#allocation3 + $0x778] sm:$0xff] }
 0x424   :  { %2851 = vmatmul.mubr.bf16.vlgmr.msra.gmra.mxu1 %v8885_v3  ;;  %2861 = vmatprep.subr.bf16.mxu0 %v6969_v48  ;;  %v7169_v48 = vcombine.high %v1324_v43, %v1328_v44  ;;  %v1276_v34 = vld [vmem:[#allocation3 + $0x658] sm:$0xff] }
 0x425   :  { %2901 = vmatpush1.bf16.msra.mxu1 %v7104_v47  ;;  %2932 = vmatprep.mubr.bf16.mxu1 %v8875_v20  ;;  %v7073_v20 = vcombine.high %v1228_v7, %v1232_v8  ;;  %v7041_v47 = vcombine.high %v1196_v41, %v1200_v42  ;;  %v1304_v7 = vld [vmem:[#allocation3 + $0x738] sm:$0xff] }
 0x426   :  { %2902 = vmatprep.subr.bf16.mxu1 %v7097_v49  ;;  %v1188_v49 = vld [vmem:[#allocation3 + $0x398] sm:$0xff] }
 0x427   :  { %2862 = vmatpush1.bf16.msra.mxu0 %v6968_v54  ;;  %v7168_v54 = vcombine.low %v1324_v43, %v1328_v44  ;;  %v7032_v62 = vcombine.low %v1188_v49, %v1192_v50  ;;  %v1280_v35 = vld [vmem:[#allocation3 + $0x678] sm:$0xff] }
 0x428   :  { %2863 = vmatprep.subr.bf16.mxu0 %v6961_v32  ;;  %v7161_v32 = vcombine.high %v1316_v51, %v1320_v52  ;;  %v1144_v41 = vld [vmem:[#allocation3 + $0x238] sm:$0xff] }
 0x429   :  { %2903 = vmatpush1.bf16.msra.mxu1 %v7096_v55  ;;  %v7033_v55 = vcombine.high %v1188_v49, %v1192_v50  ;;  %v1268_v42 = vld [vmem:[#allocation3 + $0x618] sm:$0xff] }
 0x42a   :  { %2904 = vmatprep.subr.bf16.mxu1 %v7089_v58  ;;  %v1180_v58 = vld [vmem:[#allocation3 + $0x358] sm:$0xff] }
 0x42b   :  { %2864 = vmatpush1.bf16.msra.mxu0 %v6960_v63  ;;  %v7160_v63 = vcombine.low %v1316_v51, %v1320_v52  ;;  %v7024_v8 = vcombine.low %v1180_v58, %v1184_v59  ;;  %v1272_v43 = vld [vmem:[#allocation3 + $0x638] sm:$0xff] }
 0x42c   :  { %2865 = vmatprep.subr.bf16.mxu0 %v6953_v2  ;;  %v7153_v2 = vcombine.high %v1308_v60, %v1312_v61  ;;  %v7112_v49 = vcombine.low %v1268_v42, %v1272_v43 }
 0x42d   :  { %2905 = vmatpush1.bf16.msra.mxu1 %v7088_v1  ;;  %v7025_v1 = vcombine.high %v1180_v58, %v1184_v59 }
 0x42e   :  { %2906 = vmatprep.subr.bf16.mxu1 %v7081_v4  ;;  %v1172_v4 = vld [vmem:[#allocation3 + $0x318] sm:$0xff] }
 0x42f   :  { %2866 = vmatpush1.bf16.msra.mxu0 %v6952_v9  ;;  %v7152_v9 = vcombine.low %v1308_v60, %v1312_v61  ;;  %v7016_v17 = vcombine.low %v1172_v4, %v1176_v5 }
 0x430   :  { %2867 = vmatprep.subr.bf16.mxu0 %v6945_v31  ;;  %v7145_v31 = vcombine.high %v1300_v6, %v1304_v7 }
 0x431   :  { %2907 = vmatpush1.bf16.msra.mxu1 %v7080_v19  ;;  %v7017_v19 = vcombine.high %v1172_v4, %v1176_v5 }
 0x432   :  { %2908 = vmatprep.subr.bf16.mxu1 %v7073_v20  ;;  %v1164_v20 = vld [vmem:[#allocation3 + $0x2d8] sm:$0xff] }
 0x433   :  { %2868 = vmatpush1.bf16.msra.mxu0 %v6944_v18  ;;  %v7144_v18 = vcombine.low %v1300_v6, %v1304_v7  ;;  %v7008_v27 = vcombine.low %v1164_v20, %v1168_v14 }
 0x434   :  { %2869 = vmatprep.subr.bf16.mxu0 %v6937_v22  ;;  %v7137_v22 = vcombine.high %v1292_v16, %v1296_v33 }
 0x435   :  { %2909 = vmatpush1.bf16.msra.mxu1 %v7072_v21  ;;  %v7009_v21 = vcombine.high %v1164_v20, %v1168_v14 }
 0x436   :  { %2910 = vmatprep.subr.bf16.mxu1 %v7065_v23  ;;  %v1156_v23 = vld [vmem:[#allocation3 + $0x298] sm:$0xff] }
 0x437   :  { %2870 = vmatpush1.bf16.msra.mxu0 %v6936_v28  ;;  %v7136_v28 = vcombine.low %v1292_v16, %v1296_v33  ;;  %v7000_v36 = vcombine.low %v1156_v23, %v1160_v24 }
 0x438   :  { %2871 = vmatprep.subr.bf16.mxu0 %v6929_v10  ;;  %v7129_v10 = vcombine.high %v1284_v25, %v1288_v26 }
 0x439   :  { %2911 = vmatpush1.bf16.msra.mxu1 %v7064_v29  ;;  %v7001_v29 = vcombine.high %v1156_v23, %v1160_v24 }
 0x43a   :  { %2912 = vmatprep.subr.bf16.mxu1 %v7057_v30  ;;  %v1148_v30 = vld [vmem:[#allocation3 + $0x258] sm:$0xff] }
 0x43b   :  { %2872 = vmatpush1.bf16.msra.mxu0 %v6928_v37  ;;  %v7128_v37 = vcombine.low %v1284_v25, %v1288_v26  ;;  %v6992_v44 = vcombine.low %v1148_v30, %v1152_v11 }
 0x43c   :  { %2873 = vmatprep.subr.bf16.mxu0 %v6921_v39  ;;  %v7121_v39 = vcombine.high %v1276_v34, %v1280_v35 }
 0x43d   :  { %2913 = vmatpush1.bf16.msra.mxu1 %v7056_v38  ;;  %v6993_v38 = vcombine.high %v1148_v30, %v1152_v11 }
 0x43e   :  { %2914 = vmatprep.subr.bf16.mxu1 %v7049_v40  ;;  %v1140_v40 = vld [vmem:[#allocation3 + $0x218] sm:$0xff] }
 0x43f   :  { %2874 = vmatpush1.bf16.msra.mxu0 %v6920_v45  ;;  %v7120_v45 = vcombine.low %v1276_v34, %v1280_v35  ;;  %v2942_v35 = vld [vmem:[#allocation12 + $0x5] ss:$8 sm:$0xf] }
 0x440   :  { %2875 = vmatprep.subr.bf16.mxu0 %v7041_v47  ;;  %v7113_v47 = vcombine.high %v1268_v42, %v1272_v43 }
 0x441   :  { %2915 = vmatpush1.bf16.msra.mxu1 %v7048_v46  ;;  %v6985_v46 = vcombine.high %v1140_v40, %v1144_v41 }
 0x442   :  { %2916 = vmatprep.subr.bf16.mxu1 %v7169_v48  ;;  %v6984_v48 = vcombine.low %v1140_v40, %v1144_v41 }
 0x443   :  { %2876 = vmatpush2.bf16.msra.mxu0 %v7040_v53 }
 0x444   :  { %2877 = vmatprep.subr.bf16.mxu0 %v7033_v55 }
 0x445   :  { %2917 = vmatpush2.bf16.msra.mxu1 %v7168_v54 }
 0x446   :  { %2918 = vmatprep.subr.bf16.mxu1 %v7161_v32 }
 0x447   :  { %2878 = vmatpush2.bf16.msra.mxu0 %v7032_v62 }
 0x448   :  { %2879 = vmatprep.subr.bf16.mxu0 %v7025_v1 }
 0x449   :  { %2919 = vmatpush2.bf16.msra.mxu1 %v7160_v63 }
 0x44a   :  { %2920 = vmatprep.subr.bf16.mxu1 %v7153_v2 }
 0x44b   :  { %2880 = vmatpush2.bf16.msra.mxu0 %v7024_v8 }
 0x44c   :  { %2881 = vmatprep.subr.bf16.mxu0 %v7017_v19 }
 0x44d   :  { %2921 = vmatpush2.bf16.msra.mxu1 %v7152_v9 }
 0x44e   :  { %2922 = vmatprep.subr.bf16.mxu1 %v7145_v31 }
 0x44f   :  { %2882 = vmatpush2.bf16.msra.mxu0 %v7016_v17 }
 0x450   :  { %2883 = vmatprep.subr.bf16.mxu0 %v7009_v21 }
 0x451   :  { %2923 = vmatpush2.bf16.msra.mxu1 %v7144_v18 }
 0x452   :  { %2924 = vmatprep.subr.bf16.mxu1 %v7137_v22 }
 0x453   :  { %2884 = vmatpush2.bf16.msra.mxu0 %v7008_v27 }
 0x454   :  { %2885 = vmatprep.subr.bf16.mxu0 %v7001_v29 }
 0x455   :  { %2925 = vmatpush2.bf16.msra.mxu1 %v7136_v28 }
 0x456   :  { %2926 = vmatprep.subr.bf16.mxu1 %v7129_v10 }
 0x457   :  { %2886 = vmatpush2.bf16.msra.mxu0 %v7000_v36  ;;  %v2943_v36 = vld [vmem:[#allocation12 + $0x5] ss:$8 sm:$0xf0] }
 0x458   :  { %2887 = vmatprep.subr.bf16.mxu0 %v6993_v38  ;;  %v2946_v38 = vld [vmem:[#allocation12 + $0x6] ss:$8 sm:$0xf] }
 0x459   :  { %2927 = vmatpush2.bf16.msra.mxu1 %v7128_v37  ;;  %v8901_v37 = vor.u32 %v2943_v36, %v2942_v35 }
 0x45a   :  { %2928 = vmatprep.subr.bf16.mxu1 %v7121_v39  ;;  %v2947_v39 = vld [vmem:[#allocation12 + $0x6] ss:$8 sm:$0xf0] }
 0x45b   :  { %2888 = vmatpush2.bf16.msra.mxu0 %v6992_v44  ;;  %v3097_v40 = vrot.slane %v8901_v37, %v8816_v13  ;;  %v8905_v41 = vor.u32 %v2947_v39, %v2946_v38  ;;  %v3101_v42 = vrot.slane %v8901_v37, %v8819_v15 }
 0x45c   :  { %2889 = vmatprep.subr.bf16.mxu0 %v6985_v46 }
 0x45d   :  { %2929 = vmatpush2.bf16.msra.mxu1 %v7120_v45 }
 0x45e   :  { %2930 = vmatprep.subr.bf16.mxu1 %v7113_v47  ;;  %v3186_v47 = vrot.slane %v8905_v41, %v8816_v13 }
 0x45f   :  { %2890 = vmatpush2.bf16.msra.mxu0 %v6984_v48 }
 0x461   :  { %2931 = vmatpush2.bf16.msra.mxu1 %v7112_v49 }
 0x462   :  { %v2647_v50 = vpop.f32.mrf.mxu0  ;;  %2892 = vmatmul.mubr.bf16.vlgmr.msra.gmra.mxu0 %v8881_v0 }
 0x464   :  { %v2688_v51 = vpop.f32.mrf.mxu1  ;;  %2933 = vmatmul.mubr.bf16.vlgmr.msra.gmra.mxu1 %v8885_v3  ;;  %v2649_v53 = vpop.f32.mrf.mxu0 }
 0x465   :  { %v2689_v52 = vadd.f32 %v2688_v51, %v2647_v50  ;;  %v3190_v51 = vrot.slane %v8905_v41, %v8819_v15 }
 0x466   :  { %v2690_v54 = vpop.f32.mrf.mxu1  ;;  %v2651_v58 = vpop.f32.mrf.mxu0 }
 0x467   :  { %v2949_v55 = vrot.slane %v2689_v52, 4  ;;  %v2691_v32 = vadd.f32 %v2690_v54, %v2649_v53 }
 0x468   :  { %v2692_v59 = vpop.f32.mrf.mxu1  ;;  %v2652_v62 = vpop.f32.mrf.mxu0 }
 0x469   :  { %v2950_v60 = vadd.f32 %v2949_v55, %v2689_v52  ;;  %v2955_v61 = vrot.slane %v2691_v32, 4 }
 0x46a   :  { %v2693_v63 = vpop.f32.mrf.mxu1 }
 0x46b   :  { %v2951_v1 = vrot.slane %v2950_v60, 2  ;;  %v2956_v2 = vadd.f32 %v2955_v61, %v2691_v32 }
 0x46d   :  { %v2952_v4 = vadd.f32 %v2951_v1, %v2950_v60  ;;  %v2957_v5 = vrot.slane %v2956_v2, 2 }
 0x46f   :  { %v2953_v6 = vrot.slane %v2952_v4, 1  ;;  %v2958_v0 = vadd.f32 %v2957_v5, %v2956_v2 }
 0x471   :  { %v2954_v7 = vadd.f32 %v2953_v6, %v2952_v4  ;;  %v2959_v8 = vrot.slane %v2958_v0, 1 }
 0x473   :  { %v2997_v3 = vmul.f32 0.125, %v2954_v7  ;;  %v2960_v9 = vadd.f32 %v2959_v8, %v2958_v0 }
 0x475   :  { %v3005_v19 = vsub.f32 %v2689_v52, %v2997_v3  ;;  %v2998_v31 = vmul.f32 0.125, %v2960_v9 }
 0x477   :  { %v3013_v20 = vmul.f32 %v3005_v19, %v3005_v19  ;;  %v3006_v14 = vsub.f32 %v2691_v32, %v2998_v31 }
 0x479   :  { %v3021_v16 = vrot.slane %v3013_v20, 4  ;;  %v3014_v33 = vmul.f32 %v3006_v14, %v3006_v14 }
 0x47b   :  { %v3022_v17 = vadd.f32 %v3021_v16, %v3013_v20  ;;  %v3027_v18 = vrot.slane %v3014_v33, 4 }
 0x47d   :  { %v3023_v21 = vrot.slane %v3022_v17, 2  ;;  %v3028_v22 = vadd.f32 %v3027_v18, %v3014_v33 }
 0x47f   :  { %v3024_v23 = vadd.f32 %v3023_v21, %v3022_v17  ;;  %v3029_v24 = vrot.slane %v3028_v22, 2 }
 0x481   :  { %v3025_v25 = vrot.slane %v3024_v23, 1  ;;  %v3030_v26 = vadd.f32 %v3029_v24, %v3028_v22 }
 0x483   :  { %v3026_v27 = vadd.f32 %v3025_v25, %v3024_v23  ;;  %v3031_v28 = vrot.slane %v3030_v26, 1 }
 0x485   :  { %v3069_v29 = vmul.f32 0.125, %v3026_v27  ;;  %v3032_v10 = vadd.f32 %v3031_v28, %v3030_v26 }
 0x487   :  { %v3077_v30 = vadd.f32 1e-05, %v3069_v29  ;;  %v3070_v11 = vmul.f32 0.125, %v3032_v10 }
 0x489   :  { %7893 = vrsqrt.f32 %v3077_v30  ;;  %v3078_v34 = vadd.f32 1e-05, %v3070_v11 }
 0x48b   :  { %7895 = vrsqrt.f32 %v3078_v34 }
 0x496   :  { %v7894_v43 = vpop.eup %7893 }
 0x497   :  { %v3134_v44 = vmul.f32 %v7894_v43, %v3097_v40 }
 0x498   :  { %v7896_v45 = vpop.eup %7895 }
 0x499   :  { %v3145_v46 = vrot.slane %v3134_v44, %v8816_v13  ;;  %v3135_v48 = vmul.f32 %v7896_v45, %v3101_v42 }
 0x49b   :  { %v3174_v49 = vmul.f32 %v3145_v46, %v3005_v19  ;;  %v3149_v50 = vrot.slane %v3135_v48, %v8816_v13  ;;  %v3105_v46 = vrot.slane %v8901_v37, %v8848_v56 }
 0x49d   :  { %v3223_v52 = vadd.f32 %v3186_v47, %v3174_v49  ;;  %v3175_v53 = vmul.f32 %v3149_v50, %v3006_v14  ;;  %v3109_v47 = vrot.slane %v8901_v37, %v8851_v57 }
 0x49f   :  { %vm3231_vm8 = vcmp.ge.f32.partialorder %v3223_v52, 0.0  ;;  %v3239_v54 = vmul.f32 0.2, %v3223_v52  ;;  %v3224_v55 = vadd.f32 %v3190_v51, %v3175_v53 }
 0x4a1   :  { %v8915_v32 = vsel %vm3231_vm8, %v3223_v52, %v3239_v54  ;;  %vm3232_vm9 = vcmp.ge.f32.partialorder %v3224_v55, 0.0  ;;  %v3240_v58 = vmul.f32 0.2, %v3224_v55  ;;  %v3194_v52 = vrot.slane %v8905_v41, %v8848_v56 }
 0x4a2   :  { %v2729_v60 = vpop.f32.mrf.mxu0 }
 0x4a3   :  { %v8917_v59 = vsel %vm3232_vm9, %v3224_v55, %v3240_v58  ;;  %v3198_v58 = vrot.slane %v8905_v41, %v8851_v57 }
 0x4a4   :  { %v2770_v61 = vpop.f32.mrf.mxu1  ;;  %v2731_v63 = vpop.f32.mrf.mxu0 }
 0x4a5   :  { %v2771_v62 = vadd.f32 %v2770_v61, %v2729_v60 }
 0x4a6   :  { %v2772_v1 = vpop.f32.mrf.mxu1  ;;  %v2733_v5 = vpop.f32.mrf.mxu0 }
 0x4a7   :  { %v2961_v2 = vrot.slane %v2771_v62, 4  ;;  %v2773_v4 = vadd.f32 %v2772_v1, %v2731_v63 }
 0x4a8   :  { %v2774_v6 = vpop.f32.mrf.mxu1  ;;  %v2734_v8 = vpop.f32.mrf.mxu0 }
 0x4a9   :  { %v2962_v0 = vadd.f32 %v2961_v2, %v2771_v62  ;;  %v2967_v7 = vrot.slane %v2773_v4, 4 }
 0x4aa   :  { %v2775_v3 = vpop.f32.mrf.mxu1 }
 0x4ab   :  { %v2963_v9 = vrot.slane %v2962_v0, 2  ;;  %v2968_v19 = vadd.f32 %v2967_v7, %v2773_v4 }
 0x4ad   :  { %v2964_v31 = vadd.f32 %v2963_v9, %v2962_v0  ;;  %v2969_v20 = vrot.slane %v2968_v19, 2 }
 0x4af   :  { %v2965_v14 = vrot.slane %v2964_v31, 1  ;;  %v2970_v16 = vadd.f32 %v2969_v20, %v2968_v19 }
 0x4b1   :  { %v2966_v33 = vadd.f32 %v2965_v14, %v2964_v31  ;;  %v2971_v17 = vrot.slane %v2970_v16, 1 }
 0x4b3   :  { %v2999_v18 = vmul.f32 0.125, %v2966_v33  ;;  %v2972_v21 = vadd.f32 %v2971_v17, %v2970_v16 }
 0x4b5   :  { %v3007_v22 = vsub.f32 %v2771_v62, %v2999_v18  ;;  %v3000_v23 = vmul.f32 0.125, %v2972_v21 }
 0x4b7   :  { %v3015_v24 = vmul.f32 %v3007_v22, %v3007_v22  ;;  %v3008_v25 = vsub.f32 %v2773_v4, %v3000_v23 }
 0x4b9   :  { %v3033_v26 = vrot.slane %v3015_v24, 4  ;;  %v3016_v27 = vmul.f32 %v3008_v25, %v3008_v25 }
 0x4bb   :  { %v3034_v28 = vadd.f32 %v3033_v26, %v3015_v24  ;;  %v3039_v29 = vrot.slane %v3016_v27, 4 }
 0x4bd   :  { %v3035_v10 = vrot.slane %v3034_v28, 2  ;;  %v3040_v30 = vadd.f32 %v3039_v29, %v3016_v27 }
 0x4bf   :  { %v3036_v11 = vadd.f32 %v3035_v10, %v3034_v28  ;;  %v3041_v34 = vrot.slane %v3040_v30, 2 }
 0x4c1   :  { %v3037_v35 = vrot.slane %v3036_v11, 1  ;;  %v3042_v36 = vadd.f32 %v3041_v34, %v3040_v30 }
 0x4c3   :  { %v3038_v38 = vadd.f32 %v3037_v35, %v3036_v11  ;;  %v3043_v39 = vrot.slane %v3042_v36, 1 }
 0x4c5   :  { %v3071_v40 = vmul.f32 0.125, %v3038_v38  ;;  %v3044_v42 = vadd.f32 %v3043_v39, %v3042_v36 }
 0x4c7   :  { %v3079_v43 = vadd.f32 1e-05, %v3071_v40  ;;  %v3072_v44 = vmul.f32 0.125, %v3044_v42 }
 0x4c9   :  { %7897 = vrsqrt.f32 %v3079_v43  ;;  %v3080_v45 = vadd.f32 1e-05, %v3072_v44 }
 0x4cb   :  { %7899 = vrsqrt.f32 %v3080_v45 }
 0x4d6   :  { %v7898_v48 = vpop.eup %7897 }
 0x4d7   :  { %v3136_v49 = vmul.f32 %v7898_v48, %v3105_v46 }
 0x4d8   :  { %v7900_v50 = vpop.eup %7899 }
 0x4d9   :  { %v3153_v51 = vrot.slane %v3136_v49, %v8816_v13  ;;  %v3137_v53 = vmul.f32 %v7900_v50, %v3109_v47 }
 0x4db   :  { %v3176_v54 = vmul.f32 %v3153_v51, %v3007_v22  ;;  %v3157_v55 = vrot.slane %v3137_v53, %v8816_v13  ;;  %v8934_v53 = vsub.s32 4, %v8813_v12 }
 0x4dd   :  { %v3225_v60 = vadd.f32 %v3194_v52, %v3176_v54  ;;  %v3177_v61 = vmul.f32 %v3157_v55, %v3008_v25  ;;  %v8937_v54 = vsub.s32 5, %v8813_v12  ;;  %v3113_v55 = vrot.slane %v8901_v37, %v8934_v53 }
 0x4df   :  { %vm3233_vm10 = vcmp.ge.f32.partialorder %v3225_v60, 0.0  ;;  %v3241_v62 = vmul.f32 0.2, %v3225_v60  ;;  %v3226_v63 = vadd.f32 %v3198_v58, %v3177_v61  ;;  %v3117_v58 = vrot.slane %v8901_v37, %v8937_v54 }
 0x4e1   :  { %v8929_v1 = vsel %vm3233_vm10, %v3225_v60, %v3241_v62  ;;  %vm3234_vm11 = vcmp.ge.f32.partialorder %v3226_v63, 0.0  ;;  %v3242_v2 = vmul.f32 0.2, %v3226_v63 }
 0x4e2   :  { %v2811_v5 = vpop.f32.mrf.mxu0 }
 0x4e3   :  { %v8931_v4 = vsel %vm3234_vm11, %v3226_v63, %v3242_v2  ;;  %v3202_v2 = vrot.slane %v8905_v41, %v8934_v53 }
 0x4e4   :  { %v2852_v6 = vpop.f32.mrf.mxu1  ;;  %v2813_v7 = vpop.f32.mrf.mxu0 }
 0x4e5   :  { %v2853_v0 = vadd.f32 %v2852_v6, %v2811_v5 }
 0x4e6   :  { %v2854_v8 = vpop.f32.mrf.mxu1  ;;  %v2815_v19 = vpop.f32.mrf.mxu0 }
 0x4e7   :  { %v2973_v3 = vrot.slane %v2853_v0, 4  ;;  %v2855_v9 = vadd.f32 %v2854_v8, %v2813_v7  ;;  %v3206_v7 = vrot.slane %v8905_v41, %v8937_v54 }
 0x4e8   :  { %v2856_v31 = vpop.f32.mrf.mxu1  ;;  %v2816_v16 = vpop.f32.mrf.mxu0 }
 0x4e9   :  { %v2974_v20 = vadd.f32 %v2973_v3, %v2853_v0  ;;  %v2979_v14 = vrot.slane %v2855_v9, 4 }
 0x4ea   :  { %v2857_v33 = vpop.f32.mrf.mxu1 }
 0x4eb   :  { %v2975_v17 = vrot.slane %v2974_v20, 2  ;;  %v2980_v18 = vadd.f32 %v2979_v14, %v2855_v9 }
 0x4ed   :  { %v2976_v21 = vadd.f32 %v2975_v17, %v2974_v20  ;;  %v2981_v22 = vrot.slane %v2980_v18, 2 }
 0x4ef   :  { %v2977_v23 = vrot.slane %v2976_v21, 1  ;;  %v2982_v24 = vadd.f32 %v2981_v22, %v2980_v18 }
 0x4f1   :  { %v2978_v25 = vadd.f32 %v2977_v23, %v2976_v21  ;;  %v2983_v26 = vrot.slane %v2982_v24, 1 }
 0x4f3   :  { %v3001_v27 = vmul.f32 0.125, %v2978_v25  ;;  %v2984_v28 = vadd.f32 %v2983_v26, %v2982_v24 }
 0x4f5   :  { %v3009_v29 = vsub.f32 %v2853_v0, %v3001_v27  ;;  %v3002_v10 = vmul.f32 0.125, %v2984_v28 }
 0x4f7   :  { %v3017_v30 = vmul.f32 %v3009_v29, %v3009_v29  ;;  %v3010_v11 = vsub.f32 %v2855_v9, %v3002_v10 }
 0x4f9   :  { %v3045_v34 = vrot.slane %v3017_v30, 4  ;;  %v3018_v35 = vmul.f32 %v3010_v11, %v3010_v11 }
 0x4fb   :  { %v3046_v36 = vadd.f32 %v3045_v34, %v3017_v30  ;;  %v3051_v38 = vrot.slane %v3018_v35, 4 }
 0x4fd   :  { %v3047_v39 = vrot.slane %v3046_v36, 2  ;;  %v3052_v40 = vadd.f32 %v3051_v38, %v3018_v35 }
 0x4ff   :  { %v3048_v42 = vadd.f32 %v3047_v39, %v3046_v36  ;;  %v3053_v43 = vrot.slane %v3052_v40, 2 }
 0x501   :  { %v3049_v44 = vrot.slane %v3048_v42, 1  ;;  %v3054_v45 = vadd.f32 %v3053_v43, %v3052_v40 }
 0x503   :  { %v3050_v46 = vadd.f32 %v3049_v44, %v3048_v42  ;;  %v3055_v47 = vrot.slane %v3054_v45, 1 }
 0x505   :  { %v3073_v48 = vmul.f32 0.125, %v3050_v46  ;;  %v3056_v49 = vadd.f32 %v3055_v47, %v3054_v45 }
 0x507   :  { %v3081_v50 = vadd.f32 1e-05, %v3073_v48  ;;  %v3074_v51 = vmul.f32 0.125, %v3056_v49 }
 0x509   :  { %7901 = vrsqrt.f32 %v3081_v50  ;;  %v3082_v52 = vadd.f32 1e-05, %v3074_v51 }
 0x50b   :  { %7903 = vrsqrt.f32 %v3082_v52 }
 0x516   :  { %v7902_v60 = vpop.eup %7901 }
 0x517   :  { %v3138_v61 = vmul.f32 %v7902_v60, %v3113_v55 }
 0x518   :  { %v7904_v62 = vpop.eup %7903 }
 0x519   :  { %v3161_v63 = vrot.slane %v3138_v61, %v8816_v13  ;;  %v3139_v5 = vmul.f32 %v7904_v62, %v3117_v58 }
 0x51b   :  { %v3178_v6 = vmul.f32 %v3161_v63, %v3009_v29  ;;  %v3165_v0 = vrot.slane %v3139_v5, %v8816_v13 }
 0x51d   :  { %v3227_v8 = vadd.f32 %v3202_v2, %v3178_v6  ;;  %v3179_v3 = vmul.f32 %v3165_v0, %v3010_v11 }
 0x51f   :  { %vm3235_vm12 = vcmp.ge.f32.partialorder %v3227_v8, 0.0  ;;  %v3243_v9 = vmul.f32 0.2, %v3227_v8  ;;  %v3228_v19 = vadd.f32 %v3206_v7, %v3179_v3  ;;  %v3124_v3 = vsub.s32 7, %v8813_v12 }
 0x521   :  { %v8949_v31 = vsel %vm3235_vm12, %v3227_v8, %v3243_v9  ;;  %vm3236_vm13 = vcmp.ge.f32.partialorder %v3228_v19, 0.0  ;;  %v3244_v20 = vmul.f32 0.2, %v3228_v19  ;;  %v8954_v8 = vsub.s32 6, %v8813_v12 }
 0x522   :  { %v2893_v16 = vpop.f32.mrf.mxu0 }
 0x523   :  { %v8951_v14 = vsel %vm3236_vm13, %v3228_v19, %v3244_v20  ;;  %v3121_v9 = vrot.slane %v8901_v37, %v8954_v8  ;;  %v3125_v19 = vrot.slane %v8901_v37, %v3124_v3 }
 0x524   :  { %v2934_v33 = vpop.f32.mrf.mxu1  ;;  %v2895_v18 = vpop.f32.mrf.mxu0 }
 0x525   :  { %v2935_v17 = vadd.f32 %v2934_v33, %v2893_v16 }
 0x526   :  { %v2936_v21 = vpop.f32.mrf.mxu1  ;;  %v2897_v24 = vpop.f32.mrf.mxu0 }
 0x527   :  { %v2985_v22 = vrot.slane %v2935_v17, 4  ;;  %v2937_v23 = vadd.f32 %v2936_v21, %v2895_v18  ;;  %v3210_v18 = vrot.slane %v8905_v41, %v8954_v8  ;;  %v3214_v24 = vrot.slane %v8905_v41, %v3124_v3 }
 0x528   :  { %v2938_v25 = vpop.f32.mrf.mxu1  ;;  %v2898_v28 = vpop.f32.mrf.mxu0 }
 0x529   :  { %v2986_v26 = vadd.f32 %v2985_v22, %v2935_v17  ;;  %v2991_v27 = vrot.slane %v2937_v23, 4 }
 0x52a   :  { %v2939_v29 = vpop.f32.mrf.mxu1 }
 0x52b   :  { %v2987_v10 = vrot.slane %v2986_v26, 2  ;;  %v2992_v30 = vadd.f32 %v2991_v27, %v2937_v23 }
 0x52d   :  { %v2988_v11 = vadd.f32 %v2987_v10, %v2986_v26  ;;  %v2993_v34 = vrot.slane %v2992_v30, 2 }
 0x52f   :  { %v2989_v35 = vrot.slane %v2988_v11, 1  ;;  %v2994_v36 = vadd.f32 %v2993_v34, %v2992_v30 }
 0x531   :  { %v2990_v38 = vadd.f32 %v2989_v35, %v2988_v11  ;;  %v2995_v39 = vrot.slane %v2994_v36, 1 }
 0x533   :  { %v3003_v40 = vmul.f32 0.125, %v2990_v38  ;;  %v2996_v42 = vadd.f32 %v2995_v39, %v2994_v36 }
 0x535   :  { %v3011_v43 = vsub.f32 %v2935_v17, %v3003_v40  ;;  %v3004_v44 = vmul.f32 0.125, %v2996_v42 }
 0x537   :  { %v3019_v45 = vmul.f32 %v3011_v43, %v3011_v43  ;;  %v3012_v46 = vsub.f32 %v2937_v23, %v3004_v44 }
 0x539   :  { %v3057_v47 = vrot.slane %v3019_v45, 4  ;;  %v3020_v48 = vmul.f32 %v3012_v46, %v3012_v46 }
 0x53b   :  { %v3058_v49 = vadd.f32 %v3057_v47, %v3019_v45  ;;  %v3063_v50 = vrot.slane %v3020_v48, 4 }
 0x53d   :  { %v3059_v51 = vrot.slane %v3058_v49, 2  ;;  %v3064_v52 = vadd.f32 %v3063_v50, %v3020_v48 }
 0x53f   :  { %v3060_v55 = vadd.f32 %v3059_v51, %v3058_v49  ;;  %v3065_v58 = vrot.slane %v3064_v52, 2 }
 0x541   :  { %v3061_v60 = vrot.slane %v3060_v55, 1  ;;  %v3066_v61 = vadd.f32 %v3065_v58, %v3064_v52 }
 0x543   :  { %v3062_v62 = vadd.f32 %v3061_v60, %v3060_v55  ;;  %v3067_v63 = vrot.slane %v3066_v61, 1 }
 0x545   :  { %v3075_v2 = vmul.f32 0.125, %v3062_v62  ;;  %v3068_v5 = vadd.f32 %v3067_v63, %v3066_v61 }
 0x547   :  { %v3083_v6 = vadd.f32 1e-05, %v3075_v2  ;;  %v3076_v0 = vmul.f32 0.125, %v3068_v5 }
 0x549   :  { %7905 = vrsqrt.f32 %v3083_v6  ;;  %v3084_v7 = vadd.f32 1e-05, %v3076_v0 }
 0x54b   :  { %7907 = vrsqrt.f32 %v3084_v7 }
 0x556   :  { %v7906_v20 = vpop.eup %7905 }
 0x557   :  { %v3140_v16 = vmul.f32 %v7906_v20, %v3121_v9 }
 0x558   :  { %v7908_v33 = vpop.eup %7907 }
 0x559   :  { %v3169_v17 = vrot.slane %v3140_v16, %v8816_v13  ;;  %v3141_v21 = vmul.f32 %v7908_v33, %v3125_v19 }
 0x55b   :  { %v3180_v22 = vmul.f32 %v3169_v17, %v3011_v43  ;;  %v3173_v23 = vrot.slane %v3141_v21, %v8816_v13 }
 0x55d   :  { %v3229_v12 = vadd.f32 %v3210_v18, %v3180_v22  ;;  %v3181_v25 = vmul.f32 %v3173_v23, %v3012_v46 }
 0x55f   :  { %vm3237_vm14 = vcmp.ge.f32.partialorder %v3229_v12, 0.0  ;;  %v3245_v26 = vmul.f32 0.2, %v3229_v12  ;;  %v3230_v27 = vadd.f32 %v3214_v24, %v3181_v25 }
 0x561   :  { %v8965_v37 = vsel %vm3237_vm14, %v3229_v12, %v3245_v26  ;;  %vm3238_vm15 = vcmp.ge.f32.partialorder %v3230_v27, 0.0  ;;  %v3246_v28 = vmul.f32 0.2, %v3230_v27 }
 0x563   :  { %v8967_v29 = vsel %vm3238_vm15, %v3230_v27, %v3246_v28 }
 0x564   :  { %8733 = dma.done.wait [#allocation5 + $0x2], 57344 }
 0x565   :  { %8734 = vsyncadd [#allocation5 + $0x2], 4294909952  ;;  %v8971_v10 = vpack.c.bf16 %v8917_v59, %v8917_v59  ;;  %v8975_v41 = vpack.c.bf16 %v8931_v4, %v8931_v4  ;;  %v7909_v30 = vld [vmem:[#allocation4 + $0x18c] ss:$28 sps:$4 sm:$0xff]   ;;  %v7915_v36 = vld [vmem:[#allocation4 + $0x154] ss:$28 sps:$4 sm:$0xff]  }
 0x566   :  { %v7911_v11 = vld [vmem:[#allocation4 + $0x50c] ss:$28 sps:$4 sm:$0xff]   ;;  %6123 = vmatprep.subr.bf16.mxu0 %v7909_v30  ;;  %v7917_v38 = vld [vmem:[#allocation4 + $0x4d4] ss:$28 sps:$4 sm:$0xff]   ;;  %v7921_v4 = vld [vmem:[#allocation4 + $0x11c] ss:$28 sps:$4 sm:$0xff]  }
 0x567   :  { %6155 = vmatprep.mubr.bf16.mxu0 %v8971_v10  ;;  %6196 = vmatprep.mubr.bf16.mxu1 %v8975_v41  ;;  %v7913_v34 = vld [vmem:[#allocation4 + $0x188] ss:$28 sps:$4 sm:$0xff]   ;;  %v7919_v59 = vld [vmem:[#allocation4 + $0x150] ss:$28 sps:$4 sm:$0xff]   ;;  %v7923_v40 = vld [vmem:[#allocation4 + $0x49c] ss:$28 sps:$4 sm:$0xff]  }
 0x568   :  { %v7914_v35 = vld [vmem:[#allocation4 + $0x508] ss:$28 sps:$4 sm:$0xff]   ;;  %6164 = vmatprep.subr.bf16.mxu1 %v7911_v11  ;;  %6124 = vmatpush1.bf16.msra.mxu0 %v7913_v34  ;;  %v7920_v39 = vld [vmem:[#allocation4 + $0x4d0] ss:$28 sps:$4 sm:$0xff]   ;;  %v7925_v42 = vld [vmem:[#allocation4 + $0x118] ss:$28 sps:$4 sm:$0xff]  }
 0x569   :  { %6165 = vmatpush1.bf16.msra.mxu1 %v7914_v35  ;;  %6125 = vmatprep.subr.bf16.mxu0 %v7915_v36  ;;  %v7926_v43 = vld [vmem:[#allocation4 + $0x498] ss:$28 sps:$4 sm:$0xff]   ;;  %v7927_v44 = vld [vmem:[#allocation4 + $0xe4] ss:$28 sps:$4 sm:$0xff]   ;;  %v7933_v48 = vld [vmem:[#allocation4 + $0xac] ss:$28 sps:$4 sm:$0xff]  }
 0x56a   :  { %6166 = vmatprep.subr.bf16.mxu1 %v7917_v38  ;;  %v7929_v45 = vld [vmem:[#allocation4 + $0x464] ss:$28 sps:$4 sm:$0xff]   ;;  %v7935_v49 = vld [vmem:[#allocation4 + $0x42c] ss:$28 sps:$4 sm:$0xff]   ;;  %v7939_v52 = vld [vmem:[#allocation4 + $0x74] ss:$28 sps:$4 sm:$0xff]  }
 0x56b   :  { %v7931_v46 = vld [vmem:[#allocation4 + $0xe0] ss:$28 sps:$4 sm:$0xff]   ;;  %v7937_v50 = vld [vmem:[#allocation4 + $0xa8] ss:$28 sps:$4 sm:$0xff]   ;;  %v7941_v55 = vld [vmem:[#allocation4 + $0x3f4] ss:$28 sps:$4 sm:$0xff]  }
 0x56c   :  { %6126 = vmatpush1.bf16.msra.mxu0 %v7919_v59  ;;  %v7932_v47 = vld [vmem:[#allocation4 + $0x460] ss:$28 sps:$4 sm:$0xff]   ;;  %v7938_v51 = vld [vmem:[#allocation4 + $0x428] ss:$28 sps:$4 sm:$0xff]   ;;  %v7943_v58 = vld [vmem:[#allocation4 + $0x70] ss:$28 sps:$4 sm:$0xff]  }
 0x56d   :  { %6167 = vmatpush1.bf16.msra.mxu1 %v7920_v39  ;;  %6127 = vmatprep.subr.bf16.mxu0 %v7921_v4  ;;  %v7944_v60 = vld [vmem:[#allocation4 + $0x3f0] ss:$28 sps:$4 sm:$0xff]   ;;  %v7945_v61 = vld [vmem:[#allocation4 + $0x3c] ss:$28 sps:$4 sm:$0xff]   ;;  %v7951_v5 = vld [vmem:[#allocation4 + $0x4] ss:$28 sps:$4 sm:$0xff]  }
 0x56e   :  { %6168 = vmatprep.subr.bf16.mxu1 %v7923_v40  ;;  %v7947_v62 = vld [vmem:[#allocation4 + $0x3bc] ss:$28 sps:$4 sm:$0xff]   ;;  %v7953_v6 = vld [vmem:[#allocation4 + $0x384] ss:$28 sps:$4 sm:$0xff]   ;;  %v7957_v3 = vld [vmem:[#allocation4 + $0x34c] ss:$28 sps:$4 sm:$0xff]  }
 0x56f   :  { %v7949_v63 = vld [vmem:[#allocation4 + $0x38] ss:$28 sps:$4 sm:$0xff]   ;;  %v7955_v0 = vld [vmem:[#allocation4] ss:$28 sps:$4 sm:$0xff]   ;;  %v7959_v9 = vld [vmem:[#allocation4 + $0x6cc] ss:$28 sps:$4 sm:$0xff]  }
 0x570   :  { %6128 = vmatpush1.bf16.msra.mxu0 %v7925_v42  ;;  %v7950_v2 = vld [vmem:[#allocation4 + $0x3b8] ss:$28 sps:$4 sm:$0xff]   ;;  %v7956_v7 = vld [vmem:[#allocation4 + $0x380] ss:$28 sps:$4 sm:$0xff]   ;;  %v7961_v19 = vld [vmem:[#allocation4 + $0x348] ss:$28 sps:$4 sm:$0xff]  }
 0x571   :  { %6169 = vmatpush1.bf16.msra.mxu1 %v7926_v43  ;;  %6129 = vmatprep.subr.bf16.mxu0 %v7927_v44  ;;  %v7962_v20 = vld [vmem:[#allocation4 + $0x6c8] ss:$28 sps:$4 sm:$0xff]   ;;  %v7963_v16 = vld [vmem:[#allocation4 + $0x314] ss:$28 sps:$4 sm:$0xff]   ;;  %v7969_v21 = vld [vmem:[#allocation4 + $0x2dc] ss:$28 sps:$4 sm:$0xff]  }
 0x572   :  { %6170 = vmatprep.subr.bf16.mxu1 %v7929_v45  ;;  %v7965_v33 = vld [vmem:[#allocation4 + $0x694] ss:$28 sps:$4 sm:$0xff]   ;;  %v7971_v22 = vld [vmem:[#allocation4 + $0x65c] ss:$28 sps:$4 sm:$0xff]   ;;  %v7975_v12 = vld [vmem:[#allocation4 + $0x2a4] ss:$28 sps:$4 sm:$0xff]  }
 0x573   :  { %v7967_v17 = vld [vmem:[#allocation4 + $0x310] ss:$28 sps:$4 sm:$0xff]   ;;  %v7973_v23 = vld [vmem:[#allocation4 + $0x2d8] ss:$28 sps:$4 sm:$0xff]   ;;  %v7977_v25 = vld [vmem:[#allocation4 + $0x624] ss:$28 sps:$4 sm:$0xff]  }
 0x574   :  { %6130 = vmatpush1.bf16.msra.mxu0 %v7931_v46  ;;  %v7968_v18 = vld [vmem:[#allocation4 + $0x690] ss:$28 sps:$4 sm:$0xff]   ;;  %v7974_v24 = vld [vmem:[#allocation4 + $0x658] ss:$28 sps:$4 sm:$0xff]   ;;  %v7979_v26 = vld [vmem:[#allocation4 + $0x2a0] ss:$28 sps:$4 sm:$0xff]  }
 0x575   :  { %6171 = vmatpush1.bf16.msra.mxu1 %v7932_v47  ;;  %6131 = vmatprep.subr.bf16.mxu0 %v7933_v48  ;;  %v7980_v27 = vld [vmem:[#allocation4 + $0x620] ss:$28 sps:$4 sm:$0xff]   ;;  %v7981_v28 = vld [vmem:[#allocation4 + $0x26c] ss:$28 sps:$4 sm:$0xff]   ;;  %v7987_v35 = vld [vmem:[#allocation4 + $0x234] ss:$28 sps:$4 sm:$0xff]  }
 0x576   :  { %6172 = vmatprep.subr.bf16.mxu1 %v7935_v49  ;;  %v7983_v30 = vld [vmem:[#allocation4 + $0x5ec] ss:$28 sps:$4 sm:$0xff]   ;;  %v7989_v36 = vld [vmem:[#allocation4 + $0x5b4] ss:$28 sps:$4 sm:$0xff]   ;;  %v7993_v39 = vld [vmem:[#allocation4 + $0x1fc] ss:$28 sps:$4 sm:$0xff]   ;;  %v8981_v49 = vpack.c.bf16 %v8915_v32, %v8915_v32  ;;  %v8993_v32 = vpack.c.bf16 %v8967_v29, %v8967_v29 }
 0x577   :  { %v7985_v11 = vld [vmem:[#allocation4 + $0x268] ss:$28 sps:$4 sm:$0xff]   ;;  %v7991_v38 = vld [vmem:[#allocation4 + $0x230] ss:$28 sps:$4 sm:$0xff]   ;;  %v7995_v4 = vld [vmem:[#allocation4 + $0x57c] ss:$28 sps:$4 sm:$0xff]  }
 0x578   :  { %6132 = vmatpush1.bf16.msra.mxu0 %v7937_v50  ;;  %v7986_v34 = vld [vmem:[#allocation4 + $0x5e8] ss:$28 sps:$4 sm:$0xff]   ;;  %v7992_v59 = vld [vmem:[#allocation4 + $0x5b0] ss:$28 sps:$4 sm:$0xff]   ;;  %v7997_v40 = vld [vmem:[#allocation4 + $0x1f8] ss:$28 sps:$4 sm:$0xff]   ;;  %v8985_v50 = vpack.c.bf16 %v8929_v1, %v8929_v1 }
 0x579   :  { %6173 = vmatpush1.bf16.msra.mxu1 %v7938_v51  ;;  %6133 = vmatprep.subr.bf16.mxu0 %v7939_v52  ;;  %v7998_v42 = vld [vmem:[#allocation4 + $0x578] ss:$28 sps:$4 sm:$0xff]   ;;  %v7999_v43 = vld [vmem:[#allocation4 + $0x1c4] ss:$28 sps:$4 sm:$0xff]   ;;  %v8007_v47 = vld [vmem:[#allocation4 + $0x88c] ss:$28 sps:$4 sm:$0xff]  }
 0x57a   :  { %6174 = vmatprep.subr.bf16.mxu1 %v7941_v55  ;;  %v8001_v44 = vld [vmem:[#allocation4 + $0x544] ss:$28 sps:$4 sm:$0xff]   ;;  %v8010_v48 = vld [vmem:[#allocation4 + $0xc0c] ss:$28 sps:$4 sm:$0xff]   ;;  %v8013_v55 = vld [vmem:[#allocation4 + $0x854] ss:$28 sps:$4 sm:$0xff]  }
 0x57b   :  { %v8003_v45 = vld [vmem:[#allocation4 + $0x1c0] ss:$28 sps:$4 sm:$0xff]   ;;  %v8005_v51 = vld [vmem:[#allocation4 + $0x888] ss:$28 sps:$4 sm:$0xff]   ;;  %v8011_v1 = vld [vmem:[#allocation4 + $0x850] ss:$28 sps:$4 sm:$0xff]  }
 0x57c   :  { %6134 = vmatpush1.bf16.msra.mxu0 %v7943_v58  ;;  %v8004_v46 = vld [vmem:[#allocation4 + $0x540] ss:$28 sps:$4 sm:$0xff]   ;;  %v8008_v52 = vld [vmem:[#allocation4 + $0xc08] ss:$28 sps:$4 sm:$0xff]   ;;  %v8016_v58 = vld [vmem:[#allocation4 + $0xbd4] ss:$28 sps:$4 sm:$0xff]  }
 0x57d   :  { %6175 = vmatpush1.bf16.msra.mxu1 %v7944_v60  ;;  %6135 = vmatprep.subr.bf16.mxu0 %v7945_v61  ;;  %v8989_v60 = vpack.c.bf16 %v8951_v14, %v8951_v14  ;;  %v8014_v61 = vld [vmem:[#allocation4 + $0xbd0] ss:$28 sps:$4 sm:$0xff]   ;;  %v8017_v14 = vld [vmem:[#allocation4 + $0x818] ss:$28 sps:$4 sm:$0xff]   ;;  %v8025_v29 = vld [vmem:[#allocation4 + $0x7e4] ss:$28 sps:$4 sm:$0xff]  }
 0x57e   :  { %6176 = vmatprep.subr.bf16.mxu1 %v7947_v62  ;;  %v8019_v62 = vld [vmem:[#allocation4 + $0x81c] ss:$28 sps:$4 sm:$0xff]   ;;  %s8751_s4 = smov [#allocation14]  }
 0x57f   :  { %s6795_s5 = sshll.u32 %s8751_s4, 4  ;;  %s6796_s5 = int_to_ptr.vmem [resolvable:$true] %s6795_s5 }
 0x580   :  { %6136 = vmatpush1.bf16.msra.mxu0 %v7949_v63  ;;  %v8022_v63 = vld [vmem:[#allocation4 + $0xb9c] ss:$28 sps:$4 sm:$0xff]   ;;  %s8703_s12 = scalar_lea.vmem %s6796_s5, 896  ;;  %p8708_p8 = scmp.lt.s32.totalorder %s6796_s5, %s6796_s5 }
 0x581   :  { %6177 = vmatpush1.bf16.msra.mxu1 %v7950_v2  ;;  %6137 = vmatprep.subr.bf16.mxu0 %v7951_v5  ;;  %v8020_v2 = vld [vmem:[#allocation4 + $0xb98] ss:$28 sps:$4 sm:$0xff]   ;;  %v8028_v5 = vld [vmem:[#allocation4 + $0xb64] ss:$28 sps:$4 sm:$0xff]   ;;  %p8704_p7 = scmp.ne.s32.totalorder %s6796_s5, %s8703_s12  ;;  %p8709_p9 = scmp.lt.s32.totalorder %s8703_s12, %s8703_s12 }
 0x582   :  { %6178 = vmatprep.subr.bf16.mxu1 %v7953_v6  ;;  %v8023_v6 = vld [vmem:[#allocation4 + $0x7e0] ss:$28 sps:$4 sm:$0xff]  }
 0x583   :  { %p8710_p10 = por %p8709_p9, %p8708_p8 }
 0x584   :  { %6138 = vmatpush1.bf16.msra.mxu0 %v7955_v0  ;;  %v8026_v0 = vld [vmem:[#allocation4 + $0xb60] ss:$28 sps:$4 sm:$0xff]  }
 0x585   :  { %6179 = vmatpush1.bf16.msra.mxu1 %v7956_v7  ;;  %6139 = vmatprep.subr.bf16.mxu0 %v7957_v3  ;;  %v8031_v7 = vld [vmem:[#allocation4 + $0x7ac] ss:$28 sps:$4 sm:$0xff]   ;;  %p8711_p11 = pnand %p8710_p10, %p8704_p7 }
 0x586   :  { %6180 = vmatprep.subr.bf16.mxu1 %v7959_v9  ;;  %v8034_v3 = vld [vmem:[#allocation4 + $0xb2c] ss:$28 sps:$4 sm:$0xff]  }
 0x587   :  { %v8029_v9 = vld [vmem:[#allocation4 + $0x7a8] ss:$28 sps:$4 sm:$0xff]  }
 0x588   :  { %6140 = vmatpush2.bf16.msra.mxu0 %v7961_v19  ;;  %v8032_v19 = vld [vmem:[#allocation4 + $0xb28] ss:$28 sps:$4 sm:$0xff]  }
 0x589   :  { %6181 = vmatpush2.bf16.msra.mxu1 %v7962_v20  ;;  %6141 = vmatprep.subr.bf16.mxu0 %v7963_v16  ;;  %v8037_v20 = vld [vmem:[#allocation4 + $0x774] ss:$28 sps:$4 sm:$0xff]  }
 0x58a   :  { %6182 = vmatprep.subr.bf16.mxu1 %v7965_v33  ;;  %v8040_v16 = vld [vmem:[#allocation4 + $0xaf4] ss:$28 sps:$4 sm:$0xff]  }
 0x58b   :  { %v8035_v33 = vld [vmem:[#allocation4 + $0x770] ss:$28 sps:$4 sm:$0xff]  }
 0x58c   :  { %6142 = vmatpush2.bf16.msra.mxu0 %v7967_v17  ;;  %v8038_v17 = vld [vmem:[#allocation4 + $0xaf0] ss:$28 sps:$4 sm:$0xff]  }
 0x58d   :  { %6183 = vmatpush2.bf16.msra.mxu1 %v7968_v18  ;;  %6143 = vmatprep.subr.bf16.mxu0 %v7969_v21  ;;  %v8043_v18 = vld [vmem:[#allocation4 + $0x73c] ss:$28 sps:$4 sm:$0xff]  }
 0x58e   :  { %6184 = vmatprep.subr.bf16.mxu1 %v7971_v22  ;;  %v8046_v21 = vld [vmem:[#allocation4 + $0xabc] ss:$28 sps:$4 sm:$0xff]  }
 0x58f   :  { %v8041_v22 = vld [vmem:[#allocation4 + $0x738] ss:$28 sps:$4 sm:$0xff]  }
 0x590   :  { %6144 = vmatpush2.bf16.msra.mxu0 %v7973_v23  ;;  %v8044_v23 = vld [vmem:[#allocation4 + $0xab8] ss:$28 sps:$4 sm:$0xff]  }
 0x591   :  { %6185 = vmatpush2.bf16.msra.mxu1 %v7974_v24  ;;  %6145 = vmatprep.subr.bf16.mxu0 %v7975_v12  ;;  %v8049_v24 = vld [vmem:[#allocation4 + $0x704] ss:$28 sps:$4 sm:$0xff]  }
 0x592   :  { %6186 = vmatprep.subr.bf16.mxu1 %v7977_v25  ;;  %v8052_v12 = vld [vmem:[#allocation4 + $0xa84] ss:$28 sps:$4 sm:$0xff]  }
 0x593   :  { %v8047_v25 = vld [vmem:[#allocation4 + $0x700] ss:$28 sps:$4 sm:$0xff]  }
 0x594   :  { %6146 = vmatpush2.bf16.msra.mxu0 %v7979_v26  ;;  %v8050_v26 = vld [vmem:[#allocation4 + $0xa80] ss:$28 sps:$4 sm:$0xff]  }
 0x595   :  { %6187 = vmatpush2.bf16.msra.mxu1 %v7980_v27  ;;  %6147 = vmatprep.subr.bf16.mxu0 %v7981_v28  ;;  %v8055_v27 = vld [vmem:[#allocation4 + $0xa4c] ss:$28 sps:$4 sm:$0xff]  }
 0x596   :  { %6188 = vmatprep.subr.bf16.mxu1 %v7983_v30  ;;  %v8058_v28 = vld [vmem:[#allocation4 + $0xdcc] ss:$28 sps:$4 sm:$0xff]  }
 0x597   :  { %v8053_v30 = vld [vmem:[#allocation4 + $0xa48] ss:$28 sps:$4 sm:$0xff]  }
 0x598   :  { %6148 = vmatpush2.bf16.msra.mxu0 %v7985_v11  ;;  %v8056_v11 = vld [vmem:[#allocation4 + $0xdc8] ss:$28 sps:$4 sm:$0xff]  }
 0x599   :  { %6189 = vmatpush2.bf16.msra.mxu1 %v7986_v34  ;;  %6149 = vmatprep.subr.bf16.mxu0 %v7987_v35  ;;  %v8061_v34 = vld [vmem:[#allocation4 + $0xa14] ss:$28 sps:$4 sm:$0xff]  }
 0x59a   :  { %6190 = vmatprep.subr.bf16.mxu1 %v7989_v36  ;;  %v8064_v35 = vld [vmem:[#allocation4 + $0xd94] ss:$28 sps:$4 sm:$0xff]  }
 0x59b   :  { %v8059_v36 = vld [vmem:[#allocation4 + $0xa10] ss:$28 sps:$4 sm:$0xff]  }
 0x59c   :  { %6150 = vmatpush2.bf16.msra.mxu0 %v7991_v38  ;;  %v8062_v38 = vld [vmem:[#allocation4 + $0xd90] ss:$28 sps:$4 sm:$0xff]  }
 0x59d   :  { %6191 = vmatpush2.bf16.msra.mxu1 %v7992_v59  ;;  %6151 = vmatprep.subr.bf16.mxu0 %v7993_v39  ;;  %v8067_v59 = vld [vmem:[#allocation4 + $0x9dc] ss:$28 sps:$4 sm:$0xff]  }
 0x59e   :  { %6192 = vmatprep.subr.bf16.mxu1 %v7995_v4  ;;  %v8070_v39 = vld [vmem:[#allocation4 + $0xd5c] ss:$28 sps:$4 sm:$0xff]  }
 0x59f   :  { %v8065_v4 = vld [vmem:[#allocation4 + $0x9d8] ss:$28 sps:$4 sm:$0xff]  }
 0x5a0   :  { %6152 = vmatpush2.bf16.msra.mxu0 %v7997_v40  ;;  %v8068_v40 = vld [vmem:[#allocation4 + $0xd58] ss:$28 sps:$4 sm:$0xff]  }
 0x5a1   :  { %6193 = vmatpush2.bf16.msra.mxu1 %v7998_v42  ;;  %6153 = vmatprep.subr.bf16.mxu0 %v7999_v43  ;;  %v8073_v42 = vld [vmem:[#allocation4 + $0x9a4] ss:$28 sps:$4 sm:$0xff]  }
 0x5a2   :  { %6194 = vmatprep.subr.bf16.mxu1 %v8001_v44  ;;  %v8076_v43 = vld [vmem:[#allocation4 + $0xd24] ss:$28 sps:$4 sm:$0xff]  }
 0x5a3   :  { %v8071_v44 = vld [vmem:[#allocation4 + $0x9a0] ss:$28 sps:$4 sm:$0xff]  }
 0x5a4   :  { %6154 = vmatpush2.bf16.msra.mxu0 %v8003_v45  ;;  %v8074_v45 = vld [vmem:[#allocation4 + $0xd20] ss:$28 sps:$4 sm:$0xff]  }
 0x5a5   :  { %6195 = vmatpush2.bf16.msra.mxu1 %v8004_v46  ;;  %6205 = vmatprep.subr.bf16.mxu0 %v8007_v47  ;;  %v8079_v46 = vld [vmem:[#allocation4 + $0x96c] ss:$28 sps:$4 sm:$0xff]  }
 0x5a6   :  { %6246 = vmatprep.subr.bf16.mxu1 %v8010_v48  ;;  %v8082_v47 = vld [vmem:[#allocation4 + $0xcec] ss:$28 sps:$4 sm:$0xff]  }
 0x5a7   :  { %6156 = vmatmul.mubr.bf16.vlgmr.msra.gmra.mxu0 %v8981_v49  ;;  %v8077_v48 = vld [vmem:[#allocation4 + $0x968] ss:$28 sps:$4 sm:$0xff]  }
 0x5a8   :  { %6197 = vmatmul.mubr.bf16.vlgmr.msra.gmra.mxu1 %v8985_v50  ;;  %6206 = vmatpush1.bf16.msra.mxu0 %v8005_v51  ;;  %v8080_v51 = vld [vmem:[#allocation4 + $0xce8] ss:$28 sps:$4 sm:$0xff]  }
 0x5a9   :  { %6247 = vmatpush1.bf16.msra.mxu1 %v8008_v52  ;;  %6207 = vmatprep.subr.bf16.mxu0 %v8013_v55  ;;  %v8085_v52 = vld [vmem:[#allocation4 + $0x934] ss:$28 sps:$4 sm:$0xff]  }
 0x5aa   :  { %6248 = vmatprep.subr.bf16.mxu1 %v8016_v58  ;;  %6237 = vmatprep.mubr.bf16.mxu0 %v8989_v60  ;;  %v8088_v55 = vld [vmem:[#allocation4 + $0xcb4] ss:$28 sps:$4 sm:$0xff]  }
 0x5ab   :  { %6278 = vmatprep.mubr.bf16.mxu1 %v8993_v32  ;;  %v8083_v58 = vld [vmem:[#allocation4 + $0x930] ss:$28 sps:$4 sm:$0xff]  }
 0x5ac   :  { %6208 = vmatpush1.bf16.msra.mxu0 %v8011_v1  ;;  %v8086_v1 = vld [vmem:[#allocation4 + $0xcb0] ss:$28 sps:$4 sm:$0xff]  }
 0x5ad   :  { %6249 = vmatpush1.bf16.msra.mxu1 %v8014_v61  ;;  %6209 = vmatprep.subr.bf16.mxu0 %v8019_v62  ;;  %v8091_v61 = vld [vmem:[#allocation4 + $0x8fc] ss:$28 sps:$4 sm:$0xff]  }
 0x5ae   :  { %6250 = vmatprep.subr.bf16.mxu1 %v8022_v63  ;;  %v8094_v62 = vld [vmem:[#allocation4 + $0xc7c] ss:$28 sps:$4 sm:$0xff]  }
 0x5af   :  { %v8089_v63 = vld [vmem:[#allocation4 + $0x8f8] ss:$28 sps:$4 sm:$0xff]  }
 0x5b0   :  { %6210 = vmatpush1.bf16.msra.mxu0 %v8017_v14  ;;  %v8092_v14 = vld [vmem:[#allocation4 + $0xc78] ss:$28 sps:$4 sm:$0xff]  }
 0x5b1   :  { %6251 = vmatpush1.bf16.msra.mxu1 %v8020_v2  ;;  %6211 = vmatprep.subr.bf16.mxu0 %v8025_v29  ;;  %v8097_v2 = vld [vmem:[#allocation4 + $0x8c4] ss:$28 sps:$4 sm:$0xff]  }
 0x5b2   :  { %6252 = vmatprep.subr.bf16.mxu1 %v8028_v5  ;;  %v8100_v29 = vld [vmem:[#allocation4 + $0xc44] ss:$28 sps:$4 sm:$0xff]  }
 0x5b3   :  { %v8095_v5 = vld [vmem:[#allocation4 + $0x8c0] ss:$28 sps:$4 sm:$0xff]  }
 0x5b4   :  { %6212 = vmatpush1.bf16.msra.mxu0 %v8023_v6  ;;  %v8098_v6 = vld [vmem:[#allocation4 + $0xc40] ss:$28 sps:$4 sm:$0xff]  }
 0x5b5   :  { %6253 = vmatpush1.bf16.msra.mxu1 %v8026_v0  ;;  %6213 = vmatprep.subr.bf16.mxu0 %v8031_v7  ;;  %v8103_v0 = vld [vmem:[#allocation4 + $0x194] ss:$28 sps:$4 sm:$0xff]  }
 0x5b6   :  { %6254 = vmatprep.subr.bf16.mxu1 %v8034_v3  ;;  %v8106_v7 = vld [vmem:[#allocation4 + $0x514] ss:$28 sps:$4 sm:$0xff]   ;;  %v9001_v3 = vpack.c.bf16 %v8949_v31, %v8949_v31  ;;  %v8115_v31 = vld [vmem:[#allocation4 + $0x124] ss:$28 sps:$4 sm:$0xff]  }
 0x5b8   :  { %6214 = vmatpush1.bf16.msra.mxu0 %v8029_v9  ;;  %v9005_v9 = vpack.c.bf16 %v8965_v37, %v8965_v37  ;;  %v8118_v37 = vld [vmem:[#allocation4 + $0x4a4] ss:$28 sps:$4 sm:$0xff]  }
 0x5b9   :  { %6255 = vmatpush1.bf16.msra.mxu1 %v8032_v19  ;;  %6215 = vmatprep.subr.bf16.mxu0 %v8037_v20  ;;  %v8101_v19 = vld [vmem:[#allocation4 + $0x190] ss:$28 sps:$4 sm:$0xff]  }
 0x5ba   :  { %6256 = vmatprep.subr.bf16.mxu1 %v8040_v16  ;;  %v8104_v20 = vld [vmem:[#allocation4 + $0x510] ss:$28 sps:$4 sm:$0xff]   ;;  %v8109_v16 = vld [vmem:[#allocation4 + $0x15c] ss:$28 sps:$4 sm:$0xff]  }
 0x5bc   :  { %6216 = vmatpush1.bf16.msra.mxu0 %v8035_v33  ;;  %v8112_v33 = vld [vmem:[#allocation4 + $0x4dc] ss:$28 sps:$4 sm:$0xff]  }
 0x5bd   :  { %6257 = vmatpush1.bf16.msra.mxu1 %v8038_v17  ;;  %6217 = vmatprep.subr.bf16.mxu0 %v8043_v18  ;;  %v8107_v17 = vld [vmem:[#allocation4 + $0x158] ss:$28 sps:$4 sm:$0xff]  }
 0x5be   :  { %6258 = vmatprep.subr.bf16.mxu1 %v8046_v21  ;;  %v8110_v18 = vld [vmem:[#allocation4 + $0x4d8] ss:$28 sps:$4 sm:$0xff]   ;;  %v8113_v21 = vld [vmem:[#allocation4 + $0x120] ss:$28 sps:$4 sm:$0xff]  }
 0x5c0   :  { %6218 = vmatpush1.bf16.msra.mxu0 %v8041_v22  ;;  %v8116_v22 = vld [vmem:[#allocation4 + $0x4a0] ss:$28 sps:$4 sm:$0xff]  }
 0x5c1   :  { %6259 = vmatpush1.bf16.msra.mxu1 %v8044_v23  ;;  %6219 = vmatprep.subr.bf16.mxu0 %v8049_v24  ;;  %v8121_v23 = vld [vmem:[#allocation4 + $0xec] ss:$28 sps:$4 sm:$0xff]  }
 0x5c2   :  { %6260 = vmatprep.subr.bf16.mxu1 %v8052_v12  ;;  %v8124_v24 = vld [vmem:[#allocation4 + $0x46c] ss:$28 sps:$4 sm:$0xff]  }
 0x5c3   :  { %v8119_v12 = vld [vmem:[#allocation4 + $0xe8] ss:$28 sps:$4 sm:$0xff]  }
 0x5c4   :  { %6220 = vmatpush1.bf16.msra.mxu0 %v8047_v25  ;;  %v8122_v25 = vld [vmem:[#allocation4 + $0x468] ss:$28 sps:$4 sm:$0xff]  }
 0x5c5   :  { %6261 = vmatpush1.bf16.msra.mxu1 %v8050_v26  ;;  %6221 = vmatprep.subr.bf16.mxu0 %v8055_v27  ;;  %v8127_v26 = vld [vmem:[#allocation4 + $0xb4] ss:$28 sps:$4 sm:$0xff]  }
 0x5c6   :  { %6262 = vmatprep.subr.bf16.mxu1 %v8058_v28  ;;  %v8130_v27 = vld [vmem:[#allocation4 + $0x434] ss:$28 sps:$4 sm:$0xff]  }
 0x5c7   :  { %v8125_v28 = vld [vmem:[#allocation4 + $0xb0] ss:$28 sps:$4 sm:$0xff]  }
 0x5c8   :  { %6222 = vmatpush2.bf16.msra.mxu0 %v8053_v30  ;;  %v8128_v30 = vld [vmem:[#allocation4 + $0x430] ss:$28 sps:$4 sm:$0xff]  }
 0x5c9   :  { %6263 = vmatpush2.bf16.msra.mxu1 %v8056_v11  ;;  %6223 = vmatprep.subr.bf16.mxu0 %v8061_v34  ;;  %v8133_v11 = vld [vmem:[#allocation4 + $0x7c] ss:$28 sps:$4 sm:$0xff]  }
 0x5ca   :  { %6264 = vmatprep.subr.bf16.mxu1 %v8064_v35  ;;  %v8136_v34 = vld [vmem:[#allocation4 + $0x3fc] ss:$28 sps:$4 sm:$0xff]  }
 0x5cb   :  { %v8131_v35 = vld [vmem:[#allocation4 + $0x78] ss:$28 sps:$4 sm:$0xff]  }
 0x5cc   :  { %6224 = vmatpush2.bf16.msra.mxu0 %v8059_v36  ;;  %v8134_v36 = vld [vmem:[#allocation4 + $0x3f8] ss:$28 sps:$4 sm:$0xff]  }
 0x5cd   :  { %6265 = vmatpush2.bf16.msra.mxu1 %v8062_v38  ;;  %6225 = vmatprep.subr.bf16.mxu0 %v8067_v59  ;;  %v8139_v38 = vld [vmem:[#allocation4 + $0x44] ss:$28 sps:$4 sm:$0xff]  }
 0x5ce   :  { %6266 = vmatprep.subr.bf16.mxu1 %v8070_v39  ;;  %v8142_v59 = vld [vmem:[#allocation4 + $0x3c4] ss:$28 sps:$4 sm:$0xff]  }
 0x5cf   :  { %v8137_v39 = vld [vmem:[#allocation4 + $0x40] ss:$28 sps:$4 sm:$0xff]  }
 0x5d0   :  { %6226 = vmatpush2.bf16.msra.mxu0 %v8065_v4  ;;  %v8140_v4 = vld [vmem:[#allocation4 + $0x3c0] ss:$28 sps:$4 sm:$0xff]  }
 0x5d1   :  { %6267 = vmatpush2.bf16.msra.mxu1 %v8068_v40  ;;  %6227 = vmatprep.subr.bf16.mxu0 %v8073_v42  ;;  %v8145_v40 = vld [vmem:[#allocation4 + $0xc] ss:$28 sps:$4 sm:$0xff]  }
 0x5d2   :  { %6268 = vmatprep.subr.bf16.mxu1 %v8076_v43  ;;  %v8148_v42 = vld [vmem:[#allocation4 + $0x38c] ss:$28 sps:$4 sm:$0xff]  }
 0x5d3   :  { %v8143_v43 = vld [vmem:[#allocation4 + $0x8] ss:$28 sps:$4 sm:$0xff]  }
 0x5d4   :  { %6228 = vmatpush2.bf16.msra.mxu0 %v8071_v44  ;;  %v8146_v44 = vld [vmem:[#allocation4 + $0x388] ss:$28 sps:$4 sm:$0xff]  }
 0x5d5   :  { %6269 = vmatpush2.bf16.msra.mxu1 %v8074_v45  ;;  %6229 = vmatprep.subr.bf16.mxu0 %v8079_v46  ;;  %v8151_v45 = vld [vmem:[#allocation4 + $0x354] ss:$28 sps:$4 sm:$0xff]  }
 0x5d6   :  { %6270 = vmatprep.subr.bf16.mxu1 %v8082_v47  ;;  %v8154_v46 = vld [vmem:[#allocation4 + $0x6d4] ss:$28 sps:$4 sm:$0xff]  }
 0x5d7   :  { %v8149_v47 = vld [vmem:[#allocation4 + $0x350] ss:$28 sps:$4 sm:$0xff]  }
 0x5d8   :  { %6230 = vmatpush2.bf16.msra.mxu0 %v8077_v48  ;;  %v8152_v48 = vld [vmem:[#allocation4 + $0x6d0] ss:$28 sps:$4 sm:$0xff]  }
 0x5d9   :  { %6271 = vmatpush2.bf16.msra.mxu1 %v8080_v51  ;;  %6231 = vmatprep.subr.bf16.mxu0 %v8085_v52  ;;  %v8157_v51 = vld [vmem:[#allocation4 + $0x31c] ss:$28 sps:$4 sm:$0xff]  }
 0x5da   :  { %6272 = vmatprep.subr.bf16.mxu1 %v8088_v55  ;;  %v8160_v52 = vld [vmem:[#allocation4 + $0x69c] ss:$28 sps:$4 sm:$0xff]  }
 0x5db   :  { %v8155_v55 = vld [vmem:[#allocation4 + $0x318] ss:$28 sps:$4 sm:$0xff]  }
 0x5dc   :  { %6232 = vmatpush2.bf16.msra.mxu0 %v8083_v58  ;;  %v8158_v58 = vld [vmem:[#allocation4 + $0x698] ss:$28 sps:$4 sm:$0xff]  }
 0x5dd   :  { %6273 = vmatpush2.bf16.msra.mxu1 %v8086_v1  ;;  %6233 = vmatprep.subr.bf16.mxu0 %v8091_v61  ;;  %v8163_v1 = vld [vmem:[#allocation4 + $0x2e4] ss:$28 sps:$4 sm:$0xff]  }
 0x5de   :  { %6274 = vmatprep.subr.bf16.mxu1 %v8094_v62  ;;  %v8166_v61 = vld [vmem:[#allocation4 + $0x664] ss:$28 sps:$4 sm:$0xff]  }
 0x5df   :  { %v8161_v62 = vld [vmem:[#allocation4 + $0x2e0] ss:$28 sps:$4 sm:$0xff]  }
 0x5e0   :  { %6234 = vmatpush2.bf16.msra.mxu0 %v8089_v63  ;;  %v8164_v63 = vld [vmem:[#allocation4 + $0x660] ss:$28 sps:$4 sm:$0xff]  }
 0x5e1   :  { %6275 = vmatpush2.bf16.msra.mxu1 %v8092_v14  ;;  %6235 = vmatprep.subr.bf16.mxu0 %v8097_v2  ;;  %v8169_v14 = vld [vmem:[#allocation4 + $0x2ac] ss:$28 sps:$4 sm:$0xff]  }
 0x5e2   :  { %6276 = vmatprep.subr.bf16.mxu1 %v8100_v29  ;;  %v8172_v2 = vld [vmem:[#allocation4 + $0x62c] ss:$28 sps:$4 sm:$0xff]  }
 0x5e3   :  { %v8167_v29 = vld [vmem:[#allocation4 + $0x2a8] ss:$28 sps:$4 sm:$0xff]  }
 0x5e4   :  { %6236 = vmatpush2.bf16.msra.mxu0 %v8095_v5  ;;  %v8170_v5 = vld [vmem:[#allocation4 + $0x628] ss:$28 sps:$4 sm:$0xff]  }
 0x5e5   :  { %6277 = vmatpush2.bf16.msra.mxu1 %v8098_v6  ;;  %6287 = vmatprep.subr.bf16.mxu0 %v8103_v0  ;;  %v8175_v6 = vld [vmem:[#allocation4 + $0x274] ss:$28 sps:$4 sm:$0xff]  }
 0x5e6   :  { %6328 = vmatprep.subr.bf16.mxu1 %v8106_v7  ;;  %v8178_v0 = vld [vmem:[#allocation4 + $0x5f4] ss:$28 sps:$4 sm:$0xff]  }
 0x5e7   :  { %6238 = vmatmul.mubr.bf16.vlgmr.msra.gmra.mxu0 %v9001_v3  ;;  %v8173_v7 = vld [vmem:[#allocation4 + $0x270] ss:$28 sps:$4 sm:$0xff]  }
 0x5e8   :  { %6279 = vmatmul.mubr.bf16.vlgmr.msra.gmra.mxu1 %v9005_v9  ;;  %6288 = vmatpush1.bf16.msra.mxu0 %v8101_v19  ;;  %v8176_v19 = vld [vmem:[#allocation4 + $0x5f0] ss:$28 sps:$4 sm:$0xff]  }
 0x5e9   :  { %6329 = vmatpush1.bf16.msra.mxu1 %v8104_v20  ;;  %6289 = vmatprep.subr.bf16.mxu0 %v8109_v16  ;;  %v8181_v20 = vld [vmem:[#allocation4 + $0x23c] ss:$28 sps:$4 sm:$0xff]  }
 0x5ea   :  { %6330 = vmatprep.subr.bf16.mxu1 %v8112_v33  ;;  %6319 = vmatprep.mubr.bf16.mxu0 %v8971_v10  ;;  %v8184_v16 = vld [vmem:[#allocation4 + $0x5bc] ss:$28 sps:$4 sm:$0xff]  }
 0x5eb   :  { %6360 = vmatprep.mubr.bf16.mxu1 %v8975_v41  ;;  %v8179_v33 = vld [vmem:[#allocation4 + $0x238] ss:$28 sps:$4 sm:$0xff]  }
 0x5ec   :  { %6290 = vmatpush1.bf16.msra.mxu0 %v8107_v17  ;;  %v8182_v17 = vld [vmem:[#allocation4 + $0x5b8] ss:$28 sps:$4 sm:$0xff]  }
 0x5ed   :  { %6331 = vmatpush1.bf16.msra.mxu1 %v8110_v18  ;;  %6291 = vmatprep.subr.bf16.mxu0 %v8115_v31  ;;  %v8187_v18 = vld [vmem:[#allocation4 + $0x204] ss:$28 sps:$4 sm:$0xff]  }
 0x5ee   :  { %6332 = vmatprep.subr.bf16.mxu1 %v8118_v37  ;;  %v8190_v31 = vld [vmem:[#allocation4 + $0x584] ss:$28 sps:$4 sm:$0xff]  }
 0x5ef   :  { %v8185_v37 = vld [vmem:[#allocation4 + $0x200] ss:$28 sps:$4 sm:$0xff]  }
 0x5f0   :  { %6292 = vmatpush1.bf16.msra.mxu0 %v8113_v21  ;;  %v8188_v21 = vld [vmem:[#allocation4 + $0x580] ss:$28 sps:$4 sm:$0xff]  }
 0x5f1   :  { %6333 = vmatpush1.bf16.msra.mxu1 %v8116_v22  ;;  %6293 = vmatprep.subr.bf16.mxu0 %v8121_v23  ;;  %v8193_v22 = vld [vmem:[#allocation4 + $0x1cc] ss:$28 sps:$4 sm:$0xff]  }
 0x5f2   :  { %6334 = vmatprep.subr.bf16.mxu1 %v8124_v24  ;;  %v8196_v23 = vld [vmem:[#allocation4 + $0x54c] ss:$28 sps:$4 sm:$0xff]  }
 0x5f3   :  { %v8191_v24 = vld [vmem:[#allocation4 + $0x1c8] ss:$28 sps:$4 sm:$0xff]  }
 0x5f4   :  { %6294 = vmatpush1.bf16.msra.mxu0 %v8119_v12  ;;  %v8194_v12 = vld [vmem:[#allocation4 + $0x548] ss:$28 sps:$4 sm:$0xff]  }
 0x5f5   :  { %6335 = vmatpush1.bf16.msra.mxu1 %v8122_v25  ;;  %6295 = vmatprep.subr.bf16.mxu0 %v8127_v26  ;;  %v8199_v25 = vld [vmem:[#allocation4 + $0x894] ss:$28 sps:$4 sm:$0xff]  }
 0x5f6   :  { %6336 = vmatprep.subr.bf16.mxu1 %v8130_v27  ;;  %v8202_v26 = vld [vmem:[#allocation4 + $0xc14] ss:$28 sps:$4 sm:$0xff]  }
 0x5f7   :  { %v8197_v27 = vld [vmem:[#allocation4 + $0x890] ss:$28 sps:$4 sm:$0xff]  }
 0x5f8   :  { %6296 = vmatpush1.bf16.msra.mxu0 %v8125_v28  ;;  %v8200_v28 = vld [vmem:[#allocation4 + $0xc10] ss:$28 sps:$4 sm:$0xff]  }
 0x5f9   :  { %6337 = vmatpush1.bf16.msra.mxu1 %v8128_v30  ;;  %6297 = vmatprep.subr.bf16.mxu0 %v8133_v11  ;;  %v8205_v30 = vld [vmem:[#allocation4 + $0x85c] ss:$28 sps:$4 sm:$0xff]  }
 0x5fa   :  { %6338 = vmatprep.subr.bf16.mxu1 %v8136_v34  ;;  %v8208_v11 = vld [vmem:[#allocation4 + $0xbdc] ss:$28 sps:$4 sm:$0xff]  }
 0x5fb   :  { %v8203_v34 = vld [vmem:[#allocation4 + $0x858] ss:$28 sps:$4 sm:$0xff]  }
 0x5fc   :  { %6298 = vmatpush1.bf16.msra.mxu0 %v8131_v35  ;;  %v8206_v35 = vld [vmem:[#allocation4 + $0xbd8] ss:$28 sps:$4 sm:$0xff]  }
 0x5fd   :  { %6339 = vmatpush1.bf16.msra.mxu1 %v8134_v36  ;;  %6299 = vmatprep.subr.bf16.mxu0 %v8139_v38  ;;  %v8211_v36 = vld [vmem:[#allocation4 + $0x824] ss:$28 sps:$4 sm:$0xff]  }
 0x5fe   :  { %6340 = vmatprep.subr.bf16.mxu1 %v8142_v59  ;;  %v8214_v38 = vld [vmem:[#allocation4 + $0xba4] ss:$28 sps:$4 sm:$0xff]  }
 0x5ff   :  { %v8209_v59 = vld [vmem:[#allocation4 + $0x820] ss:$28 sps:$4 sm:$0xff]  }
 0x600   :  { %6300 = vmatpush1.bf16.msra.mxu0 %v8137_v39  ;;  %v8212_v39 = vld [vmem:[#allocation4 + $0xba0] ss:$28 sps:$4 sm:$0xff]  }
 0x601   :  { %6341 = vmatpush1.bf16.msra.mxu1 %v8140_v4  ;;  %6301 = vmatprep.subr.bf16.mxu0 %v8145_v40  ;;  %v8217_v4 = vld [vmem:[#allocation4 + $0x7ec] ss:$28 sps:$4 sm:$0xff]  }
 0x602   :  { %6342 = vmatprep.subr.bf16.mxu1 %v8148_v42  ;;  %v8220_v40 = vld [vmem:[#allocation4 + $0xb6c] ss:$28 sps:$4 sm:$0xff]  }
 0x603   :  { %v8215_v42 = vld [vmem:[#allocation4 + $0x7e8] ss:$28 sps:$4 sm:$0xff]  }
 0x604   :  { %6302 = vmatpush1.bf16.msra.mxu0 %v8143_v43  ;;  %v8218_v43 = vld [vmem:[#allocation4 + $0xb68] ss:$28 sps:$4 sm:$0xff]  }
 0x605   :  { %6343 = vmatpush1.bf16.msra.mxu1 %v8146_v44  ;;  %6303 = vmatprep.subr.bf16.mxu0 %v8151_v45  ;;  %v8223_v44 = vld [vmem:[#allocation4 + $0x7b4] ss:$28 sps:$4 sm:$0xff]  }
 0x606   :  { %6344 = vmatprep.subr.bf16.mxu1 %v8154_v46  ;;  %v8226_v45 = vld [vmem:[#allocation4 + $0xb34] ss:$28 sps:$4 sm:$0xff]  }
 0x607   :  { %v8221_v46 = vld [vmem:[#allocation4 + $0x7b0] ss:$28 sps:$4 sm:$0xff]  }
 0x608   :  { %6304 = vmatpush2.bf16.msra.mxu0 %v8149_v47  ;;  %v8224_v47 = vld [vmem:[#allocation4 + $0xb30] ss:$28 sps:$4 sm:$0xff]  }
 0x609   :  { %6345 = vmatpush2.bf16.msra.mxu1 %v8152_v48  ;;  %6305 = vmatprep.subr.bf16.mxu0 %v8157_v51  ;;  %v8229_v48 = vld [vmem:[#allocation4 + $0x77c] ss:$28 sps:$4 sm:$0xff]  }
 0x60a   :  { %6346 = vmatprep.subr.bf16.mxu1 %v8160_v52  ;;  %v8232_v51 = vld [vmem:[#allocation4 + $0xafc] ss:$28 sps:$4 sm:$0xff]  }
 0x60b   :  { %v8227_v52 = vld [vmem:[#allocation4 + $0x778] ss:$28 sps:$4 sm:$0xff]  }
 0x60c   :  { %6306 = vmatpush2.bf16.msra.mxu0 %v8155_v55  ;;  %v8230_v55 = vld [vmem:[#allocation4 + $0xaf8] ss:$28 sps:$4 sm:$0xff]  }
 0x60d   :  { %6347 = vmatpush2.bf16.msra.mxu1 %v8158_v58  ;;  %6307 = vmatprep.subr.bf16.mxu0 %v8163_v1  ;;  %v8235_v58 = vld [vmem:[#allocation4 + $0x744] ss:$28 sps:$4 sm:$0xff]  }
 0x60e   :  { %6348 = vmatprep.subr.bf16.mxu1 %v8166_v61  ;;  %v8238_v1 = vld [vmem:[#allocation4 + $0xac4] ss:$28 sps:$4 sm:$0xff]  }
 0x60f   :  { %v8233_v61 = vld [vmem:[#allocation4 + $0x740] ss:$28 sps:$4 sm:$0xff]  }
 0x610   :  { %6308 = vmatpush2.bf16.msra.mxu0 %v8161_v62  ;;  %v8236_v62 = vld [vmem:[#allocation4 + $0xac0] ss:$28 sps:$4 sm:$0xff]  }
 0x611   :  { %6349 = vmatpush2.bf16.msra.mxu1 %v8164_v63  ;;  %6309 = vmatprep.subr.bf16.mxu0 %v8169_v14  ;;  %v8241_v63 = vld [vmem:[#allocation4 + $0x70c] ss:$28 sps:$4 sm:$0xff]  }
 0x612   :  { %6350 = vmatprep.subr.bf16.mxu1 %v8172_v2  ;;  %v8244_v14 = vld [vmem:[#allocation4 + $0xa8c] ss:$28 sps:$4 sm:$0xff]  }
 0x613   :  { %v8239_v2 = vld [vmem:[#allocation4 + $0x708] ss:$28 sps:$4 sm:$0xff]  }
 0x614   :  { %6310 = vmatpush2.bf16.msra.mxu0 %v8167_v29  ;;  %v8242_v29 = vld [vmem:[#allocation4 + $0xa88] ss:$28 sps:$4 sm:$0xff]  }
 0x615   :  { %6351 = vmatpush2.bf16.msra.mxu1 %v8170_v5  ;;  %6311 = vmatprep.subr.bf16.mxu0 %v8175_v6  ;;  %v8247_v5 = vld [vmem:[#allocation4 + $0xa54] ss:$28 sps:$4 sm:$0xff]  }
 0x616   :  { %6352 = vmatprep.subr.bf16.mxu1 %v8178_v0  ;;  %v8250_v6 = vld [vmem:[#allocation4 + $0xdd4] ss:$28 sps:$4 sm:$0xff]  }
 0x617   :  { %v8245_v0 = vld [vmem:[#allocation4 + $0xa50] ss:$28 sps:$4 sm:$0xff]  }
 0x618   :  { %6312 = vmatpush2.bf16.msra.mxu0 %v8173_v7  ;;  %v8248_v7 = vld [vmem:[#allocation4 + $0xdd0] ss:$28 sps:$4 sm:$0xff]  }
 0x619   :  { %6353 = vmatpush2.bf16.msra.mxu1 %v8176_v19  ;;  %6313 = vmatprep.subr.bf16.mxu0 %v8181_v20  ;;  %v8253_v19 = vld [vmem:[#allocation4 + $0xa1c] ss:$28 sps:$4 sm:$0xff]  }
 0x61a   :  { %6354 = vmatprep.subr.bf16.mxu1 %v8184_v16  ;;  %v8256_v20 = vld [vmem:[#allocation4 + $0xd9c] ss:$28 sps:$4 sm:$0xff]  }
 0x61b   :  { %v8251_v16 = vld [vmem:[#allocation4 + $0xa18] ss:$28 sps:$4 sm:$0xff]  }
 0x61c   :  { %6314 = vmatpush2.bf16.msra.mxu0 %v8179_v33  ;;  %v8254_v33 = vld [vmem:[#allocation4 + $0xd98] ss:$28 sps:$4 sm:$0xff]  }
 0x61d   :  { %6355 = vmatpush2.bf16.msra.mxu1 %v8182_v17  ;;  %6315 = vmatprep.subr.bf16.mxu0 %v8187_v18  ;;  %v8259_v17 = vld [vmem:[#allocation4 + $0x9e4] ss:$28 sps:$4 sm:$0xff]  }
 0x61e   :  { %6356 = vmatprep.subr.bf16.mxu1 %v8190_v31  ;;  %v8262_v18 = vld [vmem:[#allocation4 + $0xd64] ss:$28 sps:$4 sm:$0xff]  }
 0x61f   :  { %v8257_v31 = vld [vmem:[#allocation4 + $0x9e0] ss:$28 sps:$4 sm:$0xff]  }
 0x620   :  { %6316 = vmatpush2.bf16.msra.mxu0 %v8185_v37  ;;  %v8260_v37 = vld [vmem:[#allocation4 + $0xd60] ss:$28 sps:$4 sm:$0xff]  }
 0x621   :  { %6357 = vmatpush2.bf16.msra.mxu1 %v8188_v21  ;;  %6317 = vmatprep.subr.bf16.mxu0 %v8193_v22  ;;  %v8265_v21 = vld [vmem:[#allocation4 + $0x9ac] ss:$28 sps:$4 sm:$0xff]  }
 0x622   :  { %6358 = vmatprep.subr.bf16.mxu1 %v8196_v23  ;;  %v8268_v22 = vld [vmem:[#allocation4 + $0xd2c] ss:$28 sps:$4 sm:$0xff]  }
 0x623   :  { %v8263_v23 = vld [vmem:[#allocation4 + $0x9a8] ss:$28 sps:$4 sm:$0xff]  }
 0x624   :  { %6318 = vmatpush2.bf16.msra.mxu0 %v8191_v24  ;;  %v8266_v24 = vld [vmem:[#allocation4 + $0xd28] ss:$28 sps:$4 sm:$0xff]  }
 0x625   :  { %6359 = vmatpush2.bf16.msra.mxu1 %v8194_v12  ;;  %6369 = vmatprep.subr.bf16.mxu0 %v8199_v25  ;;  %v8271_v12 = vld [vmem:[#allocation4 + $0x974] ss:$28 sps:$4 sm:$0xff]  }
 0x626   :  { %6410 = vmatprep.subr.bf16.mxu1 %v8202_v26  ;;  %v8274_v25 = vld [vmem:[#allocation4 + $0xcf4] ss:$28 sps:$4 sm:$0xff]  }
 0x627   :  { %6320 = vmatmul.mubr.bf16.vlgmr.msra.gmra.mxu0 %v8981_v49  ;;  %v8269_v26 = vld [vmem:[#allocation4 + $0x970] ss:$28 sps:$4 sm:$0xff]  }
 0x628   :  { %6361 = vmatmul.mubr.bf16.vlgmr.msra.gmra.mxu1 %v8985_v50  ;;  %6370 = vmatpush1.bf16.msra.mxu0 %v8197_v27  ;;  %v8272_v27 = vld [vmem:[#allocation4 + $0xcf0] ss:$28 sps:$4 sm:$0xff]  }
 0x629   :  { %6411 = vmatpush1.bf16.msra.mxu1 %v8200_v28  ;;  %6371 = vmatprep.subr.bf16.mxu0 %v8205_v30  ;;  %v8277_v28 = vld [vmem:[#allocation4 + $0x93c] ss:$28 sps:$4 sm:$0xff]  }
 0x62a   :  { %6412 = vmatprep.subr.bf16.mxu1 %v8208_v11  ;;  %6401 = vmatprep.mubr.bf16.mxu0 %v8989_v60  ;;  %v8280_v30 = vld [vmem:[#allocation4 + $0xcbc] ss:$28 sps:$4 sm:$0xff]  }
 0x62b   :  { %6442 = vmatprep.mubr.bf16.mxu1 %v8993_v32  ;;  %v8275_v11 = vld [vmem:[#allocation4 + $0x938] ss:$28 sps:$4 sm:$0xff]  }
 0x62c   :  { %6372 = vmatpush1.bf16.msra.mxu0 %v8203_v34  ;;  %v8278_v34 = vld [vmem:[#allocation4 + $0xcb8] ss:$28 sps:$4 sm:$0xff]  }
 0x62d   :  { %6413 = vmatpush1.bf16.msra.mxu1 %v8206_v35  ;;  %6373 = vmatprep.subr.bf16.mxu0 %v8211_v36  ;;  %v8283_v35 = vld [vmem:[#allocation4 + $0x904] ss:$28 sps:$4 sm:$0xff]  }
 0x62e   :  { %6414 = vmatprep.subr.bf16.mxu1 %v8214_v38  ;;  %v8286_v36 = vld [vmem:[#allocation4 + $0xc84] ss:$28 sps:$4 sm:$0xff]  }
 0x62f   :  { %v8281_v38 = vld [vmem:[#allocation4 + $0x900] ss:$28 sps:$4 sm:$0xff]  }
 0x630   :  { %6374 = vmatpush1.bf16.msra.mxu0 %v8209_v59  ;;  %v8284_v59 = vld [vmem:[#allocation4 + $0xc80] ss:$28 sps:$4 sm:$0xff]  }
 0x631   :  { %6415 = vmatpush1.bf16.msra.mxu1 %v8212_v39  ;;  %6375 = vmatprep.subr.bf16.mxu0 %v8217_v4  ;;  %v8289_v39 = vld [vmem:[#allocation4 + $0x8cc] ss:$28 sps:$4 sm:$0xff]  }
 0x632   :  { %6416 = vmatprep.subr.bf16.mxu1 %v8220_v40  ;;  %v8292_v4 = vld [vmem:[#allocation4 + $0xc4c] ss:$28 sps:$4 sm:$0xff]  }
 0x633   :  { %v8287_v40 = vld [vmem:[#allocation4 + $0x8c8] ss:$28 sps:$4 sm:$0xff]  }
 0x634   :  { %6376 = vmatpush1.bf16.msra.mxu0 %v8215_v42  ;;  %v8290_v42 = vld [vmem:[#allocation4 + $0xc48] ss:$28 sps:$4 sm:$0xff]  }
 0x635   :  { %6417 = vmatpush1.bf16.msra.mxu1 %v8218_v43  ;;  %6377 = vmatprep.subr.bf16.mxu0 %v8223_v44  ;;  %v8295_v43 = vld [vmem:[#allocation4 + $0x19c] ss:$28 sps:$4 sm:$0xff]  }
 0x636   :  { %6418 = vmatprep.subr.bf16.mxu1 %v8226_v45  ;;  %v8298_v44 = vld [vmem:[#allocation4 + $0x51c] ss:$28 sps:$4 sm:$0xff]  }
 0x637   :  { %v8293_v45 = vld [vmem:[#allocation4 + $0x198] ss:$28 sps:$4 sm:$0xff]  }
 0x638   :  { %6378 = vmatpush1.bf16.msra.mxu0 %v8221_v46  ;;  %v8296_v46 = vld [vmem:[#allocation4 + $0x518] ss:$28 sps:$4 sm:$0xff]  }
 0x639   :  { %6419 = vmatpush1.bf16.msra.mxu1 %v8224_v47  ;;  %6379 = vmatprep.subr.bf16.mxu0 %v8229_v48  ;;  %v8301_v47 = vld [vmem:[#allocation4 + $0x164] ss:$28 sps:$4 sm:$0xff]  }
 0x63a   :  { %6420 = vmatprep.subr.bf16.mxu1 %v8232_v51  ;;  %v8304_v48 = vld [vmem:[#allocation4 + $0x4e4] ss:$28 sps:$4 sm:$0xff]  }
 0x63b   :  { %v8299_v51 = vld [vmem:[#allocation4 + $0x160] ss:$28 sps:$4 sm:$0xff]  }
 0x63c   :  { %6380 = vmatpush1.bf16.msra.mxu0 %v8227_v52 }
 0x63d   :  { %6421 = vmatpush1.bf16.msra.mxu1 %v8230_v55  ;;  %6381 = vmatprep.subr.bf16.mxu0 %v8235_v58  ;;  %v8302_v58 = vld [vmem:[#allocation4 + $0x4e0] ss:$28 sps:$4 sm:$0xff]  }
 0x63e   :  { %6422 = vmatprep.subr.bf16.mxu1 %v8238_v1  ;;  %v8307_v1 = vld [vmem:[#allocation4 + $0x12c] ss:$28 sps:$4 sm:$0xff]  }
 0x640   :  { %6382 = vmatpush1.bf16.msra.mxu0 %v8233_v61 }
 0x641   :  { %6423 = vmatpush1.bf16.msra.mxu1 %v8236_v62  ;;  %6383 = vmatprep.subr.bf16.mxu0 %v8241_v63  ;;  %v8310_v63 = vld [vmem:[#allocation4 + $0x4ac] ss:$28 sps:$4 sm:$0xff]  }
 0x642   :  { %6424 = vmatprep.subr.bf16.mxu1 %v8244_v14  ;;  %v8305_v14 = vld [vmem:[#allocation4 + $0x128] ss:$28 sps:$4 sm:$0xff]  }
 0x644   :  { %6384 = vmatpush1.bf16.msra.mxu0 %v8239_v2 }
 0x645   :  { %6425 = vmatpush1.bf16.msra.mxu1 %v8242_v29  ;;  %6385 = vmatprep.subr.bf16.mxu0 %v8247_v5  ;;  %v8308_v5 = vld [vmem:[#allocation4 + $0x4a8] ss:$28 sps:$4 sm:$0xff]  }
 0x646   :  { %6426 = vmatprep.subr.bf16.mxu1 %v8250_v6  ;;  %v8313_v6 = vld [vmem:[#allocation4 + $0xf4] ss:$28 sps:$4 sm:$0xff]  }
 0x648   :  { %6386 = vmatpush2.bf16.msra.mxu0 %v8245_v0 }
 0x649   :  { %6427 = vmatpush2.bf16.msra.mxu1 %v8248_v7  ;;  %6387 = vmatprep.subr.bf16.mxu0 %v8253_v19  ;;  %v8316_v19 = vld [vmem:[#allocation4 + $0x474] ss:$28 sps:$4 sm:$0xff]  }
 0x64a   :  { %6428 = vmatprep.subr.bf16.mxu1 %v8256_v20  ;;  %v8311_v20 = vld [vmem:[#allocation4 + $0xf0] ss:$28 sps:$4 sm:$0xff]  }
 0x64c   :  { %6388 = vmatpush2.bf16.msra.mxu0 %v8251_v16  ;;  %v8314_v16 = vld [vmem:[#allocation4 + $0x470] ss:$28 sps:$4 sm:$0xff]  }
 0x64d   :  { %6429 = vmatpush2.bf16.msra.mxu1 %v8254_v33  ;;  %6389 = vmatprep.subr.bf16.mxu0 %v8259_v17  ;;  %v8319_v33 = vld [vmem:[#allocation4 + $0xbc] ss:$28 sps:$4 sm:$0xff]  }
 0x64e   :  { %6430 = vmatprep.subr.bf16.mxu1 %v8262_v18  ;;  %v8322_v17 = vld [vmem:[#allocation4 + $0x43c] ss:$28 sps:$4 sm:$0xff]  }
 0x64f   :  { %v8317_v18 = vld [vmem:[#allocation4 + $0xb8] ss:$28 sps:$4 sm:$0xff]  }
 0x650   :  { %6390 = vmatpush2.bf16.msra.mxu0 %v8257_v31  ;;  %v8320_v31 = vld [vmem:[#allocation4 + $0x438] ss:$28 sps:$4 sm:$0xff]  }
 0x651   :  { %6431 = vmatpush2.bf16.msra.mxu1 %v8260_v37  ;;  %6391 = vmatprep.subr.bf16.mxu0 %v8265_v21  ;;  %v8325_v37 = vld [vmem:[#allocation4 + $0x84] ss:$28 sps:$4 sm:$0xff]  }
 0x652   :  { %6432 = vmatprep.subr.bf16.mxu1 %v8268_v22  ;;  %v8328_v21 = vld [vmem:[#allocation4 + $0x404] ss:$28 sps:$4 sm:$0xff]  }
 0x653   :  { %v8323_v22 = vld [vmem:[#allocation4 + $0x80] ss:$28 sps:$4 sm:$0xff]  }
 0x654   :  { %6392 = vmatpush2.bf16.msra.mxu0 %v8263_v23  ;;  %v8326_v23 = vld [vmem:[#allocation4 + $0x400] ss:$28 sps:$4 sm:$0xff]  }
 0x655   :  { %6433 = vmatpush2.bf16.msra.mxu1 %v8266_v24  ;;  %6393 = vmatprep.subr.bf16.mxu0 %v8271_v12  ;;  %v8331_v24 = vld [vmem:[#allocation4 + $0x4c] ss:$28 sps:$4 sm:$0xff]  }
 0x656   :  { %6434 = vmatprep.subr.bf16.mxu1 %v8274_v25  ;;  %v8334_v12 = vld [vmem:[#allocation4 + $0x3cc] ss:$28 sps:$4 sm:$0xff]  }
 0x657   :  { %v8329_v25 = vld [vmem:[#allocation4 + $0x48] ss:$28 sps:$4 sm:$0xff]  }
 0x658   :  { %6394 = vmatpush2.bf16.msra.mxu0 %v8269_v26  ;;  %v8332_v26 = vld [vmem:[#allocation4 + $0x3c8] ss:$28 sps:$4 sm:$0xff]  }
 0x659   :  { %6435 = vmatpush2.bf16.msra.mxu1 %v8272_v27  ;;  %6395 = vmatprep.subr.bf16.mxu0 %v8277_v28  ;;  %v8337_v27 = vld [vmem:[#allocation4 + $0x14] ss:$28 sps:$4 sm:$0xff]  }
 0x65a   :  { %6436 = vmatprep.subr.bf16.mxu1 %v8280_v30  ;;  %v8340_v28 = vld [vmem:[#allocation4 + $0x394] ss:$28 sps:$4 sm:$0xff]  }
 0x65b   :  { %v8335_v30 = vld [vmem:[#allocation4 + $0x10] ss:$28 sps:$4 sm:$0xff]  }
 0x65c   :  { %6396 = vmatpush2.bf16.msra.mxu0 %v8275_v11  ;;  %v8338_v11 = vld [vmem:[#allocation4 + $0x390] ss:$28 sps:$4 sm:$0xff]  }
 0x65d   :  { %6437 = vmatpush2.bf16.msra.mxu1 %v8278_v34  ;;  %6397 = vmatprep.subr.bf16.mxu0 %v8283_v35  ;;  %v8343_v34 = vld [vmem:[#allocation4 + $0x35c] ss:$28 sps:$4 sm:$0xff]  }
 0x65e   :  { %6438 = vmatprep.subr.bf16.mxu1 %v8286_v36  ;;  %v8346_v35 = vld [vmem:[#allocation4 + $0x6dc] ss:$28 sps:$4 sm:$0xff]  }
 0x65f   :  { %v8341_v36 = vld [vmem:[#allocation4 + $0x358] ss:$28 sps:$4 sm:$0xff]  }
 0x660   :  { %6398 = vmatpush2.bf16.msra.mxu0 %v8281_v38  ;;  %v8344_v38 = vld [vmem:[#allocation4 + $0x6d8] ss:$28 sps:$4 sm:$0xff]  }
 0x661   :  { %6439 = vmatpush2.bf16.msra.mxu1 %v8284_v59  ;;  %6399 = vmatprep.subr.bf16.mxu0 %v8289_v39  ;;  %v8349_v59 = vld [vmem:[#allocation4 + $0x324] ss:$28 sps:$4 sm:$0xff]  }
 0x662   :  { %6440 = vmatprep.subr.bf16.mxu1 %v8292_v4  ;;  %v8352_v39 = vld [vmem:[#allocation4 + $0x6a4] ss:$28 sps:$4 sm:$0xff]  }
 0x663   :  { %v8347_v4 = vld [vmem:[#allocation4 + $0x320] ss:$28 sps:$4 sm:$0xff]  }
 0x664   :  { %6400 = vmatpush2.bf16.msra.mxu0 %v8287_v40  ;;  %v8350_v40 = vld [vmem:[#allocation4 + $0x6a0] ss:$28 sps:$4 sm:$0xff]  }
 0x665   :  { %6441 = vmatpush2.bf16.msra.mxu1 %v8290_v42  ;;  %6451 = vmatprep.subr.bf16.mxu0 %v8295_v43  ;;  %v8355_v42 = vld [vmem:[#allocation4 + $0x2ec] ss:$28 sps:$4 sm:$0xff]  }
 0x666   :  { %6492 = vmatprep.subr.bf16.mxu1 %v8298_v44  ;;  %v8358_v43 = vld [vmem:[#allocation4 + $0x66c] ss:$28 sps:$4 sm:$0xff]  }
 0x667   :  { %v9015_v52 = vpop.f32.mrf.mxu0  ;;  %6402 = vmatmul.mubr.bf16.vlgmr.msra.gmra.mxu0 %v9001_v3  ;;  %v8353_v44 = vld [vmem:[#allocation4 + $0x2e8] ss:$28 sps:$4 sm:$0xff]  }
 0x668   :  { %v9017_v55 = vpop.f32.mrf.mxu1  ;;  %6443 = vmatmul.mubr.bf16.vlgmr.msra.gmra.mxu1 %v9005_v9  ;;  %6452 = vmatpush1.bf16.msra.mxu0 %v8293_v45  ;;  %v8356_v45 = vld [vmem:[#allocation4 + $0x668] ss:$28 sps:$4 sm:$0xff]  }
 0x669   :  { %6493 = vmatpush1.bf16.msra.mxu1 %v8296_v46  ;;  %v9021_v61 = vpop.f32.mrf.mxu0  ;;  %6453 = vmatprep.subr.bf16.mxu0 %v8301_v47  ;;  %v8361_v46 = vld [vmem:[#allocation4 + $0x2b4] ss:$28 sps:$4 sm:$0xff]  }
 0x66a   :  { %v9023_v62 = vpop.f32.mrf.mxu1  ;;  %6494 = vmatprep.subr.bf16.mxu1 %v8304_v48  ;;  %6483 = vmatprep.mubr.bf16.mxu0 %v8971_v10  ;;  %v8364_v47 = vld [vmem:[#allocation4 + $0x634] ss:$28 sps:$4 sm:$0xff]  }
 0x66b   :  { %6524 = vmatprep.mubr.bf16.mxu1 %v8975_v41  ;;  %v6161_v2 = vpop.f32.mrf.mxu0  ;;  %v8359_v48 = vld [vmem:[#allocation4 + $0x2b0] ss:$28 sps:$4 sm:$0xff]  }
 0x66c   :  { %v6202_v29 = vpop.f32.mrf.mxu1  ;;  %6454 = vmatpush1.bf16.msra.mxu0 %v8299_v51  ;;  %v8362_v51 = vld [vmem:[#allocation4 + $0x630] ss:$28 sps:$4 sm:$0xff]   ;;  %v8373_v2 = vld [vmem:[#allocation4 + $0x244] ss:$28 sps:$4 sm:$0xff]  }
 0x66d   :  { %6495 = vmatpush1.bf16.msra.mxu1 %v8302_v58  ;;  %v6162_v0 = vpop.f32.mrf.mxu0  ;;  %6455 = vmatprep.subr.bf16.mxu0 %v8307_v1  ;;  %v8367_v58 = vld [vmem:[#allocation4 + $0x27c] ss:$28 sps:$4 sm:$0xff]  }
 0x66e   :  { %v6203_v7 = vpop.f32.mrf.mxu1  ;;  %6496 = vmatprep.subr.bf16.mxu1 %v8310_v63  ;;  %v8370_v1 = vld [vmem:[#allocation4 + $0x5fc] ss:$28 sps:$4 sm:$0xff]  }
 0x66f   :  { %v8365_v63 = vld [vmem:[#allocation4 + $0x278] ss:$28 sps:$4 sm:$0xff]   ;;  %v8371_v0 = vld [vmem:[#allocation4 + $0x240] ss:$28 sps:$4 sm:$0xff]  }
 0x670   :  { %6456 = vmatpush1.bf16.msra.mxu0 %v8305_v14  ;;  %v8368_v14 = vld [vmem:[#allocation4 + $0x5f8] ss:$28 sps:$4 sm:$0xff]   ;;  %v8374_v7 = vld [vmem:[#allocation4 + $0x5c0] ss:$28 sps:$4 sm:$0xff]  }
 0x671   :  { %6497 = vmatpush1.bf16.msra.mxu1 %v8308_v5  ;;  %6457 = vmatprep.subr.bf16.mxu0 %v8313_v6  ;;  %v3780_v29 = vld [vmem:[#allocation12 + $0x7] ss:$8 sm:$0xf] }
 0x672   :  { %6498 = vmatprep.subr.bf16.mxu1 %v8316_v19  ;;  %v3781_v5 = vld [vmem:[#allocation12 + $0x7] ss:$8 sm:$0xf0] }
 0x673   :  { %v8376_v6 = vld [vmem:[#allocation4 + $0x5c4] ss:$28 sps:$4 sm:$0xff]   ;;  %v8379_v19 = vld [vmem:[#allocation4 + $0x20c] ss:$28 sps:$4 sm:$0xff]  }
 0x674   :  { %6458 = vmatpush1.bf16.msra.mxu0 %v8311_v20  ;;  %v8382_v20 = vld [vmem:[#allocation4 + $0x58c] ss:$28 sps:$4 sm:$0xff]  }
 0x675   :  { %6499 = vmatpush1.bf16.msra.mxu1 %v8314_v16  ;;  %6459 = vmatprep.subr.bf16.mxu0 %v8319_v33  ;;  %v9027_v16 = vor.u32 %v3781_v5, %v3780_v29  ;;  %v8377_v33 = vld [vmem:[#allocation4 + $0x208] ss:$28 sps:$4 sm:$0xff]   ;;  %v8416_v29 = vld [vmem:[#allocation4 + $0xb38] ss:$28 sps:$4 sm:$0xff]  }
 0x676   :  { %6500 = vmatprep.subr.bf16.mxu1 %v8322_v17  ;;  %v8380_v17 = vld [vmem:[#allocation4 + $0x588] ss:$28 sps:$4 sm:$0xff]  }
 0x677   :  { %v8421_v5 = vld [vmem:[#allocation4 + $0x784] ss:$28 sps:$4 sm:$0xff]  }
 0x678   :  { %6460 = vmatpush1.bf16.msra.mxu0 %v8317_v18  ;;  %v8385_v18 = vld [vmem:[#allocation4 + $0x1d4] ss:$28 sps:$4 sm:$0xff]  }
 0x679   :  { %6501 = vmatpush1.bf16.msra.mxu1 %v8320_v31  ;;  %6461 = vmatprep.subr.bf16.mxu0 %v8325_v37  ;;  %v8388_v31 = vld [vmem:[#allocation4 + $0x554] ss:$28 sps:$4 sm:$0xff]   ;;  %v3787_v37 = vrot.slane %v9027_v16, %v8816_v13  ;;  %v8397_v13 = vld [vmem:[#allocation4 + $0x864] ss:$28 sps:$4 sm:$0xff]  }
 0x67a   :  { %6502 = vmatprep.subr.bf16.mxu1 %v8328_v21  ;;  %v8383_v21 = vld [vmem:[#allocation4 + $0x1d0] ss:$28 sps:$4 sm:$0xff]  }
 0x67c   :  { %6462 = vmatpush1.bf16.msra.mxu0 %v8323_v22  ;;  %v8386_v22 = vld [vmem:[#allocation4 + $0x550] ss:$28 sps:$4 sm:$0xff]  }
 0x67d   :  { %6503 = vmatpush1.bf16.msra.mxu1 %v8326_v23  ;;  %6463 = vmatprep.subr.bf16.mxu0 %v8331_v24  ;;  %v3791_v23 = vrot.slane %v9027_v16, %v8819_v15  ;;  %v8391_v24 = vld [vmem:[#allocation4 + $0x89c] ss:$28 sps:$4 sm:$0xff]  }
 0x67e   :  { %6504 = vmatprep.subr.bf16.mxu1 %v8334_v12  ;;  %v8394_v12 = vld [vmem:[#allocation4 + $0xc1c] ss:$28 sps:$4 sm:$0xff]  }
 0x680   :  { %6464 = vmatpush1.bf16.msra.mxu0 %v8329_v25  ;;  %v6158_v25 = vadd.f32 %v9015_v52, %v3787_v37  ;;  %v8433_v37 = vld [vmem:[#allocation4 + $0x714] ss:$28 sps:$4 sm:$0xff]  }
 0x681   :  { %6505 = vmatpush1.bf16.msra.mxu1 %v8332_v26  ;;  %6465 = vmatprep.subr.bf16.mxu0 %v8337_v27  ;;  %v8389_v26 = vld [vmem:[#allocation4 + $0x898] ss:$28 sps:$4 sm:$0xff]   ;;  %v6160_v27 = vadd.f32 %v9021_v61, %v3791_v23  ;;  %v8395_v61 = vld [vmem:[#allocation4 + $0x860] ss:$28 sps:$4 sm:$0xff]   ;;  %v8434_v23 = vld [vmem:[#allocation4 + $0xa90] ss:$28 sps:$4 sm:$0xff]  }
 0x682   :  { %6506 = vmatprep.subr.bf16.mxu1 %v8340_v28  ;;  %v8392_v28 = vld [vmem:[#allocation4 + $0xc18] ss:$28 sps:$4 sm:$0xff]   ;;  %v6199_v15 = vadd.f32 %v9017_v55, %v6158_v25 }
 0x683   :  { %v6201_v52 = vadd.f32 %v9023_v62, %v6160_v27  ;;  %v8437_v25 = vld [vmem:[#allocation4 + $0xa58] ss:$28 sps:$4 sm:$0xff]   ;;  %v8445_v27 = vld [vmem:[#allocation4 + $0xa24] ss:$28 sps:$4 sm:$0xff]  }
 0x684   :  { %6466 = vmatpush1.bf16.msra.mxu0 %v8335_v30  ;;  %v8400_v30 = vld [vmem:[#allocation4 + $0xbe4] ss:$28 sps:$4 sm:$0xff]  }
 0x685   :  { %6507 = vmatpush1.bf16.msra.mxu1 %v8338_v11  ;;  %6467 = vmatprep.subr.bf16.mxu0 %v8343_v34 }
 0x686   :  { %6508 = vmatprep.subr.bf16.mxu1 %v8346_v35 }
 0x688   :  { %6468 = vmatpush2.bf16.msra.mxu0 %v8341_v36  ;;  %v8398_v36 = vld [vmem:[#allocation4 + $0xbe0] ss:$28 sps:$4 sm:$0xff]  }
 0x689   :  { %6509 = vmatpush2.bf16.msra.mxu1 %v8344_v38  ;;  %6469 = vmatprep.subr.bf16.mxu0 %v8349_v59 }
 0x68a   :  { %6510 = vmatprep.subr.bf16.mxu1 %v8352_v39  ;;  %v8403_v39 = vld [vmem:[#allocation4 + $0x82c] ss:$28 sps:$4 sm:$0xff]  }
 0x68c   :  { %6470 = vmatpush2.bf16.msra.mxu0 %v8347_v4  ;;  %v8406_v4 = vld [vmem:[#allocation4 + $0xbac] ss:$28 sps:$4 sm:$0xff]  }
 0x68d   :  { %6511 = vmatpush2.bf16.msra.mxu1 %v8350_v40  ;;  %6471 = vmatprep.subr.bf16.mxu0 %v8355_v42 }
 0x68e   :  { %6512 = vmatprep.subr.bf16.mxu1 %v8358_v43 }
 0x690   :  { %6472 = vmatpush2.bf16.msra.mxu0 %v8353_v44  ;;  %v8401_v44 = vld [vmem:[#allocation4 + $0x828] ss:$28 sps:$4 sm:$0xff]  }
 0x691   :  { %6513 = vmatpush2.bf16.msra.mxu1 %v8356_v45  ;;  %6473 = vmatprep.subr.bf16.mxu0 %v8361_v46  ;;  %v8404_v45 = vld [vmem:[#allocation4 + $0xba8] ss:$28 sps:$4 sm:$0xff]  }
 0x692   :  { %6514 = vmatprep.subr.bf16.mxu1 %v8364_v47 }
 0x694   :  { %6474 = vmatpush2.bf16.msra.mxu0 %v8359_v48  ;;  %v8409_v48 = vld [vmem:[#allocation4 + $0x7f4] ss:$28 sps:$4 sm:$0xff]  }
 0x695   :  { %6515 = vmatpush2.bf16.msra.mxu1 %v8362_v51  ;;  %6475 = vmatprep.subr.bf16.mxu0 %v8367_v58  ;;  %v8412_v51 = vld [vmem:[#allocation4 + $0xb74] ss:$28 sps:$4 sm:$0xff]  }
 0x696   :  { %6516 = vmatprep.subr.bf16.mxu1 %v8370_v1  ;;  %v8407_v58 = vld [vmem:[#allocation4 + $0x7f0] ss:$28 sps:$4 sm:$0xff]  }
 0x697   :  { %v8410_v1 = vld [vmem:[#allocation4 + $0xb70] ss:$28 sps:$4 sm:$0xff]  }
 0x698   :  { %6476 = vmatpush2.bf16.msra.mxu0 %v8365_v63  ;;  %v8415_v63 = vld [vmem:[#allocation4 + $0x7bc] ss:$28 sps:$4 sm:$0xff]  }
 0x699   :  { %6517 = vmatpush2.bf16.msra.mxu1 %v8368_v14  ;;  %6477 = vmatprep.subr.bf16.mxu0 %v8373_v2  ;;  %v8418_v14 = vld [vmem:[#allocation4 + $0xb3c] ss:$28 sps:$4 sm:$0xff]  }
 0x69a   :  { %6518 = vmatprep.subr.bf16.mxu1 %v8376_v6  ;;  %v8413_v2 = vld [vmem:[#allocation4 + $0x7b8] ss:$28 sps:$4 sm:$0xff]   ;;  %v8424_v6 = vld [vmem:[#allocation4 + $0xb04] ss:$28 sps:$4 sm:$0xff]  }
 0x69c   :  { %6478 = vmatpush2.bf16.msra.mxu0 %v8371_v0  ;;  %v8419_v0 = vld [vmem:[#allocation4 + $0x780] ss:$28 sps:$4 sm:$0xff]  }
 0x69d   :  { %6519 = vmatpush2.bf16.msra.mxu1 %v8374_v7  ;;  %6479 = vmatprep.subr.bf16.mxu0 %v8379_v19  ;;  %v8422_v7 = vld [vmem:[#allocation4 + $0xb00] ss:$28 sps:$4 sm:$0xff]  }
 0x69e   :  { %6520 = vmatprep.subr.bf16.mxu1 %v8382_v20  ;;  %v8427_v20 = vld [vmem:[#allocation4 + $0x74c] ss:$28 sps:$4 sm:$0xff]  }
 0x6a0   :  { %6480 = vmatpush2.bf16.msra.mxu0 %v8377_v33  ;;  %v8430_v33 = vld [vmem:[#allocation4 + $0xacc] ss:$28 sps:$4 sm:$0xff]  }
 0x6a1   :  { %6521 = vmatpush2.bf16.msra.mxu1 %v8380_v17  ;;  %6481 = vmatprep.subr.bf16.mxu0 %v8385_v18  ;;  %v8425_v18 = vld [vmem:[#allocation4 + $0x748] ss:$28 sps:$4 sm:$0xff]  }
 0x6a2   :  { %6522 = vmatprep.subr.bf16.mxu1 %v8388_v31  ;;  %v8428_v31 = vld [vmem:[#allocation4 + $0xac8] ss:$28 sps:$4 sm:$0xff]  }
 0x6a4   :  { %6482 = vmatpush2.bf16.msra.mxu0 %v8383_v21  ;;  %v8436_v21 = vld [vmem:[#allocation4 + $0xa94] ss:$28 sps:$4 sm:$0xff]  }
 0x6a5   :  { %6523 = vmatpush2.bf16.msra.mxu1 %v8386_v22  ;;  %6533 = vmatprep.subr.bf16.mxu0 %v8391_v24  ;;  %v8431_v22 = vld [vmem:[#allocation4 + $0x710] ss:$28 sps:$4 sm:$0xff]   ;;  %v8439_v24 = vld [vmem:[#allocation4 + $0xa5c] ss:$28 sps:$4 sm:$0xff]  }
 0x6a6   :  { %6574 = vmatprep.subr.bf16.mxu1 %v8394_v12  ;;  %v8442_v12 = vld [vmem:[#allocation4 + $0xddc] ss:$28 sps:$4 sm:$0xff]  }
 0x6a7   :  { %v6239_v11 = vpop.f32.mrf.mxu0  ;;  %6484 = vmatmul.mubr.bf16.vlgmr.msra.gmra.mxu0 %v8981_v49 }
 0x6a8   :  { %v6280_v34 = vpop.f32.mrf.mxu1  ;;  %6525 = vmatmul.mubr.bf16.vlgmr.msra.gmra.mxu1 %v8985_v50  ;;  %v6240_v35 = vadd.f32 %v6239_v11, %v6199_v15  ;;  %6534 = vmatpush1.bf16.msra.mxu0 %v8389_v26  ;;  %v8440_v26 = vld [vmem:[#allocation4 + $0xdd8] ss:$28 sps:$4 sm:$0xff]   ;;  %v8451_v15 = vld [vmem:[#allocation4 + $0x9ec] ss:$28 sps:$4 sm:$0xff]  }
 0x6a9   :  { %6575 = vmatpush1.bf16.msra.mxu1 %v8392_v28  ;;  %v6241_v38 = vpop.f32.mrf.mxu0  ;;  %6535 = vmatprep.subr.bf16.mxu0 %v8397_v13  ;;  %v8448_v28 = vld [vmem:[#allocation4 + $0xda4] ss:$28 sps:$4 sm:$0xff]   ;;  %v8454_v11 = vld [vmem:[#allocation4 + $0xd6c] ss:$28 sps:$4 sm:$0xff]  }
 0x6aa   :  { %v6282_v59 = vpop.f32.mrf.mxu1  ;;  %6576 = vmatprep.subr.bf16.mxu1 %v8400_v30  ;;  %v6281_v55 = vadd.f32 %v6280_v34, %v6240_v35  ;;  %v6242_v40 = vadd.f32 %v6241_v38, %v6201_v52  ;;  %6565 = vmatprep.mubr.bf16.mxu0 %v8989_v60  ;;  %v8443_v13 = vld [vmem:[#allocation4 + $0xa20] ss:$28 sps:$4 sm:$0xff]   ;;  %v8449_v34 = vld [vmem:[#allocation4 + $0x9e8] ss:$28 sps:$4 sm:$0xff]   ;;  %v8457_v35 = vld [vmem:[#allocation4 + $0x9b4] ss:$28 sps:$4 sm:$0xff]  }
 0x6ab   :  { %6606 = vmatprep.mubr.bf16.mxu1 %v8993_v32  ;;  %v6243_v42 = vpop.f32.mrf.mxu0  ;;  %v8446_v30 = vld [vmem:[#allocation4 + $0xda0] ss:$28 sps:$4 sm:$0xff]   ;;  %v8452_v52 = vld [vmem:[#allocation4 + $0xd68] ss:$28 sps:$4 sm:$0xff]   ;;  %v8458_v38 = vld [vmem:[#allocation4 + $0xd30] ss:$28 sps:$4 sm:$0xff]  }
 0x6ac   :  { %v6284_v43 = vpop.f32.mrf.mxu1  ;;  %8549 = vtanh.f32 %v6281_v55  ;;  %v6283_v62 = vadd.f32 %v6282_v59, %v6242_v40  ;;  %6536 = vmatpush1.bf16.msra.mxu0 %v8395_v61  ;;  %v8460_v61 = vld [vmem:[#allocation4 + $0xd34] ss:$28 sps:$4 sm:$0xff]   ;;  %v8463_v59 = vld [vmem:[#allocation4 + $0x97c] ss:$28 sps:$4 sm:$0xff]   ;;  %v8469_v40 = vld [vmem:[#allocation4 + $0x944] ss:$28 sps:$4 sm:$0xff]  }
 0x6ad   :  { %6577 = vmatpush1.bf16.msra.mxu1 %v8398_v36  ;;  %v6244_v46 = vpop.f32.mrf.mxu0  ;;  %6537 = vmatprep.subr.bf16.mxu0 %v8403_v39  ;;  %v8455_v36 = vld [vmem:[#allocation4 + $0x9b0] ss:$28 sps:$4 sm:$0xff]   ;;  %v8466_v39 = vld [vmem:[#allocation4 + $0xcfc] ss:$28 sps:$4 sm:$0xff]   ;;  %v8472_v42 = vld [vmem:[#allocation4 + $0xcc4] ss:$28 sps:$4 sm:$0xff]  }
 0x6ae   :  { %v6285_v47 = vpop.f32.mrf.mxu1  ;;  %6578 = vmatprep.subr.bf16.mxu1 %v8406_v4  ;;  %8551 = vtanh.f32 %v6283_v62  ;;  %v8461_v4 = vld [vmem:[#allocation4 + $0x978] ss:$28 sps:$4 sm:$0xff]   ;;  %v8467_v43 = vld [vmem:[#allocation4 + $0x940] ss:$28 sps:$4 sm:$0xff]   ;;  %v8473_v46 = vld [vmem:[#allocation4 + $0x908] ss:$28 sps:$4 sm:$0xff]  }
 0x6af   :  { %v8464_v55 = vld [vmem:[#allocation4 + $0xcf8] ss:$28 sps:$4 sm:$0xff]   ;;  %v8470_v62 = vld [vmem:[#allocation4 + $0xcc0] ss:$28 sps:$4 sm:$0xff]   ;;  %v8476_v47 = vld [vmem:[#allocation4 + $0xc88] ss:$28 sps:$4 sm:$0xff]  }
 0x6b0   :  { %6538 = vmatpush1.bf16.msra.mxu0 %v8401_v44  ;;  %v8475_v44 = vld [vmem:[#allocation4 + $0x90c] ss:$28 sps:$4 sm:$0xff]  }
 0x6b1   :  { %6579 = vmatpush1.bf16.msra.mxu1 %v8404_v45  ;;  %6539 = vmatprep.subr.bf16.mxu0 %v8409_v48  ;;  %v8478_v45 = vld [vmem:[#allocation4 + $0xc8c] ss:$28 sps:$4 sm:$0xff]   ;;  %v8481_v48 = vld [vmem:[#allocation4 + $0x8d4] ss:$28 sps:$4 sm:$0xff]  }
 0x6b2   :  { %6580 = vmatprep.subr.bf16.mxu1 %v8412_v51  ;;  %v8484_v51 = vld [vmem:[#allocation4 + $0xc54] ss:$28 sps:$4 sm:$0xff]  }
 0x6b4   :  { %6540 = vmatpush1.bf16.msra.mxu0 %v8407_v58  ;;  %v8479_v58 = vld [vmem:[#allocation4 + $0x8d0] ss:$28 sps:$4 sm:$0xff]  }
 0x6b5   :  { %6581 = vmatpush1.bf16.msra.mxu1 %v8410_v1  ;;  %6541 = vmatprep.subr.bf16.mxu0 %v8415_v63  ;;  %v8482_v1 = vld [vmem:[#allocation4 + $0xc50] ss:$28 sps:$4 sm:$0xff]   ;;  %v8485_v63 = vld [vmem:[#allocation4 + $0x360] ss:$28 sps:$4 sm:$0xff]  }
 0x6b6   :  { %6582 = vmatprep.subr.bf16.mxu1 %v8418_v14  ;;  %v8486_v14 = vld [vmem:[#allocation4 + $0x6e0] ss:$28 sps:$4 sm:$0xff]  }
 0x6b8   :  { %6542 = vmatpush1.bf16.msra.mxu0 %v8413_v2  ;;  %v8487_v2 = vld [vmem:[#allocation4 + $0x1a0] ss:$28 sps:$4 sm:$0xff]  }
 0x6b9   :  { %6583 = vmatpush1.bf16.msra.mxu1 %v8416_v29  ;;  %v8550_v19 = vpop.eup %8549  ;;  %6543 = vmatprep.subr.bf16.mxu0 %v8421_v5  ;;  %v8488_v29 = vld [vmem:[#allocation4 + $0x520] ss:$28 sps:$4 sm:$0xff]   ;;  %v8489_v5 = vld [vmem:[#allocation4 + $0x328] ss:$28 sps:$4 sm:$0xff]  }
 0x6ba   :  { %6584 = vmatprep.subr.bf16.mxu1 %v8424_v6  ;;  %6782 = vst [vmem:[#allocation14] sm:$0xff] %v8550_v19  ;;  %v8490_v6 = vld [vmem:[#allocation4 + $0x6a8] ss:$28 sps:$4 sm:$0xff]  }
 0x6bb   :  { %v8552_v17 = vpop.eup %8551  ;;  %v8491_v19 = vld [vmem:[#allocation4 + $0x168] ss:$28 sps:$4 sm:$0xff]  }
 0x6bc   :  { %6783 = vst [vmem:[#allocation14 + $0x8] sm:$0xff] %v8552_v17  ;;  %6544 = vmatpush1.bf16.msra.mxu0 %v8419_v0 }
 0x6bd   :  { %6585 = vmatpush1.bf16.msra.mxu1 %v8422_v7  ;;  %6545 = vmatprep.subr.bf16.mxu0 %v8427_v20  ;;  %v8492_v20 = vld [vmem:[#allocation4 + $0x4e8] ss:$28 sps:$4 sm:$0xff]  }
 0x6be   :  { %6586 = vmatprep.subr.bf16.mxu1 %v8430_v33 }
 0x6c0   :  { %6546 = vmatpush1.bf16.msra.mxu0 %v8425_v18  ;;  %v8493_v18 = vld [vmem:[#allocation4 + $0x2f0] ss:$28 sps:$4 sm:$0xff]  }
 0x6c1   :  { %6587 = vmatpush1.bf16.msra.mxu1 %v8428_v31  ;;  %6547 = vmatprep.subr.bf16.mxu0 %v8433_v37  ;;  %v8494_v31 = vld [vmem:[#allocation4 + $0x670] ss:$28 sps:$4 sm:$0xff]  }
 0x6c2   :  { %6588 = vmatprep.subr.bf16.mxu1 %v8436_v21 }
 0x6c4   :  { %6548 = vmatpush1.bf16.msra.mxu0 %v8431_v22  ;;  %v8495_v22 = vld [vmem:[#allocation4 + $0x130] ss:$28 sps:$4 sm:$0xff]  }
 0x6c5   :  { %6589 = vmatpush1.bf16.msra.mxu1 %v8434_v23  ;;  %6549 = vmatprep.subr.bf16.mxu0 %v8439_v24  ;;  %v8496_v23 = vld [vmem:[#allocation4 + $0x4b0] ss:$28 sps:$4 sm:$0xff]  }
 0x6c6   :  { %6590 = vmatprep.subr.bf16.mxu1 %v8442_v12 }
 0x6c8   :  { %6550 = vmatpush2.bf16.msra.mxu0 %v8437_v25  ;;  %v8497_v25 = vld [vmem:[#allocation4 + $0x2b8] ss:$28 sps:$4 sm:$0xff]  }
 0x6c9   :  { %6591 = vmatpush2.bf16.msra.mxu1 %v8440_v26  ;;  %6551 = vmatprep.subr.bf16.mxu0 %v8445_v27  ;;  %v8498_v26 = vld [vmem:[#allocation4 + $0x638] ss:$28 sps:$4 sm:$0xff]  }
 0x6ca   :  { %6592 = vmatprep.subr.bf16.mxu1 %v8448_v28  ;;  %v8499_v27 = vld [vmem:[#allocation4 + $0xf8] ss:$28 sps:$4 sm:$0xff]  }
 0x6cb   :  { %v8500_v28 = vld [vmem:[#allocation4 + $0x478] ss:$28 sps:$4 sm:$0xff]  }
 0x6cc   :  { %6552 = vmatpush2.bf16.msra.mxu0 %v8443_v13  ;;  %v8503_v13 = vld [vmem:[#allocation4 + $0xc0] ss:$28 sps:$4 sm:$0xff]  }
 0x6cd   :  { %6593 = vmatpush2.bf16.msra.mxu1 %v8446_v30  ;;  %6553 = vmatprep.subr.bf16.mxu0 %v8451_v15  ;;  %v8504_v30 = vld [vmem:[#allocation4 + $0x440] ss:$28 sps:$4 sm:$0xff]   ;;  %v8505_v15 = vld [vmem:[#allocation4 + $0x248] ss:$28 sps:$4 sm:$0xff]  }
 0x6ce   :  { %6594 = vmatprep.subr.bf16.mxu1 %v8454_v11  ;;  %v8506_v11 = vld [vmem:[#allocation4 + $0x5c8] ss:$28 sps:$4 sm:$0xff]  }
 0x6d0   :  { %6554 = vmatpush2.bf16.msra.mxu0 %v8449_v34  ;;  %v8507_v34 = vld [vmem:[#allocation4 + $0x88] ss:$28 sps:$4 sm:$0xff]  }
 0x6d1   :  { %6595 = vmatpush2.bf16.msra.mxu1 %v8452_v52  ;;  %6555 = vmatprep.subr.bf16.mxu0 %v8457_v35  ;;  %v8508_v52 = vld [vmem:[#allocation4 + $0x408] ss:$28 sps:$4 sm:$0xff]   ;;  %v8509_v35 = vld [vmem:[#allocation4 + $0x210] ss:$28 sps:$4 sm:$0xff]  }
 0x6d2   :  { %6596 = vmatprep.subr.bf16.mxu1 %v8460_v61  ;;  %v8510_v61 = vld [vmem:[#allocation4 + $0x590] ss:$28 sps:$4 sm:$0xff]  }
 0x6d4   :  { %6556 = vmatpush2.bf16.msra.mxu0 %v8455_v36  ;;  %v8511_v36 = vld [vmem:[#allocation4 + $0x50] ss:$28 sps:$4 sm:$0xff]  }
 0x6d5   :  { %6597 = vmatpush2.bf16.msra.mxu1 %v8458_v38  ;;  %6557 = vmatprep.subr.bf16.mxu0 %v8463_v59  ;;  %v8512_v38 = vld [vmem:[#allocation4 + $0x3d0] ss:$28 sps:$4 sm:$0xff]   ;;  %v8513_v59 = vld [vmem:[#allocation4 + $0x1d8] ss:$28 sps:$4 sm:$0xff]  }
 0x6d6   :  { %6598 = vmatprep.subr.bf16.mxu1 %v8466_v39  ;;  %v8514_v39 = vld [vmem:[#allocation4 + $0x558] ss:$28 sps:$4 sm:$0xff]  }
 0x6d8   :  { %6558 = vmatpush2.bf16.msra.mxu0 %v8461_v4  ;;  %v8515_v4 = vld [vmem:[#allocation4 + $0x18] ss:$28 sps:$4 sm:$0xff]  }
 0x6d9   :  { %6599 = vmatpush2.bf16.msra.mxu1 %v8464_v55  ;;  %6559 = vmatprep.subr.bf16.mxu0 %v8469_v40  ;;  %v8516_v55 = vld [vmem:[#allocation4 + $0x398] ss:$28 sps:$4 sm:$0xff]   ;;  %v8517_v40 = vld [vmem:[#allocation4 + $0xa60] ss:$28 sps:$4 sm:$0xff]  }
 0x6da   :  { %6600 = vmatprep.subr.bf16.mxu1 %v8472_v42  ;;  %v8518_v42 = vld [vmem:[#allocation4 + $0xde0] ss:$28 sps:$4 sm:$0xff]  }
 0x6dc   :  { %6560 = vmatpush2.bf16.msra.mxu0 %v8467_v43  ;;  %v8519_v43 = vld [vmem:[#allocation4 + $0x8a0] ss:$28 sps:$4 sm:$0xff]  }
 0x6dd   :  { %6601 = vmatpush2.bf16.msra.mxu1 %v8470_v62  ;;  %6561 = vmatprep.subr.bf16.mxu0 %v8475_v44  ;;  %v8520_v62 = vld [vmem:[#allocation4 + $0xc20] ss:$28 sps:$4 sm:$0xff]   ;;  %v8521_v44 = vld [vmem:[#allocation4 + $0xa28] ss:$28 sps:$4 sm:$0xff]  }
 0x6de   :  { %6602 = vmatprep.subr.bf16.mxu1 %v8478_v45  ;;  %v8522_v45 = vld [vmem:[#allocation4 + $0xda8] ss:$28 sps:$4 sm:$0xff]  }
 0x6e0   :  { %6562 = vmatpush2.bf16.msra.mxu0 %v8473_v46  ;;  %v8523_v46 = vld [vmem:[#allocation4 + $0x868] ss:$28 sps:$4 sm:$0xff]  }
 0x6e1   :  { %6603 = vmatpush2.bf16.msra.mxu1 %v8476_v47  ;;  %6563 = vmatprep.subr.bf16.mxu0 %v8481_v48  ;;  %v8524_v47 = vld [vmem:[#allocation4 + $0xbe8] ss:$28 sps:$4 sm:$0xff]   ;;  %v8525_v48 = vld [vmem:[#allocation4 + $0x9f0] ss:$28 sps:$4 sm:$0xff]  }
 0x6e2   :  { %6604 = vmatprep.subr.bf16.mxu1 %v8484_v51  ;;  %v8526_v51 = vld [vmem:[#allocation4 + $0xd70] ss:$28 sps:$4 sm:$0xff]  }
 0x6e4   :  { %6564 = vmatpush2.bf16.msra.mxu0 %v8479_v58  ;;  %v8527_v58 = vld [vmem:[#allocation4 + $0x830] ss:$28 sps:$4 sm:$0xff]  }
 0x6e5   :  { %6605 = vmatpush2.bf16.msra.mxu1 %v8482_v1  ;;  %7630 = vmatprep.subr.bf16.mxu0 %v8485_v63  ;;  %v8528_v1 = vld [vmem:[#allocation4 + $0xbb0] ss:$28 sps:$4 sm:$0xff]   ;;  %v8531_v63 = vld [vmem:[#allocation4 + $0x7f8] ss:$28 sps:$4 sm:$0xff]  }
 0x6e6   :  { %7652 = vmatprep.subr.bf16.mxu1 %v8486_v14  ;;  %v8532_v14 = vld [vmem:[#allocation4 + $0xb78] ss:$28 sps:$4 sm:$0xff]  }
 0x6e7   :  { %v9041_v0 = vpop.f32.mrf.mxu0  ;;  %6566 = vmatmul.mubr.bf16.vlgmr.msra.gmra.mxu0 %v9001_v3 }
 0x6e8   :  { %v9043_v7 = vpop.f32.mrf.mxu1  ;;  %6607 = vmatmul.mubr.bf16.vlgmr.msra.gmra.mxu1 %v9005_v9  ;;  %7631 = vmatpush3.bf16.msra.mxu0 %v8487_v2  ;;  %v8533_v2 = vld [vmem:[#allocation4 + $0x980] ss:$28 sps:$4 sm:$0xff]  }
 0x6e9   :  { %7653 = vmatpush3.bf16.msra.mxu1 %v8488_v29  ;;  %v9047_v33 = vpop.f32.mrf.mxu0  ;;  %7632 = vmatprep.subr.bf16.mxu0 %v8489_v5  ;;  %v8534_v29 = vld [vmem:[#allocation4 + $0xd00] ss:$28 sps:$4 sm:$0xff]   ;;  %v8537_v5 = vld [vmem:[#allocation4 + $0x948] ss:$28 sps:$4 sm:$0xff]  }
 0x6ea   :  { %v9049_v17 = vpop.f32.mrf.mxu1  ;;  %7654 = vmatprep.subr.bf16.mxu1 %v8490_v6  ;;  %6647 = vmatprep.mubr.bf16.mxu0 %v8971_v10  ;;  %v8501_v10 = vld [vmem:[#allocation4 + $0x280] ss:$28 sps:$4 sm:$0xff]   ;;  %v8538_v6 = vld [vmem:[#allocation4 + $0xcc8] ss:$28 sps:$4 sm:$0xff]  }
 0x6eb   :  { %6687 = vmatprep.mubr.bf16.mxu1 %v8975_v41  ;;  %v6325_v37 = vpop.f32.mrf.mxu0  ;;  %v8502_v41 = vld [vmem:[#allocation4 + $0x600] ss:$28 sps:$4 sm:$0xff]  }
 0x6ec   :  { %v6366_v21 = vpop.f32.mrf.mxu1  ;;  %7633 = vmatpush3.bf16.msra.mxu0 %v8491_v19  ;;  %v8539_v19 = vld [vmem:[#allocation4 + $0x788] ss:$28 sps:$4 sm:$0xff]   ;;  %v8543_v37 = vld [vmem:[#allocation4 + $0x750] ss:$28 sps:$4 sm:$0xff]  }
 0x6ed   :  { %7655 = vmatpush3.bf16.msra.mxu1 %v8492_v20  ;;  %v6326_v24 = vpop.f32.mrf.mxu0  ;;  %7634 = vmatprep.subr.bf16.mxu0 %v8493_v18  ;;  %v8540_v20 = vld [vmem:[#allocation4 + $0xb08] ss:$28 sps:$4 sm:$0xff]   ;;  %v8541_v18 = vld [vmem:[#allocation4 + $0x910] ss:$28 sps:$4 sm:$0xff]  }
 0x6ee   :  { %v6367_v12 = vpop.f32.mrf.mxu1  ;;  %7656 = vmatprep.subr.bf16.mxu1 %v8494_v31  ;;  %v8542_v31 = vld [vmem:[#allocation4 + $0xc90] ss:$28 sps:$4 sm:$0xff]   ;;  %v3795_v24 = vrot.slane %v9027_v16, %v8848_v56 }
 0x6ef   :  { %v8544_v21 = vld [vmem:[#allocation4 + $0xad0] ss:$28 sps:$4 sm:$0xff]   ;;  %v3799_v12 = vrot.slane %v9027_v16, %v8851_v57 }
 0x6f0   :  { %7635 = vmatpush3.bf16.msra.mxu0 %v8495_v22  ;;  %v8545_v22 = vld [vmem:[#allocation4 + $0x8d8] ss:$28 sps:$4 sm:$0xff]  }
 0x6f1   :  { %7657 = vmatpush3.bf16.msra.mxu1 %v8496_v23  ;;  %7636 = vmatprep.subr.bf16.mxu0 %v8497_v25  ;;  %v8546_v23 = vld [vmem:[#allocation4 + $0xc58] ss:$28 sps:$4 sm:$0xff]  }
 0x6f2   :  { %7658 = vmatprep.subr.bf16.mxu1 %v8498_v26  ;;  %v8547_v25 = vld [vmem:[#allocation4 + $0x718] ss:$28 sps:$4 sm:$0xff]  }
 0x6f3   :  { %v8548_v26 = vld [vmem:[#allocation4 + $0xa98] ss:$28 sps:$4 sm:$0xff]  }
 0x6f4   :  { %7637 = vmatpush3.bf16.msra.mxu0 %v8499_v27  ;;  %v6322_v27 = vadd.f32 %v9041_v0, %v3795_v24 }
 0x6f5   :  { %7659 = vmatpush3.bf16.msra.mxu1 %v8500_v28  ;;  %7638 = vmatprep.subr.bf16.mxu0 %v8501_v10  ;;  %v6324_v28 = vadd.f32 %v9047_v33, %v3799_v12 }
 0x6f6   :  { %7660 = vmatprep.subr.bf16.mxu1 %v8502_v41  ;;  %v6363_v10 = vadd.f32 %v9043_v7, %v6322_v27 }
 0x6f7   :  { %v6365_v56 = vadd.f32 %v9049_v17, %v6324_v28 }
 0x6f8   :  { %7639 = vmatpush3.bf16.msra.mxu0 %v8503_v13 }
 0x6f9   :  { %7661 = vmatpush3.bf16.msra.mxu1 %v8504_v30  ;;  %7640 = vmatprep.subr.bf16.mxu0 %v8505_v15 }
 0x6fa   :  { %7662 = vmatprep.subr.bf16.mxu1 %v8506_v11 }
 0x6fc   :  { %7641 = vmatpush3.bf16.msra.mxu0 %v8507_v34 }
 0x6fd   :  { %7663 = vmatpush3.bf16.msra.mxu1 %v8508_v52  ;;  %7642 = vmatprep.subr.bf16.mxu0 %v8509_v35 }
 0x6fe   :  { %7664 = vmatprep.subr.bf16.mxu1 %v8510_v61 }
 0x700   :  { %7643 = vmatpush3.bf16.msra.mxu0 %v8511_v36 }
 0x701   :  { %7665 = vmatpush3.bf16.msra.mxu1 %v8512_v38  ;;  %7644 = vmatprep.subr.bf16.mxu0 %v8513_v59 }
 0x702   :  { %7666 = vmatprep.subr.bf16.mxu1 %v8514_v39 }
 0x704   :  { %7645 = vmatpush3.bf16.msra.mxu0 %v8515_v4 }
 0x705   :  { %7667 = vmatpush3.bf16.msra.mxu1 %v8516_v55  ;;  %7674 = vmatprep.subr.bf16.mxu0 %v8517_v40  ;;  %v3803_v40 = vrot.slane %v9027_v16, %v8934_v53 }
 0x706   :  { %7696 = vmatprep.subr.bf16.mxu1 %v8518_v42  ;;  %v3807_v42 = vrot.slane %v9027_v16, %v8937_v54 }
 0x707   :  { %6648 = vmatmul.mubr.bf16.vlgmr.msra.gmra.mxu0 %v8981_v49  ;;  %v8529_v49 = vld [vmem:[#allocation4 + $0x9b8] ss:$28 sps:$4 sm:$0xff]  }
 0x708   :  { %6688 = vmatmul.mubr.bf16.vlgmr.msra.gmra.mxu1 %v8985_v50  ;;  %7675 = vmatpush3.bf16.msra.mxu0 %v8519_v43  ;;  %v8530_v50 = vld [vmem:[#allocation4 + $0xd38] ss:$28 sps:$4 sm:$0xff]  }
 0x709   :  { %7697 = vmatpush3.bf16.msra.mxu1 %v8520_v62  ;;  %7676 = vmatprep.subr.bf16.mxu0 %v8521_v44 }
 0x70a   :  { %7698 = vmatprep.subr.bf16.mxu1 %v8522_v45  ;;  %6727 = vmatprep.mubr.bf16.mxu0 %v8989_v60  ;;  %v8535_v60 = vld [vmem:[#allocation4 + $0x7c0] ss:$28 sps:$4 sm:$0xff]  }
 0x70b   :  { %6767 = vmatprep.mubr.bf16.mxu1 %v8993_v32  ;;  %v8536_v32 = vld [vmem:[#allocation4 + $0xb40] ss:$28 sps:$4 sm:$0xff]  }
 0x70c   :  { %7677 = vmatpush3.bf16.msra.mxu0 %v8523_v46 }
 0x70d   :  { %7699 = vmatpush3.bf16.msra.mxu1 %v8524_v47  ;;  %7678 = vmatprep.subr.bf16.mxu0 %v8525_v48 }
 0x70e   :  { %7700 = vmatprep.subr.bf16.mxu1 %v8526_v51 }
 0x710   :  { %7679 = vmatpush3.bf16.msra.mxu0 %v8527_v58 }
 0x711   :  { %7701 = vmatpush3.bf16.msra.mxu1 %v8528_v1  ;;  %7680 = vmatprep.subr.bf16.mxu0 %v8529_v49 }
 0x712   :  { %7702 = vmatprep.subr.bf16.mxu1 %v8530_v50 }
 0x714   :  { %7681 = vmatpush3.bf16.msra.mxu0 %v8531_v63 }
 0x715   :  { %7703 = vmatpush3.bf16.msra.mxu1 %v8532_v14  ;;  %7682 = vmatprep.subr.bf16.mxu0 %v8533_v2 }
 0x716   :  { %7704 = vmatprep.subr.bf16.mxu1 %v8534_v29 }
 0x718   :  { %7683 = vmatpush3.bf16.msra.mxu0 %v8535_v60 }
 0x719   :  { %7705 = vmatpush3.bf16.msra.mxu1 %v8536_v32  ;;  %7684 = vmatprep.subr.bf16.mxu0 %v8537_v5 }
 0x71a   :  { %7706 = vmatprep.subr.bf16.mxu1 %v8538_v6 }
 0x71c   :  { %7685 = vmatpush3.bf16.msra.mxu0 %v8539_v19 }
 0x71d   :  { %7707 = vmatpush3.bf16.msra.mxu1 %v8540_v20  ;;  %7686 = vmatprep.subr.bf16.mxu0 %v8541_v18 }
 0x71e   :  { %7708 = vmatprep.subr.bf16.mxu1 %v8542_v31 }
 0x720   :  { %7687 = vmatpush3.bf16.msra.mxu0 %v8543_v37  ;;  %v3811_v37 = vrot.slane %v9027_v16, %v8954_v8 }
 0x721   :  { %7709 = vmatpush3.bf16.msra.mxu1 %v8544_v21  ;;  %7688 = vmatprep.subr.bf16.mxu0 %v8545_v22 }
 0x722   :  { %7710 = vmatprep.subr.bf16.mxu1 %v8546_v23 }
 0x724   :  { %7689 = vmatpush3.bf16.msra.mxu0 %v8547_v25 }
 0x725   :  { %7711 = vmatpush3.bf16.msra.mxu1 %v8548_v26 }
 0x727   :  { %v6403_v41 = vpop.f32.mrf.mxu0  ;;  %6728 = vmatmul.mubr.bf16.vlgmr.msra.gmra.mxu0 %v9001_v3 }
 0x728   :  { %v6444_v13 = vpop.f32.mrf.mxu1  ;;  %6768 = vmatmul.mubr.bf16.vlgmr.msra.gmra.mxu1 %v9005_v9  ;;  %v6404_v57 = vadd.f32 %v6403_v41, %v6363_v10 }
 0x729   :  { %v6405_v30 = vpop.f32.mrf.mxu0 }
 0x72a   :  { %v6446_v15 = vpop.f32.mrf.mxu1  ;;  %v6445_v11 = vadd.f32 %v6444_v13, %v6404_v57  ;;  %v6406_v34 = vadd.f32 %v6405_v30, %v6365_v56 }
 0x72b   :  { %v6407_v0 = vpop.f32.mrf.mxu0 }
 0x72c   :  { %v6448_v52 = vpop.f32.mrf.mxu1  ;;  %8553 = vtanh.f32 %v6445_v11  ;;  %v6447_v33 = vadd.f32 %v6446_v15, %v6406_v34 }
 0x72d   :  { %v6408_v35 = vpop.f32.mrf.mxu0 }
 0x72e   :  { %v6449_v61 = vpop.f32.mrf.mxu1  ;;  %8555 = vtanh.f32 %v6447_v33 }
 0x739   :  { %v8554_v7 = vpop.eup %8553 }
 0x73a   :  { %6784 = vst [vmem:[#allocation14 + $0x10] sm:$0xff] %v8554_v7 }
 0x73b   :  { %v8556_v36 = vpop.eup %8555 }
 0x73c   :  { %6785 = vst [vmem:[#allocation14 + $0x18] sm:$0xff] %v8556_v36 }
 0x767   :  { %v6485_v3 = vpop.f32.mrf.mxu0 }
 0x768   :  { %v6526_v9 = vpop.f32.mrf.mxu1  ;;  %v6486_v43 = vadd.f32 %v6485_v3, %v3803_v40 }
 0x769   :  { %v6487_v38 = vpop.f32.mrf.mxu0 }
 0x76a   :  { %v6528_v17 = vpop.f32.mrf.mxu1  ;;  %v6488_v62 = vadd.f32 %v6487_v38, %v3807_v42  ;;  %v6527_v44 = vadd.f32 %v6526_v9, %v6486_v43 }
 0x76b   :  { %v6489_v59 = vpop.f32.mrf.mxu0 }
 0x76c   :  { %v6530_v39 = vpop.f32.mrf.mxu1  ;;  %v6529_v47 = vadd.f32 %v6528_v17, %v6488_v62 }
 0x76d   :  { %v6490_v4 = vpop.f32.mrf.mxu0 }
 0x76e   :  { %v6531_v55 = vpop.f32.mrf.mxu1 }
 0x7a7   :  { %v6567_v45 = vpop.f32.mrf.mxu0 }
 0x7a8   :  { %v6608_v46 = vpop.f32.mrf.mxu1  ;;  %v6568_v48 = vadd.f32 %v6567_v45, %v6527_v44 }
 0x7a9   :  { %v6569_v51 = vpop.f32.mrf.mxu0 }
 0x7aa   :  { %v6610_v58 = vpop.f32.mrf.mxu1  ;;  %v6609_v1 = vadd.f32 %v6608_v46, %v6568_v48  ;;  %v6570_v49 = vadd.f32 %v6569_v51, %v6529_v47 }
 0x7ab   :  { %v6571_v50 = vpop.f32.mrf.mxu0 }
 0x7ac   :  { %v6612_v63 = vpop.f32.mrf.mxu1  ;;  %8557 = vtanh.f32 %v6609_v1  ;;  %v6611_v14 = vadd.f32 %v6610_v58, %v6570_v49 }
 0x7ad   :  { %v6572_v2 = vpop.f32.mrf.mxu0 }
 0x7ae   :  { %v6613_v53 = vpop.f32.mrf.mxu1  ;;  %8559 = vtanh.f32 %v6611_v14 }
 0x7b9   :  { %v8558_v29 = vpop.eup %8557 }
 0x7ba   :  { %6786 = vst [vmem:[#allocation14 + $0x20] sm:$0xff] %v8558_v29 }
 0x7bb   :  { %v8560_v54 = vpop.eup %8559 }
 0x7bc   :  { %6787 = vst [vmem:[#allocation14 + $0x28] sm:$0xff] %v8560_v54 }
 0x7c7   :  { %v7646_v60 = vpop.f32.mrf.mxu0 }
 0x7c8   :  { %v7668_v32 = vpop.f32.mrf.mxu1 }
 0x7c9   :  { %v7647_v5 = vpop.f32.mrf.mxu0 }
 0x7ca   :  { %v7669_v6 = vpop.f32.mrf.mxu1  ;;  %v7648_v21 = vadd.f32 %v7647_v5, %v7646_v60 }
 0x7cb   :  { %v7649_v19 = vpop.f32.mrf.mxu0  ;;  %v7670_v23 = vadd.f32 %v7669_v6, %v7668_v32 }
 0x7cc   :  { %v7671_v20 = vpop.f32.mrf.mxu1  ;;  %v6650_v22 = vadd.f32 %v7648_v21, %v3811_v37 }
 0x7cd   :  { %v7650_v18 = vpop.f32.mrf.mxu0 }
 0x7ce   :  { %v7672_v31 = vpop.f32.mrf.mxu1  ;;  %v6690_v27 = vadd.f32 %v7670_v23, %v6650_v22 }
 0x7e7   :  { %v7690_v24 = vpop.f32.mrf.mxu0 }
 0x7e8   :  { %v7712_v12 = vpop.f32.mrf.mxu1 }
 0x7e9   :  { %v7691_v25 = vpop.f32.mrf.mxu0 }
 0x7ea   :  { %v7713_v26 = vpop.f32.mrf.mxu1  ;;  %v7692_v28 = vadd.f32 %v7691_v25, %v7690_v24 }
 0x7eb   :  { %v7693_v10 = vpop.f32.mrf.mxu0  ;;  %v7714_v56 = vadd.f32 %v7713_v26, %v7712_v12 }
 0x7ec   :  { %v7715_v41 = vpop.f32.mrf.mxu1  ;;  %v6730_v13 = vadd.f32 %v7692_v28, %v6690_v27 }
 0x7ed   :  { %v7694_v57 = vpop.f32.mrf.mxu0 }
 0x7ee   :  { %v7716_v30 = vpop.f32.mrf.mxu1  ;;  %v6770_v15 = vadd.f32 %v7714_v56, %v6730_v13 }
 0x7f0   :  { %8561 = vtanh.f32 %v6770_v15 }
 0x7fd   :  { %v8562_v8 = vpop.eup %8561 }
 0x7fe   :  { %6788 = vst [vmem:[#allocation14 + $0x30] sm:$0xff] %v8562_v8 }
 0x7ff   :  { %8714 = shalt.err (!%p8711_p11)
}
 0x800   :  { %6798 = dma.vmem_to_hbm [thread:$0]  %s6796_s5, 896, %s9083_s7, [#allocation8]  }
 0x801   :  { %8735 = dma.done.wait [#allocation8], 896  }
 0x802   :  { %8736 = vsyncadd [#allocation8], 4294966400 }
 0x803   :  { %6802 = vsyncpa [#allocation7], 1 }
 0x804   :  { %6803 = vsyncpa [#allocation10], 1 }
 0x805   :  { %6804 = vsyncpa [#allocation13], 1 }
 0x806   :  { %6805 = vsyncpa [#allocation8], 1 }
 0x807   :  { %6806 = vsyncmov [#allocation5] }
 0x80a   :  { %s6807_s15 = vpop.sfrf %6806 }
 0x80b   :  { %p7618_p12 = scmp.ne.s32.totalorder %s6807_s15, 0 }
 0x80d   :  { %6811 = shalt.err (%p7618_p12)  }
 0x80e   :  { %6813 = vsyncmov [#allocation5 + $0x1] }
 0x811   :  { %s6814_s1 = vpop.sfrf %6813 }
 0x812   :  { %p7619_p13 = scmp.ne.s32.totalorder %s6814_s1, 0 }
 0x814   :  { %6818 = shalt.err (%p7619_p13)  }
 0x815   :  { %6820 = vsyncmov [#allocation5 + $0x2] }
 0x818   :  { %s6821_s16 = vpop.sfrf %6820 }
 0x819   :  { %p7620_p0 = scmp.ne.s32.totalorder %s6821_s16, 0 }
 0x81b   :  { %6825 = shalt.err (%p7620_p0)  }

</bundles_post_ra>
